<compile_context>
chip_gen: v5e
topology: v5e:2x2
jax: 0.10.0
libtpu: 0.0.40
codegen_flags: <defaults>
</compile_context>

<pallas_src>
import jax
import jax.numpy as jnp
from jax.experimental import pallas as pl
from jax.experimental.pallas import tpu as pltpu


# ----------------------------- Pallas kernel ------------------------------ #

def _bottleneck_kernel(x_ref,
                       w1_ref, b1_ref, w2_ref, b2_ref, w3_ref, b3_ref,
                       g1w_ref, g1b_ref, g2w_ref, g2b_ref, g3w_ref, g3b_ref,
                       m_mid_ref, mt_mid_ref, m_out_ref, mt_out_ref,
                       out_ref, ypad_ref):
    """Fused bottleneck block for one batch element (channels-last).

    x_ref:    (H, W, Cin)   input image (Cin == Cout, stride == 1)
    w1_ref:   (Cin, Cmid)   1x1 conv weights          b1_ref: (1, Cmid)
    w2_ref:   (3, 3, Cmid, Cmid) 3x3 conv weights     b2_ref: (1, Cmid)
    w3_ref:   (Cmid, Cout)  1x1 conv weights          b3_ref: (1, Cout)
    g*w/g*b:  (1, C)        GroupNorm affine params
    m_* / mt_*: (C, G) / (G, C) 0-1 group membership matrices
    out_ref:  (H, W, Cout)
    ypad_ref: VMEM scratch (H+2, W+2, Cmid) zero-padded conv2 input.
    """
    H, W, Cin = x_ref.shape
    Cmid = w1_ref.shape[1]
    Cout = w3_ref.shape[1]
    G = m_mid_ref.shape[1]
    HW = H * W
    eps = 1e-5

    def group_norm(y, m, mt, gamma, beta, n_per_group):
        # y: (HW, C) f32.  Group stats via membership-matrix matmuls.
        s = jnp.dot(jnp.sum(y, axis=0, keepdims=True), m,
                    preferred_element_type=jnp.float32)            # (1, G)
        ss = jnp.dot(jnp.sum(y * y, axis=0, keepdims=True), m,
                     preferred_element_type=jnp.float32)           # (1, G)
        inv_n = 1.0 / float(n_per_group)
        mean = s * inv_n
        var = ss * inv_n - mean * mean
        mean_c = jnp.dot(mean, mt, preferred_element_type=jnp.float32)  # (1, C)
        inv_c = jnp.dot(jax.lax.rsqrt(var + eps), mt,
                        preferred_element_type=jnp.float32)             # (1, C)
        return (y - mean_c) * inv_c * gamma + beta

    x = x_ref[...].astype(jnp.float32).reshape(HW, Cin)

    # ---- conv1 (1x1) + GroupNorm + ReLU ----
    y = jnp.dot(x, w1_ref[...], preferred_element_type=jnp.float32) + b1_ref[...]
    y = group_norm(y, m_mid_ref[...], mt_mid_ref[...],
                   g1w_ref[...], g1b_ref[...], HW * (Cmid // G))
    y = jnp.maximum(y, 0.0)

    # ---- conv2 (3x3, pad 1) + GroupNorm + ReLU ----
    # Re-zero only the 4 halo strips; the centre is fully overwritten below.
    ypad_ref[0:1, :, :] = jnp.zeros((1, W + 2, Cmid), jnp.float32)
    ypad_ref[H + 1:H + 2, :, :] = jnp.zeros((1, W + 2, Cmid), jnp.float32)
    ypad_ref[1:H + 1, 0:1, :] = jnp.zeros((H, 1, Cmid), jnp.float32)
    ypad_ref[1:H + 1, W + 1:W + 2, :] = jnp.zeros((H, 1, Cmid), jnp.float32)
    ypad_ref[1:H + 1, 1:W + 1, :] = y.reshape(H, W, Cmid)
    ypad = ypad_ref[...]
    w2_all = w2_ref[...]

    acc = None
    for dy in range(3):                      # static unroll over the 9 taps
        for dx in range(3):
            tap = ypad[dy:dy + H, dx:dx + W, :].reshape(HW, Cmid)
            contrib = jnp.dot(tap, w2_all[dy, dx],
                              preferred_element_type=jnp.float32)
            acc = contrib if acc is None else acc + contrib
    y = acc + b2_ref[...]
    y = group_norm(y, m_mid_ref[...], mt_mid_ref[...],
                   g2w_ref[...], g2b_ref[...], HW * (Cmid // G))
    y = jnp.maximum(y, 0.0)

    # ---- conv3 (1x1) + GroupNorm + ReLU ----
    y = jnp.dot(y, w3_ref[...], preferred_element_type=jnp.float32) + b3_ref[...]
    y = group_norm(y, m_out_ref[...], mt_out_ref[...],
                   g3w_ref[...], g3b_ref[...], HW * (Cout // G))
    y = jnp.maximum(y, 0.0)

    # ---- residual + ReLU (stride == 1 -> identity shortcut) ----
    out = jnp.maximum(x + y, 0.0)
    out_ref[...] = out.reshape(H, W, Cout).astype(out_ref.dtype)


# ------------------------------- glue / API -------------------------------- #

def _membership(C, G):
    gsize = C // G
    m = (jnp.arange(C)[:, None] // gsize == jnp.arange(G)[None, :])
    m = m.astype(jnp.float32)
    return m, jnp.transpose(m)


def prepare_params(raw, planes):
    """torch-layout params -> kernel layout (channels-last matmul weights)."""
    G = planes // 8
    m_mid, mt_mid = _membership(planes // 4, G)
    m_out, mt_out = _membership(planes, G)
    return dict(
        w1=jnp.transpose(raw["w1"][:, :, 0, 0], (1, 0)),        # (Cin, Cmid)
        b1=raw["b1"].reshape(1, -1),
        w2=jnp.transpose(raw["w2"], (2, 3, 1, 0)),              # (3,3,Cmid,Cmid)
        b2=raw["b2"].reshape(1, -1),
        w3=jnp.transpose(raw["w3"][:, :, 0, 0], (1, 0)),        # (Cmid, Cout)
        b3=raw["b3"].reshape(1, -1),
        g1w=raw["gn1_w"].reshape(1, -1), g1b=raw["gn1_b"].reshape(1, -1),
        g2w=raw["gn2_w"].reshape(1, -1), g2b=raw["gn2_b"].reshape(1, -1),
        g3w=raw["gn3_w"].reshape(1, -1), g3b=raw["gn3_b"].reshape(1, -1),
        m_mid=m_mid, mt_mid=mt_mid, m_out=m_out, mt_out=mt_out,
    )


def bottleneck_forward(x_nchw, p):
    """Matches BottleneckBlock.forward(x) with norm_fn='group', stride=1."""
    # TODO(synk): stride != 1 (downsample branch) and batch/instance/none norms
    # are not implemented; module defaults (group norm, stride=1) are covered.
    B, Cin, H, W = x_nchw.shape
    Cmid = p["w1"].shape[1]
    Cout = p["w3"].shape[1]
    G = p["m_mid"].shape[1]

    x_l = jnp.transpose(x_nchw, (0, 2, 3, 1))          # (B, H, W, Cin)

    batch4 = lambda b: (b, 0, 0, 0)
    c2 = lambda b: (0, 0)
    c4 = lambda b: (0, 0, 0, 0)

    out_l = pl.pallas_call(
        _bottleneck_kernel,
        out_shape=jax.ShapeDtypeStruct((B, H, W, Cout), x_nchw.dtype),
        grid=(B,),
        in_specs=[
            pl.BlockSpec((None, H, W, Cin), batch4),
            pl.BlockSpec((Cin, Cmid), c2),
            pl.BlockSpec((1, Cmid), c2),
            pl.BlockSpec((3, 3, Cmid, Cmid), c4),
            pl.BlockSpec((1, Cmid), c2),
            pl.BlockSpec((Cmid, Cout), c2),
            pl.BlockSpec((1, Cout), c2),
            pl.BlockSpec((1, Cmid), c2),
            pl.BlockSpec((1, Cmid), c2),
            pl.BlockSpec((1, Cmid), c2),
            pl.BlockSpec((1, Cmid), c2),
            pl.BlockSpec((1, Cout), c2),
            pl.BlockSpec((1, Cout), c2),
            pl.BlockSpec((Cmid, G), c2),
            pl.BlockSpec((G, Cmid), c2),
            pl.BlockSpec((Cout, G), c2),
            pl.BlockSpec((G, Cout), c2),
        ],
        out_specs=pl.BlockSpec((None, H, W, Cout), batch4),
        scratch_shapes=[pltpu.VMEM((H + 2, W + 2, Cmid), jnp.float32)],
        compiler_params=pltpu.CompilerParams(
            dimension_semantics=("parallel",)),
    )(x_l, p["w1"], p["b1"], p["w2"], p["b2"], p["w3"], p["b3"],
      p["g1w"], p["g1b"], p["g2w"], p["g2b"], p["g3w"], p["g3b"],
      p["m_mid"], p["mt_mid"], p["m_out"], p["mt_out"])

    return jnp.transpose(out_l, (0, 3, 1, 2))          # back to NCHW


# ----------------------------- pure-JAX reference -------------------------- #

def _conv2d_ref(x, w, b, pad):
    out = jax.lax.conv_general_dilated(
        x, w, window_strides=(1, 1), padding=((pad, pad), (pad, pad)),
        dimension_numbers=("NCHW", "OIHW", "NCHW"))
    return out + b[None, :, None, None]


def _group_norm_ref(x, gamma, beta, G, eps=1e-5):
    B, C, H, W = x.shape
    xg = x.reshape(B, G, C // G, H, W)
    mean = jnp.mean(xg, axis=(2, 3, 4), keepdims=True)
    var = jnp.mean((xg - mean) ** 2, axis=(2, 3, 4), keepdims=True)
    xn = ((xg - mean) / jnp.sqrt(var + eps)).reshape(B, C, H, W)
    return xn * gamma[None, :, None, None] + beta[None, :, None, None]


def bottleneck_ref(x, raw, planes):
    G = planes // 8
    y = jax.nn.relu(_group_norm_ref(_conv2d_ref(x, raw["w1"], raw["b1"], 0),
                                    raw["gn1_w"], raw["gn1_b"], G))
    y = jax.nn.relu(_group_norm_ref(_conv2d_ref(y, raw["w2"], raw["b2"], 1),
                                    raw["gn2_w"], raw["gn2_b"], G))
    y = jax.nn.relu(_group_norm_ref(_conv2d_ref(y, raw["w3"], raw["b3"], 0),
                                    raw["gn3_w"], raw["gn3_b"], G))
    return jax.nn.relu(x + y)


# ---------------------------------- main ----------------------------------- #

def init_raw_params(key, in_planes, planes):
    Cmid = planes // 4
    keys = jax.random.split(key, 12)

    def rnd(k, shape, scale):
        return scale * jax.random.normal(k, shape, jnp.float32)

    return dict(
        w1=rnd(keys[0], (Cmid, in_planes, 1, 1), 0.2),
        b1=rnd(keys[1], (Cmid,), 0.1),
        w2=rnd(keys[2], (Cmid, Cmid, 3, 3), 0.2),
        b2=rnd(keys[3], (Cmid,), 0.1),
        w3=rnd(keys[4], (planes, Cmid, 1, 1), 0.2),
        b3=rnd(keys[5], (planes,), 0.1),
        gn1_w=1.0 + rnd(keys[6], (Cmid,), 0.1),
        gn1_b=rnd(keys[7], (Cmid,), 0.1),
        gn2_w=1.0 + rnd(keys[8], (Cmid,), 0.1),
        gn2_b=rnd(keys[9], (Cmid,), 0.1),
        gn3_w=1.0 + rnd(keys[10], (planes,), 0.1),
        gn3_b=rnd(keys[11], (planes,), 0.1),
    )


if __name__ == "__main__":
    # BottleneckBlock(in_planes=32, planes=32, norm_fn='group', stride=1)
    B, IN_PLANES, PLANES, H, W = 2, 32, 32, 16, 16

    key = jax.random.PRNGKey(0)
    kp, kx = jax.random.split(key)

    raw = init_raw_params(kp, IN_PLANES, PLANES)
    params = prepare_params(raw, PLANES)
    x = jax.random.normal(kx, (B, IN_PLANES, H, W), jnp.float32)

    fwd = jax.jit(bottleneck_forward)
    out = jax.block_until_ready(fwd(x, params))

    ref = jax.block_until_ready(bottleneck_ref(x, raw, PLANES))
    assert out.shape == ref.shape == (B, PLANES, H, W)
    max_err = float(jnp.max(jnp.abs(out - ref)))
    assert max_err < 1e-2, f"mismatch vs reference: max_err={max_err}"

    print("KERNEL_OK")
</pallas_src>

<mosaic_0001>
module attributes {stable_mosaic.version = 11 : i64} {
  func.func @_bottleneck_kernel(%arg0: i32, %arg1: memref<1x16x16x32xf32, #tpu.memory_space<vmem>>, %arg2: memref<32x8xf32, #tpu.memory_space<vmem>>, %arg3: memref<1x8xf32, #tpu.memory_space<vmem>>, %arg4: memref<3x3x8x8xf32, #tpu.memory_space<vmem>>, %arg5: memref<1x8xf32, #tpu.memory_space<vmem>>, %arg6: memref<8x32xf32, #tpu.memory_space<vmem>>, %arg7: memref<1x32xf32, #tpu.memory_space<vmem>>, %arg8: memref<1x8xf32, #tpu.memory_space<vmem>>, %arg9: memref<1x8xf32, #tpu.memory_space<vmem>>, %arg10: memref<1x8xf32, #tpu.memory_space<vmem>>, %arg11: memref<1x8xf32, #tpu.memory_space<vmem>>, %arg12: memref<1x32xf32, #tpu.memory_space<vmem>>, %arg13: memref<1x32xf32, #tpu.memory_space<vmem>>, %arg14: memref<8x4xf32, #tpu.memory_space<vmem>>, %arg15: memref<4x8xf32, #tpu.memory_space<vmem>>, %arg16: memref<32x4xf32, #tpu.memory_space<vmem>>, %arg17: memref<4x32xf32, #tpu.memory_space<vmem>>, %arg18: memref<1x16x16x32xf32, #tpu.memory_space<vmem>>, %arg19: memref<18x18x8xf32, #tpu.memory_space<vmem>>) attributes {dimension_semantics = [#tpu.dimension_semantics<parallel>], iteration_bounds = array<i64: 2>, scalar_prefetch = 0 : i64, scratch_operands = 1 : i64, tpu.core_type = #tpu.core_type<tc>, window_params = [{transform_indices = @transform_0, window_bounds = array<i64: 1, 16, 16, 32>}, {pipeline_mode = #tpu.pipeline_mode<synchronous>, transform_indices = @transform_1, window_bounds = array<i64: 32, 8>}, {pipeline_mode = #tpu.pipeline_mode<synchronous>, transform_indices = @transform_2, window_bounds = array<i64: 1, 8>}, {pipeline_mode = #tpu.pipeline_mode<synchronous>, transform_indices = @transform_3, window_bounds = array<i64: 3, 3, 8, 8>}, {pipeline_mode = #tpu.pipeline_mode<synchronous>, transform_indices = @transform_4, window_bounds = array<i64: 1, 8>}, {pipeline_mode = #tpu.pipeline_mode<synchronous>, transform_indices = @transform_5, window_bounds = array<i64: 8, 32>}, {pipeline_mode = #tpu.pipeline_mode<synchronous>, transform_indices = @transform_6, window_bounds = array<i64: 1, 32>}, {pipeline_mode = #tpu.pipeline_mode<synchronous>, transform_indices = @transform_7, window_bounds = array<i64: 1, 8>}, {pipeline_mode = #tpu.pipeline_mode<synchronous>, transform_indices = @transform_8, window_bounds = array<i64: 1, 8>}, {pipeline_mode = #tpu.pipeline_mode<synchronous>, transform_indices = @transform_9, window_bounds = array<i64: 1, 8>}, {pipeline_mode = #tpu.pipeline_mode<synchronous>, transform_indices = @transform_10, window_bounds = array<i64: 1, 8>}, {pipeline_mode = #tpu.pipeline_mode<synchronous>, transform_indices = @transform_11, window_bounds = array<i64: 1, 32>}, {pipeline_mode = #tpu.pipeline_mode<synchronous>, transform_indices = @transform_12, window_bounds = array<i64: 1, 32>}, {pipeline_mode = #tpu.pipeline_mode<synchronous>, transform_indices = @transform_13, window_bounds = array<i64: 8, 4>}, {pipeline_mode = #tpu.pipeline_mode<synchronous>, transform_indices = @transform_14, window_bounds = array<i64: 4, 8>}, {pipeline_mode = #tpu.pipeline_mode<synchronous>, transform_indices = @transform_15, window_bounds = array<i64: 32, 4>}, {pipeline_mode = #tpu.pipeline_mode<synchronous>, transform_indices = @transform_16, window_bounds = array<i64: 4, 32>}, {transform_indices = @transform_17, window_bounds = array<i64: 1, 16, 16, 32>}]} {
    %c0 = arith.constant 0 : index
    %c0_0 = arith.constant 0 : index
    %c0_1 = arith.constant 0 : index
    %c0_2 = arith.constant 0 : index
    %0 = vector.load %arg1[%c0, %c0_0, %c0_1, %c0_2] : memref<1x16x16x32xf32, #tpu.memory_space<vmem>>, vector<1x16x16x32xf32>
    %1 = vector.shape_cast %0 : vector<1x16x16x32xf32> to vector<16x16x32xf32>
    %2 = vector.shape_cast %1 : vector<16x16x32xf32> to vector<256x32xf32>
    %c0_3 = arith.constant 0 : index
    %c0_4 = arith.constant 0 : index
    %3 = vector.load %arg2[%c0_3, %c0_4] : memref<32x8xf32, #tpu.memory_space<vmem>>, vector<32x8xf32>
    %cst = arith.constant dense<0.000000e+00> : vector<256x8xf32>
    %4 = tpu.matmul %2, %3, %cst {dimension_numbers = #tpu.dot_dimension_numbers<[1], [0], [0], [1], [0, 0, 1, 1], [], []>} : vector<256x32xf32>, vector<32x8xf32>, vector<256x8xf32> -> vector<256x8xf32>
    %c0_5 = arith.constant 0 : index
    %c0_6 = arith.constant 0 : index
    %5 = vector.load %arg3[%c0_5, %c0_6] : memref<1x8xf32, #tpu.memory_space<vmem>>, vector<1x8xf32>
    %6 = vector.broadcast %5 : vector<1x8xf32> to vector<256x8xf32>
    %7 = arith.addf %4, %6 : vector<256x8xf32>
    %c0_7 = arith.constant 0 : index
    %c0_8 = arith.constant 0 : index
    %8 = vector.load %arg14[%c0_7, %c0_8] : memref<8x4xf32, #tpu.memory_space<vmem>>, vector<8x4xf32>
    %c0_9 = arith.constant 0 : index
    %c0_10 = arith.constant 0 : index
    %9 = vector.load %arg15[%c0_9, %c0_10] : memref<4x8xf32, #tpu.memory_space<vmem>>, vector<4x8xf32>
    %c0_11 = arith.constant 0 : index
    %c0_12 = arith.constant 0 : index
    %10 = vector.load %arg8[%c0_11, %c0_12] : memref<1x8xf32, #tpu.memory_space<vmem>>, vector<1x8xf32>
    %c0_13 = arith.constant 0 : index
    %c0_14 = arith.constant 0 : index
    %11 = vector.load %arg9[%c0_13, %c0_14] : memref<1x8xf32, #tpu.memory_space<vmem>>, vector<1x8xf32>
    %cst_15 = arith.constant dense<0.000000e+00> : vector<8xf32>
    %12 = vector.multi_reduction <add>, %7, %cst_15 [0] : vector<256x8xf32> to vector<8xf32>
    %13 = vector.shape_cast %12 : vector<8xf32> to vector<1x8xf32>
    %cst_16 = arith.constant dense<0.000000e+00> : vector<1x4xf32>
    %14 = tpu.matmul %13, %8, %cst_16 {dimension_numbers = #tpu.dot_dimension_numbers<[1], [0], [0], [1], [0, 0, 1, 1], [], []>} : vector<1x8xf32>, vector<8x4xf32>, vector<1x4xf32> -> vector<1x4xf32>
    %15 = arith.mulf %7, %7 : vector<256x8xf32>
    %cst_17 = arith.constant dense<0.000000e+00> : vector<8xf32>
    %16 = vector.multi_reduction <add>, %15, %cst_17 [0] : vector<256x8xf32> to vector<8xf32>
    %17 = vector.shape_cast %16 : vector<8xf32> to vector<1x8xf32>
    %cst_18 = arith.constant dense<0.000000e+00> : vector<1x4xf32>
    %18 = tpu.matmul %17, %8, %cst_18 {dimension_numbers = #tpu.dot_dimension_numbers<[1], [0], [0], [1], [0, 0, 1, 1], [], []>} : vector<1x8xf32>, vector<8x4xf32>, vector<1x4xf32> -> vector<1x4xf32>
    %cst_19 = arith.constant 0.001953125 : f32
    %19 = vector.broadcast %cst_19 : f32 to vector<1x4xf32>
    %20 = arith.mulf %14, %19 : vector<1x4xf32>
    %cst_20 = arith.constant 0.001953125 : f32
    %21 = vector.broadcast %cst_20 : f32 to vector<1x4xf32>
    %22 = arith.mulf %18, %21 : vector<1x4xf32>
    %23 = arith.mulf %20, %20 : vector<1x4xf32>
    %24 = arith.subf %22, %23 : vector<1x4xf32>
    %cst_21 = arith.constant dense<0.000000e+00> : vector<1x8xf32>
    %25 = tpu.matmul %20, %9, %cst_21 {dimension_numbers = #tpu.dot_dimension_numbers<[1], [0], [0], [1], [0, 0, 1, 1], [], []>} : vector<1x4xf32>, vector<4x8xf32>, vector<1x8xf32> -> vector<1x8xf32>
    %cst_22 = arith.constant 9.99999974E-6 : f32
    %26 = vector.broadcast %cst_22 : f32 to vector<1x4xf32>
    %27 = arith.addf %24, %26 : vector<1x4xf32>
    %28 = math.rsqrt %27 : vector<1x4xf32>
    %cst_23 = arith.constant dense<0.000000e+00> : vector<1x8xf32>
    %29 = tpu.matmul %28, %9, %cst_23 {dimension_numbers = #tpu.dot_dimension_numbers<[1], [0], [0], [1], [0, 0, 1, 1], [], []>} : vector<1x4xf32>, vector<4x8xf32>, vector<1x8xf32> -> vector<1x8xf32>
    %30 = vector.broadcast %25 : vector<1x8xf32> to vector<256x8xf32>
    %31 = arith.subf %7, %30 : vector<256x8xf32>
    %32 = vector.broadcast %29 : vector<1x8xf32> to vector<256x8xf32>
    %33 = arith.mulf %31, %32 : vector<256x8xf32>
    %34 = vector.broadcast %10 : vector<1x8xf32> to vector<256x8xf32>
    %35 = arith.mulf %33, %34 : vector<256x8xf32>
    %36 = vector.broadcast %11 : vector<1x8xf32> to vector<256x8xf32>
    %37 = arith.addf %35, %36 : vector<256x8xf32>
    %cst_24 = arith.constant 0.000000e+00 : f32
    %38 = vector.broadcast %cst_24 : f32 to vector<256x8xf32>
    %39 = arith.maximumf %37, %38 : vector<256x8xf32>
    %cst_25 = arith.constant 0.000000e+00 : f32
    %40 = vector.broadcast %cst_25 : f32 to vector<1x18x8xf32>
    %c0_26 = arith.constant 0 : index
    %c0_27 = arith.constant 0 : index
    %c0_28 = arith.constant 0 : index
    %41 = vector.load %arg19[%c0_26, %c0_27, %c0_28] : memref<18x18x8xf32, #tpu.memory_space<vmem>>, vector<1x18x8xf32>
    tpu.vector_store %arg19[%c0_26, %c0_27, %c0_28], %40 {strides = array<i32>} : memref<18x18x8xf32, #tpu.memory_space<vmem>>, vector<1x18x8xf32>,
    %cst_29 = arith.constant 0.000000e+00 : f32
    %42 = vector.broadcast %cst_29 : f32 to vector<1x18x8xf32>
    %c17 = arith.constant 17 : index
    %c0_30 = arith.constant 0 : index
    %c0_31 = arith.constant 0 : index
    %43 = vector.load %arg19[%c17, %c0_30, %c0_31] : memref<18x18x8xf32, #tpu.memory_space<vmem>>, vector<1x18x8xf32>
    tpu.vector_store %arg19[%c17, %c0_30, %c0_31], %42 {strides = array<i32>} : memref<18x18x8xf32, #tpu.memory_space<vmem>>, vector<1x18x8xf32>,
    %cst_32 = arith.constant 0.000000e+00 : f32
    %44 = vector.broadcast %cst_32 : f32 to vector<16x1x8xf32>
    %c1 = arith.constant 1 : index
    %c0_33 = arith.constant 0 : index
    %c0_34 = arith.constant 0 : index
    %45 = vector.load %arg19[%c1, %c0_33, %c0_34] : memref<18x18x8xf32, #tpu.memory_space<vmem>>, vector<16x1x8xf32>
    tpu.vector_store %arg19[%c1, %c0_33, %c0_34], %44 {strides = array<i32>} : memref<18x18x8xf32, #tpu.memory_space<vmem>>, vector<16x1x8xf32>,
    %cst_35 = arith.constant 0.000000e+00 : f32
    %46 = vector.broadcast %cst_35 : f32 to vector<16x1x8xf32>
    %c1_36 = arith.constant 1 : index
    %c17_37 = arith.constant 17 : index
    %c0_38 = arith.constant 0 : index
    %47 = vector.load %arg19[%c1_36, %c17_37, %c0_38] : memref<18x18x8xf32, #tpu.memory_space<vmem>>, vector<16x1x8xf32>
    tpu.vector_store %arg19[%c1_36, %c17_37, %c0_38], %46 {strides = array<i32>} : memref<18x18x8xf32, #tpu.memory_space<vmem>>, vector<16x1x8xf32>,
    %48 = vector.shape_cast %39 : vector<256x8xf32> to vector<16x16x8xf32>
    %c1_39 = arith.constant 1 : index
    %c1_40 = arith.constant 1 : index
    %c0_41 = arith.constant 0 : index
    %49 = vector.load %arg19[%c1_39, %c1_40, %c0_41] : memref<18x18x8xf32, #tpu.memory_space<vmem>>, vector<16x16x8xf32>
    tpu.vector_store %arg19[%c1_39, %c1_40, %c0_41], %48 {strides = array<i32>} : memref<18x18x8xf32, #tpu.memory_space<vmem>>, vector<16x16x8xf32>,
    %c0_42 = arith.constant 0 : index
    %c0_43 = arith.constant 0 : index
    %c0_44 = arith.constant 0 : index
    %50 = vector.load %arg19[%c0_42, %c0_43, %c0_44] : memref<18x18x8xf32, #tpu.memory_space<vmem>>, vector<18x18x8xf32>
    %c0_45 = arith.constant 0 : index
    %c0_46 = arith.constant 0 : index
    %c0_47 = arith.constant 0 : index
    %c0_48 = arith.constant 0 : index
    %51 = vector.load %arg4[%c0_45, %c0_46, %c0_47, %c0_48] : memref<3x3x8x8xf32, #tpu.memory_space<vmem>>, vector<3x3x8x8xf32>
    %52 = vector.extract_strided_slice %50 {offsets = [0, 0, 0], sizes = [16, 16, 8], strides = [1, 1, 1]} : vector<18x18x8xf32> to vector<16x16x8xf32>
    %53 = vector.shape_cast %52 : vector<16x16x8xf32> to vector<256x8xf32>
    %54 = vector.extract_strided_slice %51 {offsets = [0, 0, 0, 0], sizes = [1, 1, 8, 8], strides = [1, 1, 1, 1]} : vector<3x3x8x8xf32> to vector<1x1x8x8xf32>
    %55 = vector.shape_cast %54 : vector<1x1x8x8xf32> to vector<8x8xf32>
    %cst_49 = arith.constant dense<0.000000e+00> : vector<256x8xf32>
    %56 = tpu.matmul %53, %55, %cst_49 {dimension_numbers = #tpu.dot_dimension_numbers<[1], [0], [0], [1], [0, 0, 1, 1], [], []>} : vector<256x8xf32>, vector<8x8xf32>, vector<256x8xf32> -> vector<256x8xf32>
    %57 = vector.extract_strided_slice %50 {offsets = [0, 1, 0], sizes = [16, 16, 8], strides = [1, 1, 1]} : vector<18x18x8xf32> to vector<16x16x8xf32>
    %58 = vector.shape_cast %57 : vector<16x16x8xf32> to vector<256x8xf32>
    %59 = vector.extract_strided_slice %51 {offsets = [0, 1, 0, 0], sizes = [1, 1, 8, 8], strides = [1, 1, 1, 1]} : vector<3x3x8x8xf32> to vector<1x1x8x8xf32>
    %60 = vector.shape_cast %59 : vector<1x1x8x8xf32> to vector<8x8xf32>
    %cst_50 = arith.constant dense<0.000000e+00> : vector<256x8xf32>
    %61 = tpu.matmul %58, %60, %cst_50 {dimension_numbers = #tpu.dot_dimension_numbers<[1], [0], [0], [1], [0, 0, 1, 1], [], []>} : vector<256x8xf32>, vector<8x8xf32>, vector<256x8xf32> -> vector<256x8xf32>
    %62 = arith.addf %56, %61 : vector<256x8xf32>
    %63 = vector.extract_strided_slice %50 {offsets = [0, 2, 0], sizes = [16, 16, 8], strides = [1, 1, 1]} : vector<18x18x8xf32> to vector<16x16x8xf32>
    %64 = vector.shape_cast %63 : vector<16x16x8xf32> to vector<256x8xf32>
    %65 = vector.extract_strided_slice %51 {offsets = [0, 2, 0, 0], sizes = [1, 1, 8, 8], strides = [1, 1, 1, 1]} : vector<3x3x8x8xf32> to vector<1x1x8x8xf32>
    %66 = vector.shape_cast %65 : vector<1x1x8x8xf32> to vector<8x8xf32>
    %cst_51 = arith.constant dense<0.000000e+00> : vector<256x8xf32>
    %67 = tpu.matmul %64, %66, %cst_51 {dimension_numbers = #tpu.dot_dimension_numbers<[1], [0], [0], [1], [0, 0, 1, 1], [], []>} : vector<256x8xf32>, vector<8x8xf32>, vector<256x8xf32> -> vector<256x8xf32>
    %68 = arith.addf %62, %67 : vector<256x8xf32>
    %69 = vector.extract_strided_slice %50 {offsets = [1, 0, 0], sizes = [16, 16, 8], strides = [1, 1, 1]} : vector<18x18x8xf32> to vector<16x16x8xf32>
    %70 = vector.shape_cast %69 : vector<16x16x8xf32> to vector<256x8xf32>
    %71 = vector.extract_strided_slice %51 {offsets = [1, 0, 0, 0], sizes = [1, 1, 8, 8], strides = [1, 1, 1, 1]} : vector<3x3x8x8xf32> to vector<1x1x8x8xf32>
    %72 = vector.shape_cast %71 : vector<1x1x8x8xf32> to vector<8x8xf32>
    %cst_52 = arith.constant dense<0.000000e+00> : vector<256x8xf32>
    %73 = tpu.matmul %70, %72, %cst_52 {dimension_numbers = #tpu.dot_dimension_numbers<[1], [0], [0], [1], [0, 0, 1, 1], [], []>} : vector<256x8xf32>, vector<8x8xf32>, vector<256x8xf32> -> vector<256x8xf32>
    %74 = arith.addf %68, %73 : vector<256x8xf32>
    %75 = vector.extract_strided_slice %50 {offsets = [1, 1, 0], sizes = [16, 16, 8], strides = [1, 1, 1]} : vector<18x18x8xf32> to vector<16x16x8xf32>
    %76 = vector.shape_cast %75 : vector<16x16x8xf32> to vector<256x8xf32>
    %77 = vector.extract_strided_slice %51 {offsets = [1, 1, 0, 0], sizes = [1, 1, 8, 8], strides = [1, 1, 1, 1]} : vector<3x3x8x8xf32> to vector<1x1x8x8xf32>
    %78 = vector.shape_cast %77 : vector<1x1x8x8xf32> to vector<8x8xf32>
    %cst_53 = arith.constant dense<0.000000e+00> : vector<256x8xf32>
    %79 = tpu.matmul %76, %78, %cst_53 {dimension_numbers = #tpu.dot_dimension_numbers<[1], [0], [0], [1], [0, 0, 1, 1], [], []>} : vector<256x8xf32>, vector<8x8xf32>, vector<256x8xf32> -> vector<256x8xf32>
    %80 = arith.addf %74, %79 : vector<256x8xf32>
    %81 = vector.extract_strided_slice %50 {offsets = [1, 2, 0], sizes = [16, 16, 8], strides = [1, 1, 1]} : vector<18x18x8xf32> to vector<16x16x8xf32>
    %82 = vector.shape_cast %81 : vector<16x16x8xf32> to vector<256x8xf32>
    %83 = vector.extract_strided_slice %51 {offsets = [1, 2, 0, 0], sizes = [1, 1, 8, 8], strides = [1, 1, 1, 1]} : vector<3x3x8x8xf32> to vector<1x1x8x8xf32>
    %84 = vector.shape_cast %83 : vector<1x1x8x8xf32> to vector<8x8xf32>
    %cst_54 = arith.constant dense<0.000000e+00> : vector<256x8xf32>
    %85 = tpu.matmul %82, %84, %cst_54 {dimension_numbers = #tpu.dot_dimension_numbers<[1], [0], [0], [1], [0, 0, 1, 1], [], []>} : vector<256x8xf32>, vector<8x8xf32>, vector<256x8xf32> -> vector<256x8xf32>
    %86 = arith.addf %80, %85 : vector<256x8xf32>
    %87 = vector.extract_strided_slice %50 {offsets = [2, 0, 0], sizes = [16, 16, 8], strides = [1, 1, 1]} : vector<18x18x8xf32> to vector<16x16x8xf32>
    %88 = vector.shape_cast %87 : vector<16x16x8xf32> to vector<256x8xf32>
    %89 = vector.extract_strided_slice %51 {offsets = [2, 0, 0, 0], sizes = [1, 1, 8, 8], strides = [1, 1, 1, 1]} : vector<3x3x8x8xf32> to vector<1x1x8x8xf32>
    %90 = vector.shape_cast %89 : vector<1x1x8x8xf32> to vector<8x8xf32>
    %cst_55 = arith.constant dense<0.000000e+00> : vector<256x8xf32>
    %91 = tpu.matmul %88, %90, %cst_55 {dimension_numbers = #tpu.dot_dimension_numbers<[1], [0], [0], [1], [0, 0, 1, 1], [], []>} : vector<256x8xf32>, vector<8x8xf32>, vector<256x8xf32> -> vector<256x8xf32>
    %92 = arith.addf %86, %91 : vector<256x8xf32>
    %93 = vector.extract_strided_slice %50 {offsets = [2, 1, 0], sizes = [16, 16, 8], strides = [1, 1, 1]} : vector<18x18x8xf32> to vector<16x16x8xf32>
    %94 = vector.shape_cast %93 : vector<16x16x8xf32> to vector<256x8xf32>
    %95 = vector.extract_strided_slice %51 {offsets = [2, 1, 0, 0], sizes = [1, 1, 8, 8], strides = [1, 1, 1, 1]} : vector<3x3x8x8xf32> to vector<1x1x8x8xf32>
    %96 = vector.shape_cast %95 : vector<1x1x8x8xf32> to vector<8x8xf32>
    %cst_56 = arith.constant dense<0.000000e+00> : vector<256x8xf32>
    %97 = tpu.matmul %94, %96, %cst_56 {dimension_numbers = #tpu.dot_dimension_numbers<[1], [0], [0], [1], [0, 0, 1, 1], [], []>} : vector<256x8xf32>, vector<8x8xf32>, vector<256x8xf32> -> vector<256x8xf32>
    %98 = arith.addf %92, %97 : vector<256x8xf32>
    %99 = vector.extract_strided_slice %50 {offsets = [2, 2, 0], sizes = [16, 16, 8], strides = [1, 1, 1]} : vector<18x18x8xf32> to vector<16x16x8xf32>
    %100 = vector.shape_cast %99 : vector<16x16x8xf32> to vector<256x8xf32>
    %101 = vector.extract_strided_slice %51 {offsets = [2, 2, 0, 0], sizes = [1, 1, 8, 8], strides = [1, 1, 1, 1]} : vector<3x3x8x8xf32> to vector<1x1x8x8xf32>
    %102 = vector.shape_cast %101 : vector<1x1x8x8xf32> to vector<8x8xf32>
    %cst_57 = arith.constant dense<0.000000e+00> : vector<256x8xf32>
    %103 = tpu.matmul %100, %102, %cst_57 {dimension_numbers = #tpu.dot_dimension_numbers<[1], [0], [0], [1], [0, 0, 1, 1], [], []>} : vector<256x8xf32>, vector<8x8xf32>, vector<256x8xf32> -> vector<256x8xf32>
    %104 = arith.addf %98, %103 : vector<256x8xf32>
    %c0_58 = arith.constant 0 : index
    %c0_59 = arith.constant 0 : index
    %105 = vector.load %arg5[%c0_58, %c0_59] : memref<1x8xf32, #tpu.memory_space<vmem>>, vector<1x8xf32>
    %106 = vector.broadcast %105 : vector<1x8xf32> to vector<256x8xf32>
    %107 = arith.addf %104, %106 : vector<256x8xf32>
    %c0_60 = arith.constant 0 : index
    %c0_61 = arith.constant 0 : index
    %108 = vector.load %arg14[%c0_60, %c0_61] : memref<8x4xf32, #tpu.memory_space<vmem>>, vector<8x4xf32>
    %c0_62 = arith.constant 0 : index
    %c0_63 = arith.constant 0 : index
    %109 = vector.load %arg15[%c0_62, %c0_63] : memref<4x8xf32, #tpu.memory_space<vmem>>, vector<4x8xf32>
    %c0_64 = arith.constant 0 : index
    %c0_65 = arith.constant 0 : index
    %110 = vector.load %arg10[%c0_64, %c0_65] : memref<1x8xf32, #tpu.memory_space<vmem>>, vector<1x8xf32>
    %c0_66 = arith.constant 0 : index
    %c0_67 = arith.constant 0 : index
    %111 = vector.load %arg11[%c0_66, %c0_67] : memref<1x8xf32, #tpu.memory_space<vmem>>, vector<1x8xf32>
    %cst_68 = arith.constant dense<0.000000e+00> : vector<8xf32>
    %112 = vector.multi_reduction <add>, %107, %cst_68 [0] : vector<256x8xf32> to vector<8xf32>
    %113 = vector.shape_cast %112 : vector<8xf32> to vector<1x8xf32>
    %cst_69 = arith.constant dense<0.000000e+00> : vector<1x4xf32>
    %114 = tpu.matmul %113, %108, %cst_69 {dimension_numbers = #tpu.dot_dimension_numbers<[1], [0], [0], [1], [0, 0, 1, 1], [], []>} : vector<1x8xf32>, vector<8x4xf32>, vector<1x4xf32> -> vector<1x4xf32>
    %115 = arith.mulf %107, %107 : vector<256x8xf32>
    %cst_70 = arith.constant dense<0.000000e+00> : vector<8xf32>
    %116 = vector.multi_reduction <add>, %115, %cst_70 [0] : vector<256x8xf32> to vector<8xf32>
    %117 = vector.shape_cast %116 : vector<8xf32> to vector<1x8xf32>
    %cst_71 = arith.constant dense<0.000000e+00> : vector<1x4xf32>
    %118 = tpu.matmul %117, %108, %cst_71 {dimension_numbers = #tpu.dot_dimension_numbers<[1], [0], [0], [1], [0, 0, 1, 1], [], []>} : vector<1x8xf32>, vector<8x4xf32>, vector<1x4xf32> -> vector<1x4xf32>
    %cst_72 = arith.constant 0.001953125 : f32
    %119 = vector.broadcast %cst_72 : f32 to vector<1x4xf32>
    %120 = arith.mulf %114, %119 : vector<1x4xf32>
    %cst_73 = arith.constant 0.001953125 : f32
    %121 = vector.broadcast %cst_73 : f32 to vector<1x4xf32>
    %122 = arith.mulf %118, %121 : vector<1x4xf32>
    %123 = arith.mulf %120, %120 : vector<1x4xf32>
    %124 = arith.subf %122, %123 : vector<1x4xf32>
    %cst_74 = arith.constant dense<0.000000e+00> : vector<1x8xf32>
    %125 = tpu.matmul %120, %109, %cst_74 {dimension_numbers = #tpu.dot_dimension_numbers<[1], [0], [0], [1], [0, 0, 1, 1], [], []>} : vector<1x4xf32>, vector<4x8xf32>, vector<1x8xf32> -> vector<1x8xf32>
    %cst_75 = arith.constant 9.99999974E-6 : f32
    %126 = vector.broadcast %cst_75 : f32 to vector<1x4xf32>
    %127 = arith.addf %124, %126 : vector<1x4xf32>
    %128 = math.rsqrt %127 : vector<1x4xf32>
    %cst_76 = arith.constant dense<0.000000e+00> : vector<1x8xf32>
    %129 = tpu.matmul %128, %109, %cst_76 {dimension_numbers = #tpu.dot_dimension_numbers<[1], [0], [0], [1], [0, 0, 1, 1], [], []>} : vector<1x4xf32>, vector<4x8xf32>, vector<1x8xf32> -> vector<1x8xf32>
    %130 = vector.broadcast %125 : vector<1x8xf32> to vector<256x8xf32>
    %131 = arith.subf %107, %130 : vector<256x8xf32>
    %132 = vector.broadcast %129 : vector<1x8xf32> to vector<256x8xf32>
    %133 = arith.mulf %131, %132 : vector<256x8xf32>
    %134 = vector.broadcast %110 : vector<1x8xf32> to vector<256x8xf32>
    %135 = arith.mulf %133, %134 : vector<256x8xf32>
    %136 = vector.broadcast %111 : vector<1x8xf32> to vector<256x8xf32>
    %137 = arith.addf %135, %136 : vector<256x8xf32>
    %cst_77 = arith.constant 0.000000e+00 : f32
    %138 = vector.broadcast %cst_77 : f32 to vector<256x8xf32>
    %139 = arith.maximumf %137, %138 : vector<256x8xf32>
    %c0_78 = arith.constant 0 : index
    %c0_79 = arith.constant 0 : index
    %140 = vector.load %arg6[%c0_78, %c0_79] : memref<8x32xf32, #tpu.memory_space<vmem>>, vector<8x32xf32>
    %cst_80 = arith.constant dense<0.000000e+00> : vector<256x32xf32>
    %141 = tpu.matmul %139, %140, %cst_80 {dimension_numbers = #tpu.dot_dimension_numbers<[1], [0], [0], [1], [0, 0, 1, 1], [], []>} : vector<256x8xf32>, vector<8x32xf32>, vector<256x32xf32> -> vector<256x32xf32>
    %c0_81 = arith.constant 0 : index
    %c0_82 = arith.constant 0 : index
    %142 = vector.load %arg7[%c0_81, %c0_82] : memref<1x32xf32, #tpu.memory_space<vmem>>, vector<1x32xf32>
    %143 = vector.broadcast %142 : vector<1x32xf32> to vector<256x32xf32>
    %144 = arith.addf %141, %143 : vector<256x32xf32>
    %c0_83 = arith.constant 0 : index
    %c0_84 = arith.constant 0 : index
    %145 = vector.load %arg16[%c0_83, %c0_84] : memref<32x4xf32, #tpu.memory_space<vmem>>, vector<32x4xf32>
    %c0_85 = arith.constant 0 : index
    %c0_86 = arith.constant 0 : index
    %146 = vector.load %arg17[%c0_85, %c0_86] : memref<4x32xf32, #tpu.memory_space<vmem>>, vector<4x32xf32>
    %c0_87 = arith.constant 0 : index
    %c0_88 = arith.constant 0 : index
    %147 = vector.load %arg12[%c0_87, %c0_88] : memref<1x32xf32, #tpu.memory_space<vmem>>, vector<1x32xf32>
    %c0_89 = arith.constant 0 : index
    %c0_90 = arith.constant 0 : index
    %148 = vector.load %arg13[%c0_89, %c0_90] : memref<1x32xf32, #tpu.memory_space<vmem>>, vector<1x32xf32>
    %cst_91 = arith.constant dense<0.000000e+00> : vector<32xf32>
    %149 = vector.multi_reduction <add>, %144, %cst_91 [0] : vector<256x32xf32> to vector<32xf32>
    %150 = vector.shape_cast %149 : vector<32xf32> to vector<1x32xf32>
    %cst_92 = arith.constant dense<0.000000e+00> : vector<1x4xf32>
    %151 = tpu.matmul %150, %145, %cst_92 {dimension_numbers = #tpu.dot_dimension_numbers<[1], [0], [0], [1], [0, 0, 1, 1], [], []>} : vector<1x32xf32>, vector<32x4xf32>, vector<1x4xf32> -> vector<1x4xf32>
    %152 = arith.mulf %144, %144 : vector<256x32xf32>
    %cst_93 = arith.constant dense<0.000000e+00> : vector<32xf32>
    %153 = vector.multi_reduction <add>, %152, %cst_93 [0] : vector<256x32xf32> to vector<32xf32>
    %154 = vector.shape_cast %153 : vector<32xf32> to vector<1x32xf32>
    %cst_94 = arith.constant dense<0.000000e+00> : vector<1x4xf32>
    %155 = tpu.matmul %154, %145, %cst_94 {dimension_numbers = #tpu.dot_dimension_numbers<[1], [0], [0], [1], [0, 0, 1, 1], [], []>} : vector<1x32xf32>, vector<32x4xf32>, vector<1x4xf32> -> vector<1x4xf32>
    %cst_95 = arith.constant 4.8828125E-4 : f32
    %156 = vector.broadcast %cst_95 : f32 to vector<1x4xf32>
    %157 = arith.mulf %151, %156 : vector<1x4xf32>
    %cst_96 = arith.constant 4.8828125E-4 : f32
    %158 = vector.broadcast %cst_96 : f32 to vector<1x4xf32>
    %159 = arith.mulf %155, %158 : vector<1x4xf32>
    %160 = arith.mulf %157, %157 : vector<1x4xf32>
    %161 = arith.subf %159, %160 : vector<1x4xf32>
    %cst_97 = arith.constant dense<0.000000e+00> : vector<1x32xf32>
    %162 = tpu.matmul %157, %146, %cst_97 {dimension_numbers = #tpu.dot_dimension_numbers<[1], [0], [0], [1], [0, 0, 1, 1], [], []>} : vector<1x4xf32>, vector<4x32xf32>, vector<1x32xf32> -> vector<1x32xf32>
    %cst_98 = arith.constant 9.99999974E-6 : f32
    %163 = vector.broadcast %cst_98 : f32 to vector<1x4xf32>
    %164 = arith.addf %161, %163 : vector<1x4xf32>
    %165 = math.rsqrt %164 : vector<1x4xf32>
    %cst_99 = arith.constant dense<0.000000e+00> : vector<1x32xf32>
    %166 = tpu.matmul %165, %146, %cst_99 {dimension_numbers = #tpu.dot_dimension_numbers<[1], [0], [0], [1], [0, 0, 1, 1], [], []>} : vector<1x4xf32>, vector<4x32xf32>, vector<1x32xf32> -> vector<1x32xf32>
    %167 = vector.broadcast %162 : vector<1x32xf32> to vector<256x32xf32>
    %168 = arith.subf %144, %167 : vector<256x32xf32>
    %169 = vector.broadcast %166 : vector<1x32xf32> to vector<256x32xf32>
    %170 = arith.mulf %168, %169 : vector<256x32xf32>
    %171 = vector.broadcast %147 : vector<1x32xf32> to vector<256x32xf32>
    %172 = arith.mulf %170, %171 : vector<256x32xf32>
    %173 = vector.broadcast %148 : vector<1x32xf32> to vector<256x32xf32>
    %174 = arith.addf %172, %173 : vector<256x32xf32>
    %cst_100 = arith.constant 0.000000e+00 : f32
    %175 = vector.broadcast %cst_100 : f32 to vector<256x32xf32>
    %176 = arith.maximumf %174, %175 : vector<256x32xf32>
    %177 = arith.addf %2, %176 : vector<256x32xf32>
    %cst_101 = arith.constant 0.000000e+00 : f32
    %178 = vector.broadcast %cst_101 : f32 to vector<256x32xf32>
    %179 = arith.maximumf %177, %178 : vector<256x32xf32>
    %180 = vector.shape_cast %179 : vector<256x32xf32> to vector<16x16x32xf32>
    %c0_102 = arith.constant 0 : index
    %c0_103 = arith.constant 0 : index
    %c0_104 = arith.constant 0 : index
    %c0_105 = arith.constant 0 : index
    %181 = vector.load %arg18[%c0_102, %c0_103, %c0_104, %c0_105] : memref<1x16x16x32xf32, #tpu.memory_space<vmem>>, vector<1x16x16x32xf32>
    %182 = vector.shape_cast %181 : vector<1x16x16x32xf32> to vector<16x16x32xf32>
    %183 = vector.shape_cast %180 : vector<16x16x32xf32> to vector<1x16x16x32xf32>
    tpu.vector_store %arg18[%c0_102, %c0_103, %c0_104, %c0_105], %183 {strides = array<i32>} : memref<1x16x16x32xf32, #tpu.memory_space<vmem>>, vector<1x16x16x32xf32>,
    return
  }
  func.func @transform_0(%arg0: i32) -> (i32, i32, i32, i32) {
    %c0_i32 = arith.constant 0 : i32
    %c0_i32_0 = arith.constant 0 : i32
    %c0_i32_1 = arith.constant 0 : i32
    %c0_i32_2 = arith.constant 0 : i32
    return %arg0, %c0_i32, %c0_i32_0, %c0_i32_1 : i32, i32, i32, i32
  }
  func.func @transform_1(%arg0: i32) -> (i32, i32) {
    %c0_i32 = arith.constant 0 : i32
    %c0_i32_0 = arith.constant 0 : i32
    %c0_i32_1 = arith.constant 0 : i32
    return %c0_i32, %c0_i32_0 : i32, i32
  }
  func.func @transform_2(%arg0: i32) -> (i32, i32) {
    %c0_i32 = arith.constant 0 : i32
    %c0_i32_0 = arith.constant 0 : i32
    %c0_i32_1 = arith.constant 0 : i32
    return %c0_i32, %c0_i32_0 : i32, i32
  }
  func.func @transform_3(%arg0: i32) -> (i32, i32, i32, i32) {
    %c0_i32 = arith.constant 0 : i32
    %c0_i32_0 = arith.constant 0 : i32
    %c0_i32_1 = arith.constant 0 : i32
    %c0_i32_2 = arith.constant 0 : i32
    %c0_i32_3 = arith.constant 0 : i32
    return %c0_i32, %c0_i32_0, %c0_i32_1, %c0_i32_2 : i32, i32, i32, i32
  }
  func.func @transform_4(%arg0: i32) -> (i32, i32) {
    %c0_i32 = arith.constant 0 : i32
    %c0_i32_0 = arith.constant 0 : i32
    %c0_i32_1 = arith.constant 0 : i32
    return %c0_i32, %c0_i32_0 : i32, i32
  }
  func.func @transform_5(%arg0: i32) -> (i32, i32) {
    %c0_i32 = arith.constant 0 : i32
    %c0_i32_0 = arith.constant 0 : i32
    %c0_i32_1 = arith.constant 0 : i32
    return %c0_i32, %c0_i32_0 : i32, i32
  }
  func.func @transform_6(%arg0: i32) -> (i32, i32) {
    %c0_i32 = arith.constant 0 : i32
    %c0_i32_0 = arith.constant 0 : i32
    %c0_i32_1 = arith.constant 0 : i32
    return %c0_i32, %c0_i32_0 : i32, i32
  }
  func.func @transform_7(%arg0: i32) -> (i32, i32) {
    %c0_i32 = arith.constant 0 : i32
    %c0_i32_0 = arith.constant 0 : i32
    %c0_i32_1 = arith.constant 0 : i32
    return %c0_i32, %c0_i32_0 : i32, i32
  }
  func.func @transform_8(%arg0: i32) -> (i32, i32) {
    %c0_i32 = arith.constant 0 : i32
    %c0_i32_0 = arith.constant 0 : i32
    %c0_i32_1 = arith.constant 0 : i32
    return %c0_i32, %c0_i32_0 : i32, i32
  }
  func.func @transform_9(%arg0: i32) -> (i32, i32) {
    %c0_i32 = arith.constant 0 : i32
    %c0_i32_0 = arith.constant 0 : i32
    %c0_i32_1 = arith.constant 0 : i32
    return %c0_i32, %c0_i32_0 : i32, i32
  }
  func.func @transform_10(%arg0: i32) -> (i32, i32) {
    %c0_i32 = arith.constant 0 : i32
    %c0_i32_0 = arith.constant 0 : i32
    %c0_i32_1 = arith.constant 0 : i32
    return %c0_i32, %c0_i32_0 : i32, i32
  }
  func.func @transform_11(%arg0: i32) -> (i32, i32) {
    %c0_i32 = arith.constant 0 : i32
    %c0_i32_0 = arith.constant 0 : i32
    %c0_i32_1 = arith.constant 0 : i32
    return %c0_i32, %c0_i32_0 : i32, i32
  }
  func.func @transform_12(%arg0: i32) -> (i32, i32) {
    %c0_i32 = arith.constant 0 : i32
    %c0_i32_0 = arith.constant 0 : i32
    %c0_i32_1 = arith.constant 0 : i32
    return %c0_i32, %c0_i32_0 : i32, i32
  }
  func.func @transform_13(%arg0: i32) -> (i32, i32) {
    %c0_i32 = arith.constant 0 : i32
    %c0_i32_0 = arith.constant 0 : i32
    %c0_i32_1 = arith.constant 0 : i32
    return %c0_i32, %c0_i32_0 : i32, i32
  }
  func.func @transform_14(%arg0: i32) -> (i32, i32) {
    %c0_i32 = arith.constant 0 : i32
    %c0_i32_0 = arith.constant 0 : i32
    %c0_i32_1 = arith.constant 0 : i32
    return %c0_i32, %c0_i32_0 : i32, i32
  }
  func.func @transform_15(%arg0: i32) -> (i32, i32) {
    %c0_i32 = arith.constant 0 : i32
    %c0_i32_0 = arith.constant 0 : i32
    %c0_i32_1 = arith.constant 0 : i32
    return %c0_i32, %c0_i32_0 : i32, i32
  }
  func.func @transform_16(%arg0: i32) -> (i32, i32) {
    %c0_i32 = arith.constant 0 : i32
    %c0_i32_0 = arith.constant 0 : i32
    %c0_i32_1 = arith.constant 0 : i32
    return %c0_i32, %c0_i32_0 : i32, i32
  }
  func.func @transform_17(%arg0: i32) -> (i32, i32, i32, i32) {
    %c0_i32 = arith.constant 0 : i32
    %c0_i32_0 = arith.constant 0 : i32
    %c0_i32_1 = arith.constant 0 : i32
    %c0_i32_2 = arith.constant 0 : i32
    return %arg0, %c0_i32, %c0_i32_0, %c0_i32_1 : i32, i32, i32, i32
  }
}

</mosaic_0001>

<bundles_post_ra>
// kernel: bottleneck_forward.1
= control target key start
LH: loop header
LB: loop body
LE: loop exit
PB: predicated region body
PF: predicated region fallthrough
CT: control target
= control target key end

     0   :  { %s8976_s0 = inlined_call_operand.hbm [shape: f32[2,16,16,32], index: 0, kind: input, shape index: {}]   ;;  %s8977_s1 = inlined_call_operand.vmem [shape: f32[32,8], index: 1, kind: input, shape index: {}]   ;;  %s8978_s2 = inlined_call_operand.vmem [shape: f32[1,8], index: 2, kind: input, shape index: {}]   ;;  %s8979_s3 = inlined_call_operand.hbm [shape: f32[3,3,8,8], index: 3, kind: input, shape index: {}]   ;;  %s8980_s4 = inlined_call_operand.vmem [shape: f32[1,8], index: 4, kind: input, shape index: {}]   ;;  %s8981_s5 = inlined_call_operand.vmem [shape: f32[8,32], index: 5, kind: input, shape index: {}]   ;;  %s8982_s6 = inlined_call_operand.vmem [shape: f32[1,32], index: 6, kind: input, shape index: {}]   ;;  %s8983_s7 = inlined_call_operand.vmem [shape: f32[1,8], index: 7, kind: input, shape index: {}]   ;;  %s8984_s8 = inlined_call_operand.vmem [shape: f32[1,8], index: 8, kind: input, shape index: {}]   ;;  %s8985_s9 = inlined_call_operand.vmem [shape: f32[1,8], index: 9, kind: input, shape index: {}]   ;;  %s8986_s10 = inlined_call_operand.vmem [shape: f32[1,8], index: 10, kind: input, shape index: {}]   ;;  %s8987_s11 = inlined_call_operand.vmem [shape: f32[1,32], index: 11, kind: input, shape index: {}]   ;;  %s8988_s12 = inlined_call_operand.vmem [shape: f32[1,32], index: 12, kind: input, shape index: {}]   ;;  %s8989_s13 = inlined_call_operand.vmem [shape: f32[8,4], index: 13, kind: input, shape index: {}]   ;;  %s8990_s14 = inlined_call_operand.vmem [shape: f32[4,8], index: 14, kind: input, shape index: {}]   ;;  %s8991_s15 = inlined_call_operand.vmem [shape: f32[32,4], index: 15, kind: input, shape index: {}]   ;;  %s8992_s16 = inlined_call_operand.vmem [shape: f32[4,32], index: 16, kind: input, shape index: {}]   ;;  %s8993_s17 = inlined_call_operand.hbm [shape: f32[2,16,16,32], index: 17, kind: output, shape index: {}]  }
   0x1   :  { %9079 = sst [smem:[#allocation104_spill]] %s8976_s0 }
   0x2   :  { %9080 = sst [smem:[#allocation105_spill]] %s8977_s1 }
   0x3   :  { %9081 = sst [smem:[#allocation106_spill]] %s8979_s3 }
   0x4   :  { %9082 = sst [smem:[#allocation107_spill]] %s8987_s11 }
   0x5   :  { %9083 = sst [smem:[#allocation108_spill]] %s8988_s12 }
   0x6   :  { %9084 = sst [smem:[#allocation109_spill]] %s8992_s16 }
   0x7   :  { %9085 = sst [smem:[#allocation110_spill]] %s8993_s17 }
   0x8   :  { %22 = vsyncpa [#allocation4], 0 }
   0x9   :  { %24 = vsyncpa [#allocation4 + $0x1], 0 }
   0xa   :  { %25 = vsyncpa [#allocation7], 0 }
   0xb   :  { %26 = vsyncpa [#allocation5], 0 }
   0xc   :  { %28 = vsyncpa [#allocation5 + $0x1], 0  ;;  %s5230_s24 = smov 0   ;;  %s5232_s25 = smov 0  }
   0xd   :  { %s5234_s26 = smov 0   ;;  %s5236_s27 = smov 0  }
   0xe LB: > { %9086 = sst [smem:[#allocation12_spill]] %s5120_s24  ;;  %s5251_s28 = sadd.s32 4294967295, %s5132_s27   ;;  %s5132_s27 = sphi %s5236_s27, %s9364_s27   ;;  %s5128_s26 = sphi %s5234_s26, %s9366_s26   ;;  %s5124_s25 = sphi %s5232_s25, %s9368_s25   ;;  %s5120_s24 = sphi %s5230_s24, %s9367_s24  }
   0xf   : > { %9087 = sst [smem:[#allocation13_spill]] %s5128_s26  ;;  %s4473_s29 = sadd.s32 4294967294, %s5132_s27  }
  0x10   : > { %p54_p0 = scmp.ne.s32.totalorder %s5124_s25, %s5120_s24  ;;  %p55_p1 = scmp.eq.s32.totalorder %s5251_s28, 0 }
  0x11   : > { %p414_p2 = scmp.eq.s32.totalorder %s5251_s28, 1  ;;  %p420_p3 = scmp.eq.s32.totalorder %s4473_s29, 1 }
  0x12   : > { %p5260_p4 = por %p55_p1, %p54_p0  ;;  %p4474_p5 = scmp.ge.s32.totalorder %s5132_s27, 1 }
  0x13   : > { %p5265_p6 = por %p420_p3, %p54_p0  ;;  %p427_p7 = scmp.lt.s32.totalorder %s5132_s27, 3 }
  0x14   : > { %s9091_s3 = sld [smem:[#allocation106_spill]]  ;;  %s5134_s21 = smov [#allocation6]  }
  0x15   : > { %s9089_s30 = scalar_select %p5265_p6, 1, 0 }
  0x16   : > { %p5273_p8 = pnand %p4474_p5, %p427_p7  ;;  %s446_s22 = sshll.u32 %s5134_s21, 4  ;;  %s447_s22 = int_to_ptr.vmem [resolvable:$true] %s446_s22 }
  0x17   : > { %9090 = sst [smem:[#allocation14_spill]] %s9089_s30  ;;  %s5283_s23 = sadd.s32 1, %s5132_s27  }
  0x18   : > { %p4875_p9 = pneg %p5273_p8  ;;  %9093 = sst [smem:[#allocation15_spill]] %s5283_s23 }
  0x19   : > { %s8999_s29 = smov 128   ;;  %s9000_s18 = smov 8  }
  0x1a   : > { %s444_s1 = sshll.u32 %s9091_s3, 4  ;;  %p4876_p10 = pnand %p4875_p9, %p55_p1  ;;  %s445_s1 = int_to_ptr.hbm [resolvable:$true] %s444_s1 }
  0x1b   : > { %s38_s19 = ssub.s32 %s5132_s27, %s5283_s23  ;;  %s41_s3 = sadd.s32 1, %s5128_s26 }
  0x1c   : > { %4878 = dma.hbm_to_vmem [thread:$0]  (!%p4876_p10), %s445_s1, 1152, %s447_s22, [#allocation7], %s8999_s29, %s8999_s29, %s9000_s18  }
  0x1d   : > { %p39_p12 = scmp.eq.s32.totalorder %s38_s19, 0  ;;  %p48_p13 = scmp.ne.s32.totalorder %s5128_s26, %s5124_s25 }
  0x1e   : > { %p49_p0 = scmp.eq.s32.totalorder %s5132_s27, 0  ;;  %p4888_p5 = scmp.lt.s32.totalorder %s5132_s27, 2 }
  0x1f   : > { %s5295_s21 = scalar_select %p39_p12, %s5128_s26, %s41_s3  }
  0x20   : > { %p5299_p3 = por %p414_p2, %p48_p13  ;;  %s499_s24 = sand.u32 1, %s5128_s26  }
  0x21   : > { %9094 = sst [smem:[#allocation16_spill]] %s5295_s21  ;;  %s4859_s17 = sshll.u32 %s5132_s27, 8 }
  0x22   : > { %p50_p7 = por %p49_p0, %p48_p13  ;;  %s4477_s12 = sshll.u32 %s499_s24, 8 }
  0x23   : > { %s9096_s1 = sld [smem:[#allocation104_spill]]  ;;  %s503_s19 = scalar_lea.vmem [#allocation3], %s4477_s12 }
  0x24   : > { %s511_s18 = sshll.u32 %s503_s19, 4  ;;  %p5309_p9 = pnand %p4888_p5, %p50_p7  ;;  %s512_s18 = int_to_ptr.vmem [resolvable:$true] %s511_s18 }
  0x25   : > { %s500_s21 = scalar_lea.sflag [#allocation4], %s499_s24 }
  0x26   : > { %p5036_p10 = pneg %p5309_p9 }
  0x29   : > { %s508_s22 = scalar_lea.hbm %s9096_s1, %s4859_s17  ;;  %s5039_s12 = scalar_lea.hbm %s9096_s1, 512 }
  0x2a   : > { %s509_s29 = sshll.u32 %s508_s22, 4  ;;  %s510_s29 = int_to_ptr.hbm [resolvable:$true] %s509_s29 }
  0x2b   : > { %s5032_s23 = sshra.s32 %s510_s29, 4  ;;  %s5033_s23 = int_to_ptr.hbm [resolvable:$true] %s5032_s23 }
  0x2c   : > { %s5034_s26 = scalar_lea.hbm %s5033_s23, 256  ;;  %p5040_p0 = scmp.lt.s32.totalorder %s5033_s23, %s9096_s1 }
  0x2d   : > { %p5035_p2 = scmp.ne.s32.totalorder %s5033_s23, %s5034_s26  ;;  %p5041_p5 = scmp.lt.s32.totalorder %s5039_s12, %s5034_s26 }
  0x2f   : > { %p5037_p12 = pnand %p5036_p10, %p5035_p2  ;;  %p5042_p7 = por %p5041_p5, %p5040_p0 }
  0x31   : > { %p5038_p13 = pneg %p5037_p12 }
  0x33   : > { %p5043_p11 = pnand %p5042_p7, %p5038_p13 }
  0x35   : > { %5046 = shalt.err (!%p5043_p11)
}
  0x36   : > { %s9098_s24 = smov 8   ;;  %s9099_s19 = smov 128  }
  0x37   : > { %4882 = dma.hbm_to_vmem [thread:$0]  (!%p5309_p9), %s510_s29, 4096, %s512_s18, %s500_s21, %s9099_s19, %s9099_s19, %s9098_s24  }
  0x38   : > { %523 = sbr.rel (%p5273_p8) target bundleno = 2717 (0xa9d), region = 88 }
  0x3d   : > { %s5329_s11 = sand.u32 1, %s5124_s25  }
  0x3e   : > { %s4481_s26 = sshll.u32 %s5329_s11, 8  ;;  %s526_s23 = scalar_lea.sflag [#allocation4], %s5329_s11 }
  0x3f   : > { %s5335_s16 = scalar_lea.vmem [#allocation3], %s4481_s26 }
  0x40   : > { %5107 = dma.done.wait (%p5260_p4), %s526_s23, 4096  }
  0x41   : > { %5109 = vsyncadd (%p5260_p4), %s526_s23, 4294963200 }
  0x42   : > { %5111 = dma.done.wait (%p55_p1), [#allocation7], 1152  }
  0x43   : > { %5113 = vsyncadd (%p55_p1), [#allocation7], 4294966144  ;;  %s9100_s18 = sld [smem:[#allocation105_spill]]  ;;  %vm626_vm0 = vcmask 261120   ;;  %v586_v4 = vld [vmem:[%s5335_s16] sm:$0xff]  ;;  %v587_v5 = vld [vmem:[%s5335_s16 + $0x8] sm:$0xff] }
  0x44   : > { %v588_v6 = vld [vmem:[%s5335_s16 + $0x10] sm:$0xff]  ;;  %v589_v7 = vld [vmem:[%s5335_s16 + $0x18] sm:$0xff]  ;;  %v590_v8 = vld [vmem:[%s5335_s16 + $0x20] sm:$0xff]  ;;  %vm840_vm1 = vcmask 64512   ;;  %vm1065_vm2 = vcmask 1043456   ;;  %vm1061_vm3 = vcmask 31744  }
  0x45   : > { %v591_v9 = vld [vmem:[%s5335_s16 + $0x28] sm:$0xff]  ;;  %v592_v10 = vld [vmem:[%s5335_s16 + $0x30] sm:$0xff]  ;;  %v593_v11 = vld [vmem:[%s5335_s16 + $0x38] sm:$0xff]  ;;  %vm1293_vm7 = vcmask 58368   ;;  %vm1300_vm8 = vcmask 57344   ;;  %vm1476_vm9 = vcmask 1046528  }
  0x46   : > { %v594_v12 = vld [vmem:[%s5335_s16 + $0x40] sm:$0xff]  ;;  %v595_v13 = vld [vmem:[%s5335_s16 + $0x48] sm:$0xff]  ;;  %v596_v14 = vld [vmem:[%s5335_s16 + $0x50] sm:$0xff]  ;;  %vm1911_vm10 = vcmask 1045504   ;;  %s9357_s19 = sld [smem:[#allocation109_spill]]  ;;  %s8823_s12 = scalar_lea.vmem [#allocation8], %s4481_s26 }
  0x47   : > { %v597_v15 = vld [vmem:[%s5335_s16 + $0x58] sm:$0xff]  ;;  %v598_v16 = vld [vmem:[%s5335_s16 + $0x60] sm:$0xff]  ;;  %v599_v17 = vld [vmem:[%s5335_s16 + $0x68] sm:$0xff]  ;;  %s9358_s29 = sld [smem:[#allocation107_spill]]  ;;  %s4860_s26 = sshll.u32 %s5251_s28, 8 }
  0x48   : > { %v600_v18 = vld [vmem:[%s5335_s16 + $0x70] sm:$0xff]  ;;  %v601_v19 = vld [vmem:[%s5335_s16 + $0x78] sm:$0xff]  ;;  %v602_v21 = vld [vmem:[%s5335_s16 + $0x80] sm:$0xff]  ;;  %s9359_s0 = sld [smem:[#allocation108_spill]] }
  0x49   : > { %v621_v0 = vld [vmem:[%s9100_s18 + $0x18] sm:$0xff]  ;;  %v620_v1 = vld [vmem:[%s9100_s18 + $0x10] sm:$0xff]  ;;  %v619_v2 = vld [vmem:[%s9100_s18 + $0x8] sm:$0xff]  ;;  %s9360_s22 = sld [smem:[#allocation110_spill]] }
  0x4a   : > { %735 = vmatpush.msra.mxu0 %v621_v0  ;;  %4861 = vmatpush.msra.mxu1 %v621_v0  ;;  %v618_v3 = vld [vmem:[%s9100_s18] sm:$0xff]  ;;  %v603_v23 = vld [vmem:[%s5335_s16 + $0x88] sm:$0xff]  ;;  %v605_v27 = vld [vmem:[%s5335_s16 + $0x98] sm:$0xff] }
  0x4b   : > { %v604_v25 = vld [vmem:[%s5335_s16 + $0x90] sm:$0xff]  ;;  %v613_v28 = vld [vmem:[%s5335_s16 + $0xd8] sm:$0xff]  ;;  %v606_v30 = vld [vmem:[%s5335_s16 + $0xa0] sm:$0xff] }
  0x4c   : > { %736 = vmatpush.msra.mxu0 %v620_v1  ;;  %4862 = vmatpush.msra.mxu1 %v620_v1  ;;  %v614_v31 = vld [vmem:[%s5335_s16 + $0xe0] sm:$0xff]  ;;  %v607_v33 = vld [vmem:[%s5335_s16 + $0xa8] sm:$0xff]  ;;  %v608_v36 = vld [vmem:[%s5335_s16 + $0xb0] sm:$0xff] }
  0x4d   : > { %v615_v34 = vld [vmem:[%s5335_s16 + $0xe8] sm:$0xff]  ;;  %v616_v37 = vld [vmem:[%s5335_s16 + $0xf0] sm:$0xff]  ;;  %v609_v39 = vld [vmem:[%s5335_s16 + $0xb8] sm:$0xff] }
  0x4e   : > { %737 = vmatpush.msra.mxu0 %v619_v2  ;;  %4863 = vmatpush.msra.mxu1 %v619_v2  ;;  %v617_v40 = vld [vmem:[%s5335_s16 + $0xf8] sm:$0xff]  ;;  %v610_v42 = vld [vmem:[%s5335_s16 + $0xc0] sm:$0xff]  ;;  %v611_v44 = vld [vmem:[%s5335_s16 + $0xc8] sm:$0xff] }
  0x4f   : > { %v612_v46 = vld [vmem:[%s5335_s16 + $0xd0] sm:$0xff]  ;;  %s4386_s24 = scalar_lea.hbm %s9360_s22, %s4860_s26 }
  0x50   : > { %738 = vmatpush.msra.mxu0 %v618_v3  ;;  %4864 = vmatpush.msra.mxu1 %v618_v3  ;;  %v5442_v55 = vld [vmem:[%s8978_s2] ss:$0 sm:$0xff]  ;;  %s4389_s23 = sshll.u32 %s4386_s24, 4  ;;  %s4390_s23 = int_to_ptr.hbm [resolvable:$true] %s4389_s23 }
  0x51   : > { %4484 = vmatmul.msk.f32.vlgmr.msra.gmra.mxu0 %vm626_vm0, %v586_v4  ;;  %4511 = vmatmul.msk.f32.vlgmr.msra.gmra.mxu1 %vm626_vm0, %v613_v28  ;;  %s5076_s20 = sshra.s32 %s4390_s23, 4  ;;  %s5077_s20 = int_to_ptr.hbm [resolvable:$true] %s5076_s20 }
  0x52   : > { %p5083_p11 = scmp.lt.s32.totalorder %s5077_s20, %s9360_s22 }
  0x59   : > { %4485 = vmatmul.msk.f32.gmra.mxu0 %vm626_vm0, %v587_v5  ;;  %4512 = vmatmul.msk.f32.gmra.mxu1 %vm626_vm0, %v614_v31 }
  0x61   : > { %4486 = vmatmul.msk.f32.gmra.mxu0 %vm626_vm0, %v588_v6  ;;  %4513 = vmatmul.msk.f32.gmra.mxu1 %vm626_vm0, %v615_v34 }
  0x69   : > { %4487 = vmatmul.msk.f32.gmra.mxu0 %vm626_vm0, %v589_v7  ;;  %4514 = vmatmul.msk.f32.gmra.mxu1 %vm626_vm0, %v616_v37 }
  0x71   : > { %4488 = vmatmul.msk.f32.gmra.mxu0 %vm626_vm0, %v590_v8  ;;  %4515 = vmatmul.msk.f32.gmra.mxu1 %vm626_vm0, %v617_v40 }
  0x79   : > { %4489 = vmatmul.msk.f32.gmra.mxu0 %vm626_vm0, %v591_v9 }
  0x81   : > { %4490 = vmatmul.msk.f32.gmra.mxu0 %vm626_vm0, %v592_v10 }
  0x89   : > { %4491 = vmatmul.msk.f32.gmra.mxu0 %vm626_vm0, %v593_v11 }
  0x91   : > { %4492 = vmatmul.msk.f32.gmra.mxu0 %vm626_vm0, %v594_v12 }
  0x99   : > { %4493 = vmatmul.msk.f32.gmra.mxu0 %vm626_vm0, %v595_v13 }
  0xa1   : > { %4494 = vmatmul.msk.f32.gmra.mxu0 %vm626_vm0, %v596_v14 }
  0xa9   : > { %4495 = vmatmul.msk.f32.gmra.mxu0 %vm626_vm0, %v597_v15 }
  0xb1   : > { %4496 = vmatmul.msk.f32.gmra.mxu0 %vm626_vm0, %v598_v16 }
  0xb9   : > { %4497 = vmatmul.msk.f32.gmra.mxu0 %vm626_vm0, %v599_v17 }
  0xc1   : > { %4498 = vmatmul.msk.f32.gmra.mxu0 %vm626_vm0, %v600_v18 }
  0xc9   : > { %4499 = vmatmul.msk.f32.gmra.mxu0 %vm626_vm0, %v601_v19 }
  0xce   : > { %v740_v20 = vpop.f32.mrf.mxu0 }
  0xcf   : > { %v5450_v58 = vadd.f32 %v5442_v55, %v740_v20 }
  0xd1   : > { %4500 = vmatmul.msk.f32.gmra.mxu0 %vm626_vm0, %v602_v21  ;;  %v933_v62 = vmul.f32 %v5450_v58, %v5450_v58  ;;  %v841_v2 = vsel %vm840_vm1, %v5450_v58, 0.0 }
  0xd3   : > { %v965_v8 = vsel %vm840_vm1, %v933_v62, 0.0 }
  0xd6   : > { %v743_v22 = vpop.f32.mrf.mxu0 }
  0xd7   : > { %v5447_v57 = vadd.f32 %v5442_v55, %v743_v22  ;;  %v836_v22 = vld [vmem:[%s8989_s13] sm:$0xff] }
  0xd8   : > { %928 = vmatpush.msrb.mxu1 %v836_v22 }
  0xd9   : > { %4501 = vmatmul.msk.f32.gmra.mxu0 %vm626_vm0, %v603_v23  ;;  %v934_v60 = vmul.f32 %v5447_v57, %v5447_v57  ;;  %v842_v63 = vsel %vm840_vm1, %v5447_v57, 0.0 }
  0xda   : > { %v843_v9 = vadd.f32 %v842_v63, %v841_v2  ;;  %1052 = vmatpush.msra.mxu1 %v836_v22 }
  0xdb   : > { %v966_v4 = vsel %vm840_vm1, %v934_v60, 0.0 }
  0xdc   : > { %v967_v14 = vadd.f32 %v966_v4, %v965_v8 }
  0xde   : > { %v746_v24 = vpop.f32.mrf.mxu0 }
  0xdf   : > { %v5453_v59 = vadd.f32 %v5442_v55, %v746_v24 }
  0xe1   : > { %4502 = vmatmul.msk.f32.gmra.mxu0 %vm626_vm0, %v604_v25  ;;  %v935_v0 = vmul.f32 %v5453_v59, %v5453_v59  ;;  %v844_v5 = vsel %vm840_vm1, %v5453_v59, 0.0 }
  0xe2   : > { %v845_v15 = vadd.f32 %v844_v5, %v843_v9 }
  0xe3   : > { %v968_v10 = vsel %vm840_vm1, %v935_v0, 0.0 }
  0xe4   : > { %v969_v20 = vadd.f32 %v968_v10, %v967_v14 }
  0xe6   : > { %v749_v26 = vpop.f32.mrf.mxu0 }
  0xe7   : > { %v5458_v61 = vadd.f32 %v5442_v55, %v749_v26 }
  0xe9   : > { %4503 = vmatmul.msk.f32.gmra.mxu0 %vm626_vm0, %v605_v27  ;;  %v936_v6 = vmul.f32 %v5458_v61, %v5458_v61  ;;  %v846_v11 = vsel %vm840_vm1, %v5458_v61, 0.0 }
  0xea   : > { %v847_v21 = vadd.f32 %v846_v11, %v845_v15 }
  0xeb   : > { %v970_v16 = vsel %vm840_vm1, %v936_v6, 0.0 }
  0xec   : > { %v971_v27 = vadd.f32 %v970_v16, %v969_v20 }
  0xee   : > { %v752_v29 = vpop.f32.mrf.mxu0 }
  0xef   : > { %v5467_v1 = vadd.f32 %v5442_v55, %v752_v29 }
  0xf1   : > { %4504 = vmatmul.msk.f32.gmra.mxu0 %vm626_vm0, %v606_v30  ;;  %v937_v12 = vmul.f32 %v5467_v1, %v5467_v1  ;;  %v848_v17 = vsel %vm840_vm1, %v5467_v1, 0.0 }
  0xf2   : > { %v849_v28 = vadd.f32 %v848_v17, %v847_v21 }
  0xf3   : > { %v972_v23 = vsel %vm840_vm1, %v937_v12, 0.0 }
  0xf4   : > { %v973_v34 = vadd.f32 %v972_v23, %v971_v27 }
  0xf6   : > { %v755_v32 = vpop.f32.mrf.mxu0 }
  0xf7   : > { %v5479_v7 = vadd.f32 %v5442_v55, %v755_v32 }
  0xf9   : > { %4505 = vmatmul.msk.f32.gmra.mxu0 %vm626_vm0, %v607_v33  ;;  %v938_v18 = vmul.f32 %v5479_v7, %v5479_v7  ;;  %v850_v24 = vsel %vm840_vm1, %v5479_v7, 0.0 }
  0xfb   : > { %v974_v30 = vsel %vm840_vm1, %v938_v18, 0.0 }
  0xfe   : > { %v758_v35 = vpop.f32.mrf.mxu0 }
  0xff   : > { %v5488_v13 = vadd.f32 %v5442_v55, %v758_v35  ;;  %v851_v35 = vadd.f32 %v850_v24, %v849_v28 }
 0x101   : > { %4506 = vmatmul.msk.f32.gmra.mxu0 %vm626_vm0, %v608_v36  ;;  %v939_v25 = vmul.f32 %v5488_v13, %v5488_v13  ;;  %v852_v31 = vsel %vm840_vm1, %v5488_v13, 0.0  ;;  %v5519_v36 = vpop.f32.mrf.mxu1 }
 0x103   : > { %v976_v37 = vsel %vm840_vm1, %v939_v25, 0.0 }
 0x106   : > { %v761_v38 = vpop.f32.mrf.mxu0 }
 0x107   : > { %v5496_v19 = vadd.f32 %v5442_v55, %v761_v38 }
 0x109   : > { %4507 = vmatmul.msk.f32.gmra.mxu0 %vm626_vm0, %v609_v39  ;;  %v940_v32 = vmul.f32 %v5496_v19, %v5496_v19  ;;  %v854_v38 = vsel %vm840_vm1, %v5496_v19, 0.0  ;;  %v5566_v21 = vpop.f32.mrf.mxu1 }
 0x10e   : > { %v764_v41 = vpop.f32.mrf.mxu0 }
 0x10f   : > { %v5507_v26 = vadd.f32 %v5442_v55, %v764_v41  ;;  %v975_v41 = vadd.f32 %v974_v30, %v973_v34 }
 0x111   : > { %4508 = vmatmul.msk.f32.gmra.mxu0 %vm626_vm0, %v610_v42  ;;  %v941_v39 = vmul.f32 %v5507_v26, %v5507_v26  ;;  %v853_v42 = vadd.f32 %v852_v31, %v851_v35  ;;  %v977_v62 = vadd.f32 %v976_v37, %v975_v41 }
 0x113   : > { %v855_v63 = vadd.f32 %v854_v38, %v853_v42  ;;  %v980_v0 = vsel %vm840_vm1, %v941_v39, 0.0 }
 0x116   : > { %v767_v43 = vpop.f32.mrf.mxu0 }
 0x117   : > { %v5517_v33 = vadd.f32 %v5442_v55, %v767_v43  ;;  %v978_v43 = vsel %vm840_vm1, %v940_v32, 0.0 }
 0x118   : > { %v979_v5 = vadd.f32 %v978_v43, %v977_v62 }
 0x119   : > { %4509 = vmatmul.msk.f32.gmra.mxu0 %vm626_vm0, %v611_v44  ;;  %v856_v44 = vsel %vm840_vm1, %v5507_v26, 0.0 }
 0x11a   : > { %v857_v6 = vadd.f32 %v856_v44, %v855_v63  ;;  %v981_v12 = vadd.f32 %v980_v0, %v979_v5 }
 0x11e   : > { %v5419_v45 = vpop.f32.mrf.mxu0 }
 0x11f   : > { %v5528_v40 = vadd.f32 %v5442_v55, %v5419_v45  ;;  %v858_v45 = vsel %vm840_vm1, %v5517_v33, 0.0 }
 0x120   : > { %v859_v14 = vadd.f32 %v858_v45, %v857_v6 }
 0x121   : > { %4510 = vmatmul.msk.f32.gmra.mxu0 %vm626_vm0, %v612_v46  ;;  %v942_v46 = vmul.f32 %v5517_v33, %v5517_v33  ;;  %v943_v2 = vmul.f32 %v5528_v40, %v5528_v40  ;;  %v860_v9 = vsel %vm840_vm1, %v5528_v40, 0.0 }
 0x122   : > { %v861_v20 = vadd.f32 %v860_v9, %v859_v14 }
 0x126   : > { %v5423_v47 = vpop.f32.mrf.mxu0 }
 0x127   : > { %v5537_v60 = vadd.f32 %v5442_v55, %v5423_v47  ;;  %v982_v47 = vsel %vm840_vm1, %v942_v46, 0.0 }
 0x128   : > { %v983_v18 = vadd.f32 %v982_v47, %v981_v12  ;;  %v5613_v47 = vpop.f32.mrf.mxu1 }
 0x129   : > { %v944_v10 = vmul.f32 %v5537_v60, %v5537_v60  ;;  %v862_v15 = vsel %vm840_vm1, %v5537_v60, 0.0 }
 0x12a   : > { %v863_v27 = vadd.f32 %v862_v15, %v861_v20 }
 0x12e   : > { %v5425_v48 = vpop.f32.mrf.mxu0 }
 0x12f   : > { %v5546_v4 = vadd.f32 %v5442_v55, %v5425_v48  ;;  %v984_v48 = vsel %vm840_vm1, %v943_v2, 0.0 }
 0x130   : > { %v985_v25 = vadd.f32 %v984_v48, %v983_v18 }
 0x131   : > { %v945_v16 = vmul.f32 %v5546_v4, %v5546_v4  ;;  %v864_v22 = vsel %vm840_vm1, %v5546_v4, 0.0 }
 0x132   : > { %v865_v34 = vadd.f32 %v864_v22, %v863_v27 }
 0x136   : > { %v5427_v49 = vpop.f32.mrf.mxu0 }
 0x137   : > { %v5555_v11 = vadd.f32 %v5442_v55, %v5427_v49  ;;  %v986_v49 = vsel %vm840_vm1, %v944_v10, 0.0 }
 0x138   : > { %v987_v32 = vadd.f32 %v986_v49, %v985_v25 }
 0x139   : > { %v946_v23 = vmul.f32 %v5555_v11, %v5555_v11  ;;  %v866_v28 = vsel %vm840_vm1, %v5555_v11, 0.0 }
 0x13a   : > { %v867_v42 = vadd.f32 %v866_v28, %v865_v34 }
 0x13e   : > { %v5429_v50 = vpop.f32.mrf.mxu0 }
 0x13f   : > { %v5564_v17 = vadd.f32 %v5442_v55, %v5429_v50  ;;  %v988_v50 = vsel %vm840_vm1, %v945_v16, 0.0 }
 0x140   : > { %v989_v41 = vadd.f32 %v988_v50, %v987_v32 }
 0x141   : > { %v947_v30 = vmul.f32 %v5564_v17, %v5564_v17  ;;  %v868_v37 = vsel %vm840_vm1, %v5564_v17, 0.0 }
 0x142   : > { %v869_v63 = vadd.f32 %v868_v37, %v867_v42 }
 0x146   : > { %v5431_v51 = vpop.f32.mrf.mxu0 }
 0x147   : > { %v5575_v24 = vadd.f32 %v5442_v55, %v5431_v51  ;;  %v990_v51 = vsel %vm840_vm1, %v946_v23, 0.0 }
 0x148   : > { %v991_v62 = vadd.f32 %v990_v51, %v989_v41 }
 0x149   : > { %v948_v38 = vmul.f32 %v5575_v24, %v5575_v24  ;;  %v870_v43 = vsel %vm840_vm1, %v5575_v24, 0.0 }
 0x14a   : > { %v871_v6 = vadd.f32 %v870_v43, %v869_v63 }
 0x14b   : > { %v994_v0 = vsel %vm840_vm1, %v948_v38, 0.0 }
 0x14e   : > { %v5433_v52 = vpop.f32.mrf.mxu0 }
 0x14f   : > { %v5584_v31 = vadd.f32 %v5442_v55, %v5433_v52  ;;  %v992_v52 = vsel %vm840_vm1, %v947_v30, 0.0 }
 0x150   : > { %v993_v5 = vadd.f32 %v992_v52, %v991_v62  ;;  %v830_v62 = vpop.f32.mrf.mxu1 }
 0x151   : > { %v949_v44 = vmul.f32 %v5584_v31, %v5584_v31 }
 0x152   : > { %v995_v14 = vadd.f32 %v994_v0, %v993_v5 }
 0x156   : > { %v5435_v53 = vpop.f32.mrf.mxu0 }
 0x157   : > { %v5593_v39 = vadd.f32 %v5442_v55, %v5435_v53  ;;  %v872_v53 = vsel %vm840_vm1, %v5584_v31, 0.0 }
 0x158   : > { %v873_v48 = vadd.f32 %v872_v53, %v871_v6 }
 0x159   : > { %v950_v45 = vmul.f32 %v5593_v39, %v5593_v39  ;;  %v874_v9 = vsel %vm840_vm1, %v5593_v39, 0.0 }
 0x15a   : > { %v875_v22 = vadd.f32 %v874_v9, %v873_v48 }
 0x15b   : > { %v998_v15 = vsel %vm840_vm1, %v950_v45, 0.0 }
 0x15e   : > { %v5437_v54 = vpop.f32.mrf.mxu0 }
 0x15f   : > { %v5602_v46 = vadd.f32 %v5442_v55, %v5437_v54  ;;  %v996_v54 = vsel %vm840_vm1, %v949_v44, 0.0 }
 0x160   : > { %v997_v49 = vadd.f32 %v996_v54, %v995_v14 }
 0x161   : > { %v951_v10 = vmul.f32 %v5602_v46, %v5602_v46  ;;  %v876_v16 = vsel %vm840_vm1, %v5602_v46, 0.0 }
 0x162   : > { %v999_v50 = vadd.f32 %v998_v15, %v997_v49  ;;  %v877_v28 = vadd.f32 %v876_v16, %v875_v22  ;;  %v5677_v49 = vadd.f32 %v5442_v55, %v5519_v36 }
 0x166   : > { %v5444_v56 = vpop.f32.mrf.mxu0 }
 0x167   : > { %v5611_v2 = vadd.f32 %v5442_v55, %v5444_v56 }
 0x169   : > { %v952_v18 = vmul.f32 %v5611_v2, %v5611_v2  ;;  %v878_v23 = vsel %vm840_vm1, %v5611_v2, 0.0 }
 0x16a   : > { %v879_v37 = vadd.f32 %v878_v23, %v877_v28  ;;  %v5684_v28 = vadd.f32 %v5442_v55, %v5566_v21 }
 0x16b   : > { %v1002_v30 = vsel %vm840_vm1, %v952_v18, 0.0 }
 0x16e   : > { %v5471_v3 = vpop.f32.mrf.mxu0 }
 0x16f   : > { %v5622_v12 = vadd.f32 %v5442_v55, %v5471_v3  ;;  %v1000_v3 = vsel %vm840_vm1, %v951_v10, 0.0 }
 0x170   : > { %v1001_v51 = vadd.f32 %v1000_v3, %v999_v50 }
 0x171   : > { %v953_v25 = vmul.f32 %v5622_v12, %v5622_v12 }
 0x172   : > { %v1003_v52 = vadd.f32 %v1002_v30, %v1001_v51  ;;  %v833_v51 = vpop.f32.mrf.mxu1 }
 0x173   : > { %v1004_v38 = vsel %vm840_vm1, %v953_v25, 0.0 }
 0x174   : > { %v1005_v45 = vadd.f32 %v1004_v38, %v1003_v52  ;;  %v5694_v38 = vadd.f32 %v5442_v55, %v5613_v47  ;;  %v5709_v47 = vadd.f32 %v5442_v55, %v833_v51 }
 0x176   : > { %v5509_v29 = vpop.f32.mrf.mxu0 }
 0x177   : > { %v5631_v20 = vadd.f32 %v5442_v55, %v5509_v29  ;;  %v880_v29 = vsel %vm840_vm1, %v5622_v12, 0.0 }
 0x178   : > { %v881_v43 = vadd.f32 %v880_v29, %v879_v37  ;;  %v960_v37 = vmul.f32 %v5677_v49, %v5677_v49 }
 0x179   : > { %v954_v32 = vmul.f32 %v5631_v20, %v5631_v20 }
 0x17e   : > { %v806_v8 = vpop.f32.mrf.mxu0 }
 0x17f   : > { %v5639_v27 = vadd.f32 %v5442_v55, %v806_v8  ;;  %v882_v8 = vsel %vm840_vm1, %v5631_v20, 0.0 }
 0x180   : > { %v883_v5 = vadd.f32 %v882_v8, %v881_v43 }
 0x181   : > { %v955_v41 = vmul.f32 %v5639_v27, %v5639_v27  ;;  %v884_v63 = vsel %vm840_vm1, %v5639_v27, 0.0 }
 0x182   : > { %v885_v14 = vadd.f32 %v884_v63, %v883_v5  ;;  %v5706_v63 = vadd.f32 %v5442_v55, %v830_v62  ;;  %v1018_v5 = vsel %vm840_vm1, %v960_v37, 0.0  ;;  %v898_v62 = vsel %vm840_vm1, %v5694_v38, 0.0 }
 0x183   : > { %v1008_v6 = vsel %vm840_vm1, %v955_v41, 0.0  ;;  %v894_v41 = vsel %vm840_vm1, %v5677_v49, 0.0 }
 0x186   : > { %v809_v35 = vpop.f32.mrf.mxu0 }
 0x187   : > { %v5647_v34 = vadd.f32 %v5442_v55, %v809_v35  ;;  %v1006_v35 = vsel %vm840_vm1, %v954_v32, 0.0 }
 0x188   : > { %v1007_v10 = vadd.f32 %v1006_v35, %v1005_v45 }
 0x189   : > { %v956_v0 = vmul.f32 %v5647_v34, %v5647_v34  ;;  %v886_v54 = vsel %vm840_vm1, %v5647_v34, 0.0 }
 0x18a   : > { %v1009_v16 = vadd.f32 %v1008_v6, %v1007_v10  ;;  %v887_v18 = vadd.f32 %v886_v54, %v885_v14  ;;  %v896_v6 = vsel %vm840_vm1, %v5684_v28, 0.0  ;;  %v962_v54 = vmul.f32 %v5694_v38, %v5694_v38 }
 0x18b   : > { %v1010_v48 = vsel %vm840_vm1, %v956_v0, 0.0 }
 0x18c   : > { %v1011_v23 = vadd.f32 %v1010_v48, %v1009_v16  ;;  %v964_v48 = vmul.f32 %v5709_v47, %v5709_v47  ;;  %v1022_v16 = vsel %vm840_vm1, %v962_v54, 0.0 }
 0x18e   : > { %v812_v56 = vpop.f32.mrf.mxu0 }
 0x18f   : > { %v5655_v42 = vadd.f32 %v5442_v55, %v812_v56 }
 0x191   : > { %v957_v9 = vmul.f32 %v5655_v42, %v5655_v42  ;;  %v888_v56 = vsel %vm840_vm1, %v5655_v42, 0.0 }
 0x192   : > { %v889_v25 = vadd.f32 %v888_v56, %v887_v18  ;;  %v900_v18 = vsel %vm840_vm1, %v5706_v63, 0.0 }
 0x193   : > { %v1012_v22 = vsel %vm840_vm1, %v957_v9, 0.0 }
 0x194   : > { %v1013_v32 = vadd.f32 %v1012_v22, %v1011_v23  ;;  %v902_v22 = vsel %vm840_vm1, %v5709_v47, 0.0 }
 0x196   : > { %v815_v44 = vpop.f32.mrf.mxu0 }
 0x197   : > { %v5663_v53 = vadd.f32 %v5442_v55, %v815_v44  ;;  %v961_v44 = vmul.f32 %v5684_v28, %v5684_v28 }
 0x199   : > { %v958_v15 = vmul.f32 %v5663_v53, %v5663_v53  ;;  %v890_v3 = vsel %vm840_vm1, %v5663_v53, 0.0  ;;  %v1020_v14 = vsel %vm840_vm1, %v961_v44, 0.0 }
 0x19a   : > { %v891_v36 = vadd.f32 %v890_v3, %v889_v25 }
 0x19b   : > { %v1014_v30 = vsel %vm840_vm1, %v958_v15, 0.0 }
 0x19c   : > { %v1015_v52 = vadd.f32 %v1014_v30, %v1013_v32 }
 0x19e   : > { %v818_v50 = vpop.f32.mrf.mxu0 }
 0x19f   : > { %v5688_v29 = vadd.f32 %v5442_v55, %v818_v50  ;;  %v963_v55 = vmul.f32 %v5706_v63, %v5706_v63  ;;  %v1026_v50 = vsel %vm840_vm1, %v964_v48, 0.0 }
 0x1a1   : > { %v892_v8 = vsel %vm840_vm1, %v5688_v29, 0.0  ;;  %v959_v21 = vmul.f32 %v5688_v29, %v5688_v29  ;;  %v1024_v25 = vsel %vm840_vm1, %v963_v55, 0.0 }
 0x1a2   : > { %v893_v43 = vadd.f32 %v892_v8, %v891_v36 }
 0x1a3   : > { %v1016_v35 = vsel %vm840_vm1, %v959_v21, 0.0 }
 0x1a4   : > { %v895_v0 = vadd.f32 %v894_v41, %v893_v43  ;;  %v1017_v45 = vadd.f32 %v1016_v35, %v1015_v52 }
 0x1a6   : > { %v1019_v9 = vadd.f32 %v1018_v5, %v1017_v45  ;;  %v897_v10 = vadd.f32 %v896_v6, %v895_v0  ;;  %v837_v6 = vld [vmem:[%s8990_s14] sm:$0xf] }
 0x1a8   : > { %v899_v56 = vadd.f32 %v898_v62, %v897_v10  ;;  %v1021_v15 = vadd.f32 %v1020_v14, %v1019_v9 }
 0x1aa   : > { %v901_v3 = vadd.f32 %v900_v18, %v899_v56  ;;  %v1023_v23 = vadd.f32 %v1022_v16, %v1021_v15 }
 0x1ac   : > { %v1025_v30 = vadd.f32 %v1024_v25, %v1023_v23  ;;  %v903_v32 = vadd.f32 %v902_v22, %v901_v3 }
 0x1ae   : > { %v904_v36 = vrot.slane %v903_v32, 4  ;;  %v1027_v51 = vadd.f32 %v1026_v50, %v1025_v30 }
 0x1b0   : > { %v905_v37 = vadd.f32 %v904_v36, %v903_v32  ;;  %v1028_v8 = vrot.slane %v1027_v51, 4 }
 0x1b2   : > { %v906_v21 = vrot.slane %v905_v37, 2  ;;  %v1029_v41 = vadd.f32 %v1028_v8, %v1027_v51 }
 0x1b4   : > { %v1030_v52 = vrot.slane %v1029_v41, 2  ;;  %v907_v43 = vadd.f32 %v906_v21, %v905_v37 }
 0x1b6   : > { %v908_v44 = vrot.slane %v907_v43, 1  ;;  %v1031_v35 = vadd.f32 %v1030_v52, %v1029_v41 }
 0x1b8   : > { %v909_v0 = vadd.f32 %v908_v44, %v907_v43  ;;  %v1032_v45 = vrot.slane %v1031_v35, 1 }
 0x1ba   : > { %4516 = vmatmul.msk.f32.vlgmr.msrb.gmra.mxu1 %vm840_vm1, %v909_v0  ;;  %v1033_v5 = vadd.f32 %v1032_v45, %v1031_v35 }
 0x1bb   : > { %4518 = vmatpush.msk.msrb.mxu1 %vm1065_vm2, %v837_v6 }
 0x1c2   : > { %4517 = vmatmul.msk.f32.vlgmr.msra.gmra.mxu1 %vm840_vm1, %v1033_v5 }
 0x1c3   : > { %4520 = vmatpush.msk.msra.mxu1 %vm1065_vm2, %v837_v6 }
 0x237   : > { %v930_v54 = vpop.f32.mrf.mxu1 }
 0x238   : > { %v1057_v9 = vmul.f32 0.001953125, %v930_v54 }
 0x23a   : > { %4519 = vmatmul.msk.f32.vlgmr.msrb.gmra.mxu1 %vm1061_vm3, %v1057_v9  ;;  %v1059_v14 = vmul.f32 %v1057_v9, %v1057_v9  ;;  %v5809_v9 = vld [vmem:[%s8984_s8] ss:$0 sm:$0xff] }
 0x23f   : > { %v1054_v10 = vpop.f32.mrf.mxu1 }
 0x240   : > { %v1058_v62 = vmul.f32 0.001953125, %v1054_v10 }
 0x242   : > { %v1060_v55 = vsub.f32 %v1058_v62, %v1059_v14 }
 0x244   : > { %v1089_v48 = vadd.f32 1e-05, %v1060_v55 }
 0x246   : > { %4938 = vrsqrt.f32 %v1089_v48  ;;  %vm1096_vm5 = vweird.f32 %v1089_v48 }
 0x24c   : > { %v4939_v56 = vpop.eup %4938 }
 0x24d   : > { %v1091_v15 = vmul.f32 %v4939_v56, %v1089_v48  ;;  %vm1097_vm4 = vweird.f32 %v4939_v56 }
 0x24e   : > { %vm1098_vm6 = vmor %vm1096_vm5, %vm1097_vm4 }
 0x24f   : > { %v1092_v16 = vmul.f32 %v4939_v56, %v1091_v15 }
 0x251   : > { %v1093_v18 = vmul.f32 0.5, %v1092_v16 }
 0x253   : > { %v1094_v22 = vsub.f32 1.5, %v1093_v18 }
 0x255   : > { %v1095_v3 = vmul.f32 %v4939_v56, %v1094_v22 }
 0x257   : > { %v1099_v23 = vsel %vm1098_vm6, %v4939_v56, %v1095_v3 }
 0x258   : > { %4521 = vmatmul.msk.f32.vlgmr.msra.gmra.mxu1 %vm1061_vm3, %v1099_v23 }
 0x2b7   : > { %v1086_v25 = vpop.f32.mrf.mxu1 }
 0x2b8   : > { %v5739_v50 = vperm.slane %v1086_v25, 0  ;;  %v1420_v25 = vld [vmem:[#allocation6 + $0x8] sm:$0xff] }
 0x2b9   : > { %1636 = vmatpush.msrb.mxu1 %v1420_v25  ;;  %4865 = vmatpush.msra.mxu2 %v1420_v25 }
 0x2ba   : > { %v1124_v32 = vsub.f32 %v5450_v58, %v5739_v50  ;;  %v1125_v36 = vsub.f32 %v5447_v57, %v5739_v50  ;;  %v1126_v51 = vsub.f32 %v5453_v59, %v5739_v50  ;;  %v1127_v37 = vsub.f32 %v5458_v61, %v5739_v50 }
 0x2bb   : > { %v1128_v21 = vsub.f32 %v5467_v1, %v5739_v50  ;;  %v1129_v41 = vsub.f32 %v5479_v7, %v5739_v50  ;;  %v1130_v58 = vsub.f32 %v5488_v13, %v5739_v50  ;;  %v1131_v57 = vsub.f32 %v5496_v19, %v5739_v50 }
 0x2bc   : > { %v1132_v59 = vsub.f32 %v5507_v26, %v5739_v50  ;;  %v1133_v61 = vsub.f32 %v5517_v33, %v5739_v50  ;;  %v1134_v52 = vsub.f32 %v5528_v40, %v5739_v50  ;;  %v1135_v1 = vsub.f32 %v5537_v60, %v5739_v50  ;;  %v5778_v33 = vld [vmem:[%s8983_s7] ss:$0 sm:$0xff] }
 0x2bd   : > { %v1136_v7 = vsub.f32 %v5546_v4, %v5739_v50  ;;  %v1137_v13 = vsub.f32 %v5555_v11, %v5739_v50  ;;  %v1138_v19 = vsub.f32 %v5564_v17, %v5739_v50  ;;  %v1139_v26 = vsub.f32 %v5575_v24, %v5739_v50 }
 0x2be   : > { %v1140_v40 = vsub.f32 %v5584_v31, %v5739_v50  ;;  %v1141_v17 = vsub.f32 %v5593_v39, %v5739_v50  ;;  %v1142_v24 = vsub.f32 %v5602_v46, %v5739_v50  ;;  %v1143_v43 = vsub.f32 %v5611_v2, %v5739_v50 }
 0x2bf   : > { %v1144_v31 = vsub.f32 %v5622_v12, %v5739_v50  ;;  %v1145_v35 = vsub.f32 %v5631_v20, %v5739_v50  ;;  %v1146_v0 = vsub.f32 %v5639_v27, %v5739_v50  ;;  %v1147_v39 = vsub.f32 %v5647_v34, %v5739_v50 }
 0x2c0   : > { %v1148_v5 = vsub.f32 %v5655_v42, %v5739_v50  ;;  %v1149_v6 = vsub.f32 %v5663_v53, %v5739_v50  ;;  %v1150_v48 = vsub.f32 %v5688_v29, %v5739_v50  ;;  %v1151_v56 = vsub.f32 %v5677_v49, %v5739_v50 }
 0x2c1   : > { %v1152_v18 = vsub.f32 %v5684_v28, %v5739_v50  ;;  %v1153_v22 = vsub.f32 %v5694_v38, %v5739_v50 }
 0x2d5   : > { %v1120_v30 = vpop.f32.mrf.mxu1 }
 0x2d6   : > { %v5749_v8 = vperm.slane %v1120_v30, 0  ;;  %v1154_v30 = vsub.f32 %v5706_v63, %v5739_v50 }
 0x2d8   : > { %v1157_v60 = vmul.f32 %v5749_v8, %v1124_v32  ;;  %v1158_v4 = vmul.f32 %v5749_v8, %v1125_v36  ;;  %v1159_v11 = vmul.f32 %v5749_v8, %v1126_v51  ;;  %v1160_v44 = vmul.f32 %v5749_v8, %v1127_v37 }
 0x2d9   : > { %v1161_v45 = vmul.f32 %v5749_v8, %v1128_v21  ;;  %v1162_v54 = vmul.f32 %v5749_v8, %v1129_v41  ;;  %v1163_v10 = vmul.f32 %v5749_v8, %v1130_v58  ;;  %v1164_v15 = vmul.f32 %v5749_v8, %v1131_v57 }
 0x2da   : > { %v1192_v14 = vmul.f32 %v5778_v33, %v1157_v60  ;;  %v1193_v62 = vmul.f32 %v5778_v33, %v1158_v4  ;;  %v1194_v55 = vmul.f32 %v5778_v33, %v1159_v11  ;;  %v1195_v16 = vmul.f32 %v5778_v33, %v1160_v44 }
 0x2db   : > { %v1165_v3 = vmul.f32 %v5749_v8, %v1132_v59  ;;  %v1196_v23 = vmul.f32 %v5778_v33, %v1161_v45  ;;  %v1166_v32 = vmul.f32 %v5749_v8, %v1133_v61  ;;  %v1167_v36 = vmul.f32 %v5749_v8, %v1134_v52 }
 0x2dc   : > { %v1197_v51 = vmul.f32 %v5778_v33, %v1162_v54  ;;  %v1198_v37 = vmul.f32 %v5778_v33, %v1163_v10  ;;  %v1227_v21 = vadd.f32 %v5809_v9, %v1192_v14  ;;  %v1228_v41 = vadd.f32 %v5809_v9, %v1193_v62 }
 0x2dd   : > { %v1229_v58 = vadd.f32 %v5809_v9, %v1194_v55  ;;  %v1155_v57 = vsub.f32 %v5709_v47, %v5739_v50  ;;  %v1168_v59 = vmul.f32 %v5749_v8, %v1135_v1  ;;  %v1199_v61 = vmul.f32 %v5778_v33, %v1164_v15 }
 0x2de   : > { %v1230_v52 = vadd.f32 %v5809_v9, %v1195_v16  ;;  %v1169_v60 = vmul.f32 %v5749_v8, %v1136_v7  ;;  %v1170_v4 = vmul.f32 %v5749_v8, %v1137_v13  ;;  %v1200_v11 = vmul.f32 %v5778_v33, %v1165_v3 }
 0x2df   : > { %v1231_v44 = vadd.f32 %v5809_v9, %v1196_v23  ;;  %v1171_v45 = vmul.f32 %v5749_v8, %v1138_v19  ;;  %v1201_v54 = vmul.f32 %v5778_v33, %v1166_v32  ;;  %v1202_v10 = vmul.f32 %v5778_v33, %v1167_v36 }
 0x2e0   : > { %v1232_v1 = vadd.f32 %v5809_v9, %v1197_v51  ;;  %v1233_v14 = vadd.f32 %v5809_v9, %v1198_v37  ;;  %v1259_v62 = vmax.f32 %v1227_v21, 0.0  ;;  %v1260_v55 = vmax.f32 %v1228_v41, 0.0 }
 0x2e1   : > { %v1261_v15 = vmax.f32 %v1229_v58, 0.0  ;;  %v1172_v7 = vmul.f32 %v5749_v8, %v1139_v26  ;;  %v1203_v13 = vmul.f32 %v5778_v33, %v1168_v59  ;;  %v1234_v16 = vadd.f32 %v5809_v9, %v1199_v61 }
 0x2e2   : > { %v1262_v3 = vmax.f32 %v1230_v52, 0.0  ;;  %v1173_v19 = vmul.f32 %v5749_v8, %v1140_v40  ;;  %v1204_v23 = vmul.f32 %v5778_v33, %v1169_v60  ;;  %v1235_v25 = vadd.f32 %v5809_v9, %v1200_v11  ;;  %1333 = vst.msk [vmem:[#allocation2 + $0x19] sm:$0xff] %vm840_vm1, %v1259_v62 }
 0x2e3   : > { %v1263_v32 = vmax.f32 %v1231_v44, 0.0  ;;  %v1174_v36 = vmul.f32 %v5749_v8, %v1141_v17  ;;  %v1205_v51 = vmul.f32 %v5778_v33, %v1170_v4  ;;  %v1236_v26 = vadd.f32 %v5809_v9, %v1201_v54  ;;  %1334 = vst.msk [vmem:[#allocation2 + $0x21] sm:$0xff] %vm840_vm1, %v1260_v55 }
 0x2e4   : > { %v1264_v37 = vmax.f32 %v1232_v1, 0.0  ;;  %v1175_v40 = vmul.f32 %v5749_v8, %v1142_v24  ;;  %v1206_v21 = vmul.f32 %v5778_v33, %v1171_v45  ;;  %v1237_v41 = vadd.f32 %v5809_v9, %v1202_v10  ;;  %1335 = vst.msk [vmem:[#allocation2 + $0x31] sm:$0xff] %vm840_vm1, %v1261_v15 }
 0x2e5   : > { %v1265_v58 = vmax.f32 %v1233_v14, 0.0  ;;  %v1176_v17 = vmul.f32 %v5749_v8, %v1143_v43  ;;  %v1207_v59 = vmul.f32 %v5778_v33, %v1172_v7  ;;  %v1238_v61 = vadd.f32 %v5809_v9, %v1203_v13  ;;  %1336 = vst.msk [vmem:[#allocation2 + $0x39] sm:$0xff] %vm840_vm1, %v1262_v3 }
 0x2e6   : > { %v1266_v52 = vmax.f32 %v1234_v16, 0.0  ;;  %v1177_v46 = vmul.f32 %v5749_v8, %v1144_v31  ;;  %v1208_v24 = vmul.f32 %v5778_v33, %v1173_v19  ;;  %v1239_v60 = vadd.f32 %v5809_v9, %v1204_v23  ;;  %1337 = vst.msk [vmem:[#allocation2 + $0x49] sm:$0xff] %vm840_vm1, %v1263_v32 }
 0x2e7   : > { %v1267_v4 = vmax.f32 %v1235_v25, 0.0  ;;  %v1178_v2 = vmul.f32 %v5749_v8, %v1145_v35  ;;  %v1209_v43 = vmul.f32 %v5778_v33, %v1174_v36  ;;  %v1240_v11 = vadd.f32 %v5809_v9, %v1205_v51  ;;  %1338 = vst.msk [vmem:[#allocation2 + $0x51] sm:$0xff] %vm840_vm1, %v1264_v37 }
 0x2e8   : > { %v1268_v44 = vmax.f32 %v1236_v26, 0.0  ;;  %v1179_v12 = vmul.f32 %v5749_v8, %v1146_v0  ;;  %v1210_v31 = vmul.f32 %v5778_v33, %v1175_v40  ;;  %v1241_v45 = vadd.f32 %v5809_v9, %v1206_v21  ;;  %1339 = vst.msk [vmem:[#allocation2 + $0x61] sm:$0xff] %vm840_vm1, %v1265_v58 }
 0x2e9   : > { %v1269_v54 = vmax.f32 %v1237_v41, 0.0  ;;  %v1180_v20 = vmul.f32 %v5749_v8, %v1147_v39  ;;  %v1211_v35 = vmul.f32 %v5778_v33, %v1176_v17  ;;  %v1242_v10 = vadd.f32 %v5809_v9, %v1207_v59  ;;  %1340 = vst.msk [vmem:[#allocation2 + $0x69] sm:$0xff] %vm840_vm1, %v1266_v52 }
 0x2ea   : > { %v1270_v1 = vmax.f32 %v1238_v61, 0.0  ;;  %v1181_v27 = vmul.f32 %v5749_v8, %v1148_v5  ;;  %v1212_v0 = vmul.f32 %v5778_v33, %v1177_v46  ;;  %v1243_v14 = vadd.f32 %v5809_v9, %v1208_v24  ;;  %1341 = vst.msk [vmem:[#allocation2 + $0x79] sm:$0xff] %vm840_vm1, %v1267_v4  ;;  %v1419_v46 = vld [vmem:[#allocation6] sm:$0xff]  ;;  %v1422_v24 = vld [vmem:[#allocation6 + $0x18] sm:$0xff] }
 0x2eb   : > { %v1271_v62 = vmax.f32 %v1239_v60, 0.0  ;;  %v1182_v34 = vmul.f32 %v5749_v8, %v1149_v6  ;;  %v1213_v39 = vmul.f32 %v5778_v33, %v1178_v2  ;;  %v1244_v55 = vadd.f32 %v5809_v9, %v1209_v43  ;;  %1342 = vst.msk [vmem:[#allocation2 + $0x81] sm:$0xff] %vm840_vm1, %v1268_v44  ;;  %4866 = vmatpush.msra.mxu3 %v1419_v46 }
 0x2ec   : > { %v1272_v15 = vmax.f32 %v1240_v11, 0.0  ;;  %v1183_v42 = vmul.f32 %v5749_v8, %v1150_v48  ;;  %v1214_v5 = vmul.f32 %v5778_v33, %v1179_v12  ;;  %v1245_v7 = vadd.f32 %v5809_v9, %v1210_v31  ;;  %1343 = vst.msk [vmem:[#allocation2 + $0x91] sm:$0xff] %vm840_vm1, %v1269_v54  ;;  %2222 = vmatpush.msrb.mxu0 %v1422_v24 }
 0x2ed   : > { %v1273_v13 = vmax.f32 %v1241_v45, 0.0  ;;  %v1184_v53 = vmul.f32 %v5749_v8, %v1151_v56  ;;  %v1215_v6 = vmul.f32 %v5778_v33, %v1180_v20  ;;  %v1246_v16 = vadd.f32 %v5809_v9, %v1211_v35  ;;  %1344 = vst.msk [vmem:[#allocation2 + $0x99] sm:$0xff] %vm840_vm1, %v1270_v1  ;;  %1813 = vmatpush.msra.mxu1 %v1419_v46  ;;  %v1423_v20 = vld [vmem:[#allocation6 + $0x20] sm:$0xff]  ;;  %v1421_v46 = vld [vmem:[#allocation6 + $0x10] sm:$0xff] }
 0x2ee   : > { %v1274_v3 = vmax.f32 %v1242_v10, 0.0  ;;  %v1185_v29 = vmul.f32 %v5749_v8, %v1152_v18  ;;  %v1216_v48 = vmul.f32 %v5778_v33, %v1181_v27  ;;  %v1247_v19 = vadd.f32 %v5809_v9, %v1212_v0  ;;  %1345 = vst.msk [vmem:[#allocation2 + $0xa9] sm:$0xff] %vm840_vm1, %v1271_v62  ;;  %v5973_v60 = vld [vmem:[#allocation2 + $0x50] sm:$0xff]  ;;  %2377 = vmatpush.msrb.mxu2 %v1423_v20 }
 0x2ef   : > { %v1275_v23 = vmax.f32 %v1243_v14, 0.0  ;;  %v1186_v49 = vmul.f32 %v5749_v8, %v1153_v22  ;;  %v1217_v56 = vmul.f32 %v5778_v33, %v1182_v34  ;;  %v1248_v25 = vadd.f32 %v5809_v9, %v1213_v39  ;;  %1346 = vst.msk [vmem:[#allocation2 + $0xb1] sm:$0xff] %vm840_vm1, %v1272_v15  ;;  %4561 = vmatmul.msk.f32.vlgmr.msra.gmra.mxu3 %vm840_vm1, %v5973_v60  ;;  %v6047_v15 = vld [vmem:[#allocation2 + $0x20] sm:$0xff] }
 0x2f0   : > { %v1276_v32 = vmax.f32 %v1244_v55, 0.0  ;;  %v1187_v28 = vmul.f32 %v5749_v8, %v1154_v30  ;;  %v1218_v18 = vmul.f32 %v5778_v33, %v1183_v42  ;;  %v1249_v36 = vadd.f32 %v5809_v9, %v1214_v5  ;;  %1347 = vst.msk [vmem:[#allocation2 + $0xc1] sm:$0xff] %vm840_vm1, %v1273_v13 }
 0x2f1   : > { %v1277_v51 = vmax.f32 %v1245_v7, 0.0  ;;  %v1188_v38 = vmul.f32 %v5749_v8, %v1155_v57  ;;  %v1219_v22 = vmul.f32 %v5778_v33, %v1184_v53  ;;  %v1250_v26 = vadd.f32 %v5809_v9, %v1215_v6  ;;  %1348 = vst.msk [vmem:[#allocation2 + $0xc9] sm:$0xff] %vm840_vm1, %v1274_v3  ;;  %v6066_v7 = vld [vmem:[#allocation2 + $0x68] sm:$0xff]  ;;  %v6077_v53 = vld [vmem:[#allocation2 + $0x38] sm:$0xff] }
 0x2f2   : > { %v1278_v37 = vmax.f32 %v1246_v16, 0.0  ;;  %v1220_v63 = vmul.f32 %v5778_v33, %v1185_v29  ;;  %v1251_v30 = vadd.f32 %v5809_v9, %v1216_v48  ;;  %v1279_v40 = vmax.f32 %v1247_v19, 0.0  ;;  %1349 = vst.msk [vmem:[#allocation2 + $0xd9] sm:$0xff] %vm840_vm1, %v1275_v23 }
 0x2f3   : > { %v1221_v21 = vmul.f32 %v5778_v33, %v1186_v49  ;;  %v1252_v47 = vadd.f32 %v5809_v9, %v1217_v56  ;;  %v1280_v50 = vmax.f32 %v1248_v25, 0.0  ;;  %1350 = vst.msk [vmem:[#allocation2 + $0xe1] sm:$0xff] %vm840_vm1, %v1276_v32  ;;  %v1222_v8 = vmul.f32 %v5778_v33, %v1187_v28 }
 0x2f4   : > { %v1253_v57 = vadd.f32 %v5809_v9, %v1218_v18  ;;  %v1281_v41 = vmax.f32 %v1249_v36, 0.0  ;;  %1351 = vst.msk [vmem:[#allocation2 + $0xf1] sm:$0xff] %vm840_vm1, %v1277_v51  ;;  %v1223_v58 = vmul.f32 %v5778_v33, %v1188_v38  ;;  %v1254_v17 = vadd.f32 %v5809_v9, %v1219_v22  ;;  %v6135_v36 = vld [vmem:[#allocation2 + $0x80] sm:$0xff] }
 0x2f5   : > { %v1282_v59 = vmax.f32 %v1250_v26, 0.0  ;;  %1352 = vst.msk [vmem:[#allocation2 + $0xf9] sm:$0xff] %vm840_vm1, %v1278_v37  ;;  %v1255_v61 = vadd.f32 %v5809_v9, %v1220_v63  ;;  %v1283_v52 = vmax.f32 %v1251_v30, 0.0  ;;  %v1256_v4 = vadd.f32 %v5809_v9, %v1221_v21  ;;  %v6169_v21 = vld [vmem:[#allocation2 + $0x98] sm:$0xff] }
 0x2f6   : > { %1353 = vst.msk [vmem:[#allocation2 + $0x109] sm:$0xff] %vm840_vm1, %v1279_v40  ;;  %v1284_v2 = vmax.f32 %v1252_v47, 0.0  ;;  %v1257_v33 = vadd.f32 %v5809_v9, %v1222_v8  ;;  %v1285_v43 = vmax.f32 %v1253_v57, 0.0  ;;  %v1258_v11 = vadd.f32 %v5809_v9, %v1223_v58 }
 0x2f7   : > { %1354 = vst.msk [vmem:[#allocation2 + $0x111] sm:$0xff] %vm840_vm1, %v1280_v50  ;;  %v1286_v44 = vmax.f32 %v1254_v17, 0.0  ;;  %v1287_v12 = vmax.f32 %v1255_v61, 0.0  ;;  %v1288_v31 = vmax.f32 %v1256_v4, 0.0  ;;  %v5137_v9 = vmov 0.0  }
 0x2f8   : > { %1355 = vst.msk [vmem:[#allocation2 + $0x121] sm:$0xff] %vm840_vm1, %v1281_v41  ;;  %v1289_v45 = vmax.f32 %v1257_v33, 0.0  ;;  %v1290_v54 = vmax.f32 %v1258_v11, 0.0  ;;  %v1483_v5 = vrot.slane %v6047_v15, 1  ;;  %v1488_v6 = vrot.slane %v6077_v53, 1  ;;  %v6231_v11 = vld [vmem:[#allocation2 + $0xc8] sm:$0xff] }
 0x2f9   : > { %1356 = vst.msk [vmem:[#allocation2 + $0x129] sm:$0xff] %vm840_vm1, %v1282_v59  ;;  %v1493_v28 = vrot.slane %v5973_v60, 1  ;;  %v1498_v40 = vrot.slane %v6066_v7, 1  ;;  %v1503_v17 = vrot.slane %v6135_v36, 1  ;;  %v6200_v59 = vld [vmem:[#allocation2 + $0xb0] sm:$0xff] }
 0x2fa   : > { %1357 = vst.msk [vmem:[#allocation2 + $0x139] sm:$0xff] %vm840_vm1, %v1283_v52  ;;  %v1513_v20 = vrot.slane %v6200_v59, 1 }
 0x2fb   : > { %1358 = vst.msk [vmem:[#allocation2 + $0x141] sm:$0xff] %vm840_vm1, %v1284_v2 }
 0x2fc   : > { %1359 = vst.msk [vmem:[#allocation2 + $0x151] sm:$0xff] %vm840_vm1, %v1285_v43  ;;  %v1508_v43 = vrot.slane %v6169_v21, 1 }
 0x2fd   : > { %1360 = vst.msk [vmem:[#allocation2 + $0x159] sm:$0xff] %vm840_vm1, %v1286_v44 }
 0x2fe   : > { %1361 = vst.msk [vmem:[#allocation2 + $0x169] sm:$0xff] %vm840_vm1, %v1287_v12 }
 0x2ff   : > { %1362 = vst.msk [vmem:[#allocation2 + $0x171] sm:$0xff] %vm840_vm1, %v1288_v31 }
 0x300   : > { %1363 = vst.msk [vmem:[#allocation2 + $0x181] sm:$0xff] %vm840_vm1, %v1289_v45 }
 0x301   : > { %1364 = vst.msk [vmem:[#allocation2 + $0x189] sm:$0xff] %vm840_vm1, %v1290_v54 }
 0x302   : > { %1291 = vst.msk [vmem:[#allocation2] sm:$0xff] %vm840_vm1, %v5137_v9 }
 0x303   : > { %1292 = vst.msk [vmem:[#allocation2 + $0x8] sm:$0xff] %vm840_vm1, %v5137_v9 }
 0x304   : > { %1296 = vst.msk [vmem:[#allocation2 + $0x198] sm:$0xff] %vm840_vm1, %v5137_v9 }
 0x305   : > { %1297 = vst.msk [vmem:[#allocation2 + $0x1a0] sm:$0xff] %vm840_vm1, %v5137_v9 }
 0x306   : > { %1294 = vst.msk [vmem:[#allocation2 + $0x10] sm:$0x3] %vm1293_vm7, %v5137_v9 }
 0x307   : > { %1298 = vst.msk [vmem:[#allocation2 + $0x1a8] sm:$0x3] %vm1293_vm7, %v5137_v9 }
 0x308   : > { %1301 = vst.msk [vmem:[#allocation2 + $0x18] sm:$0x1] %vm1300_vm8, %v5137_v9 }
 0x309   : > { %v6003_v35 = vld [vmem:[#allocation2] sm:$0xff]  ;;  %1302 = vst.msk [vmem:[#allocation2 + $0x30] sm:$0x1] %vm1300_vm8, %v5137_v9 }
 0x30a   : > { %v6007_v10 = vld [vmem:[#allocation2 + $0x8] sm:$0xff]  ;;  %v1477_v1 = vrot.slane %v6003_v35, 1  ;;  %1303 = vst.msk [vmem:[#allocation2 + $0x48] sm:$0x1] %vm1300_vm8, %v5137_v9 }
 0x30b   : > { %v1478_v27 = vrot.slane %v6007_v10, 1  ;;  %1304 = vst.msk [vmem:[#allocation2 + $0x60] sm:$0x1] %vm1300_vm8, %v5137_v9 }
 0x30c   : > { %1305 = vst.msk [vmem:[#allocation2 + $0x78] sm:$0x1] %vm1300_vm8, %v5137_v9 }
 0x30d   : > { %v1479_v0 = vsel %vm1476_vm9, %v1477_v1, %v1478_v27  ;;  %v6018_v14 = vld [vmem:[#allocation2 + $0x10] sm:$0x3]  ;;  %1306 = vst.msk [vmem:[#allocation2 + $0x90] sm:$0x1] %vm1300_vm8, %v5137_v9  ;;  %v1912_v1 = vrot.slane %v6003_v35, 2 }
 0x30e   : > { %4522 = vmatmul.msk.f32.vlgmr.msrb.gmra.mxu1 %vm840_vm1, %v1479_v0  ;;  %1307 = vst.msk [vmem:[#allocation2 + $0xa8] sm:$0x1] %vm1300_vm8, %v5137_v9  ;;  %v1480_v62 = vrot.slane %v6018_v14, 1  ;;  %v6264_v0 = vld [vmem:[#allocation2 + $0xe0] sm:$0xff] }
 0x30f   : > { %v6026_v34 = vld [vmem:[#allocation2 + $0x18] sm:$0xff]  ;;  %1308 = vst.msk [vmem:[#allocation2 + $0xc0] sm:$0x1] %vm1300_vm8, %v5137_v9  ;;  %2071 = vmatpush.msrb.mxu1 %v1421_v46 }
 0x310   : > { %4618 = vmatmul.msk.f32.vlgmr.msrb.gmra.mxu0 %vm840_vm1, %v6026_v34  ;;  %1309 = vst.msk [vmem:[#allocation2 + $0xd8] sm:$0x1] %vm1300_vm8, %v5137_v9  ;;  %v1481_v55 = vsel %vm1476_vm9, %v1478_v27, %v1480_v62  ;;  %v1482_v42 = vrot.slane %v6026_v34, 1  ;;  %v6090_v3 = vld [vmem:[#allocation2 + $0x30] sm:$0xff]  ;;  %v1913_v27 = vrot.slane %v6007_v10, 2 }
 0x311   : > { %1310 = vst.msk [vmem:[#allocation2 + $0xf0] sm:$0x1] %vm1300_vm8, %v5137_v9  ;;  %v6117_v56 = vld [vmem:[#allocation2 + $0x48] sm:$0xff]  ;;  %v1487_v18 = vrot.slane %v6090_v3, 1 }
 0x312   : > { %1311 = vst.msk [vmem:[#allocation2 + $0x108] sm:$0x1] %vm1300_vm8, %v5137_v9  ;;  %v6038_v39 = vld [vmem:[#allocation2 + $0x60] sm:$0xff]  ;;  %v6071_v13 = vsel %vm1476_vm9, %v1482_v42, %v1483_v5  ;;  %v1492_v32 = vrot.slane %v6117_v56, 1  ;;  %v1915_v42 = vrot.slane %v6018_v14, 2 }
 0x313   : > { %1312 = vst.msk [vmem:[#allocation2 + $0x120] sm:$0x1] %vm1300_vm8, %v5137_v9  ;;  %4562 = vmatmul.msk.f32.gmra.mxu3 %vm840_vm1, %v6038_v39  ;;  %v6104_v23 = vld [vmem:[#allocation2 + $0x78] sm:$0xff]  ;;  %v6147_v22 = vsel %vm1476_vm9, %v1487_v18, %v1488_v6  ;;  %v1497_v30 = vrot.slane %v6038_v39, 1 }
 0x314   : > { %1313 = vst.msk [vmem:[#allocation2 + $0x138] sm:$0x1] %vm1300_vm8, %v5137_v9  ;;  %v6138_v51 = vsel %vm1476_vm9, %v1492_v32, %v1493_v28  ;;  %v6154_v37 = vld [vmem:[#allocation2 + $0x90] sm:$0xff]  ;;  %v1502_v58 = vrot.slane %v6104_v23, 1  ;;  %v1917_v32 = vrot.slane %v6026_v34, 2  ;;  %v6298_v18 = vld [vmem:[#allocation2 + $0xf8] sm:$0xff] }
 0x315   : > { %1314 = vst.msk [vmem:[#allocation2 + $0x150] sm:$0x1] %vm1300_vm8, %v5137_v9  ;;  %v6172_v47 = vsel %vm1476_vm9, %v1497_v30, %v1498_v40  ;;  %v6185_v57 = vld [vmem:[#allocation2 + $0xa8] sm:$0xff]  ;;  %v1507_v33 = vrot.slane %v6154_v37, 1 }
 0x316   : > { %4523 = vmatmul.msk.f32.gmra.mxu1 %vm840_vm1, %v1481_v55  ;;  %1315 = vst.msk [vmem:[#allocation2 + $0x168] sm:$0x1] %vm1300_vm8, %v5137_v9  ;;  %v6203_v61 = vsel %vm1476_vm9, %v1502_v58, %v1503_v17  ;;  %v6216_v4 = vld [vmem:[#allocation2 + $0xc0] sm:$0xff]  ;;  %v1914_v55 = vsel %vm1911_vm10, %v1912_v1, %v1913_v27 }
 0x317   : > { %1316 = vst.msk [vmem:[#allocation2 + $0x180] sm:$0x1] %vm1300_vm8, %v5137_v9  ;;  %v6234_v44 = vsel %vm1476_vm9, %v1507_v33, %v1508_v43  ;;  %v6247_v45 = vld [vmem:[#allocation2 + $0xd8] sm:$0xff]  ;;  %v1517_v14 = vrot.slane %v6216_v4, 1  ;;  %v1923_v33 = vrot.slane %v6077_v53, 2 }
 0x318   : > { %1317 = vst.msk [vmem:[#allocation2 + $0x29] sm:$0x1] %vm1300_vm8, %v5137_v9  ;;  %4619 = vmatmul.msk.f32.gmra.mxu0 %vm840_vm1, %v6047_v15  ;;  %v1522_v46 = vrot.slane %v6247_v45, 1 }
 0x319   : > { %1318 = vst.msk [vmem:[#allocation2 + $0x41] sm:$0x1] %vm1300_vm8, %v5137_v9 }
 0x31a   : > { %1319 = vst.msk [vmem:[#allocation2 + $0x59] sm:$0x1] %vm1300_vm8, %v5137_v9 }
 0x31b   : > { %1320 = vst.msk [vmem:[#allocation2 + $0x71] sm:$0x1] %vm1300_vm8, %v5137_v9  ;;  %4563 = vmatmul.msk.f32.gmra.mxu3 %vm840_vm1, %v6066_v7 }
 0x31c   : > { %1321 = vst.msk [vmem:[#allocation2 + $0x89] sm:$0x1] %vm1300_vm8, %v5137_v9 }
 0x31d   : > { %1322 = vst.msk [vmem:[#allocation2 + $0xa1] sm:$0x1] %vm1300_vm8, %v5137_v9 }
 0x31e   : > { %1323 = vst.msk [vmem:[#allocation2 + $0xb9] sm:$0x1] %vm1300_vm8, %v5137_v9  ;;  %4524 = vmatmul.msk.f32.gmra.mxu1 %vm840_vm1, %v6071_v13 }
 0x31f   : > { %1324 = vst.msk [vmem:[#allocation2 + $0xd1] sm:$0x1] %vm1300_vm8, %v5137_v9  ;;  %v6088_v16 = vld [vmem:[#allocation2 + $0x28] sm:$0x3] }
 0x320   : > { %9101 = vst [vmem:[#allocation17_spill] sm:$0xff] %v6090_v3  ;;  %v6094_v29 = vld [vmem:[#allocation2 + $0x40] sm:$0x3]  ;;  %4620 = vmatmul.msk.f32.gmra.mxu0 %vm840_vm1, %v6090_v3  ;;  %v1485_v19 = vrot.slane %v6088_v16, 1 }
 0x321   : > { %1325 = vst.msk [vmem:[#allocation2 + $0xe9] sm:$0x1] %vm1300_vm8, %v5137_v9  ;;  %v1490_v48 = vrot.slane %v6094_v29, 1  ;;  %v6144_v38 = vld [vmem:[#allocation2 + $0x58] sm:$0x3] }
 0x322   : > { %1326 = vst.msk [vmem:[#allocation2 + $0x101] sm:$0x1] %vm1300_vm8, %v5137_v9  ;;  %v6122_v25 = vsel %vm1476_vm9, %v1483_v5, %v1485_v19  ;;  %v1495_v26 = vrot.slane %v6144_v38, 1  ;;  %v6178_v50 = vld [vmem:[#allocation2 + $0x70] sm:$0x3]  ;;  %v1518_v19 = vrot.slane %v6231_v11, 1 }
 0x323   : > { %1327 = vst.msk [vmem:[#allocation2 + $0x119] sm:$0x1] %vm1300_vm8, %v5137_v9  ;;  %v6109_v49 = vsel %vm1476_vm9, %v1488_v6, %v1490_v48  ;;  %4564 = vmatmul.msk.f32.gmra.mxu3 %vm840_vm1, %v6104_v23  ;;  %v1500_v8 = vrot.slane %v6178_v50, 1  ;;  %v6209_v52 = vld [vmem:[#allocation2 + $0x88] sm:$0x3]  ;;  %v6281_v5 = vld [vmem:[#allocation2 + $0xf0] sm:$0xff]  ;;  %v1916_v48 = vsel %vm1911_vm10, %v1913_v27, %v1915_v42 }
 0x324   : > { %1328 = vst.msk [vmem:[#allocation2 + $0x131] sm:$0x1] %vm1300_vm8, %v5137_v9  ;;  %4527 = vmatmul.msk.f32.vlgmr.msra.gmra.mxu2 %vm840_vm1, %v6109_v49  ;;  %v6157_v63 = vsel %vm1476_vm9, %v1493_v28, %v1495_v26  ;;  %v1505_v24 = vrot.slane %v6209_v52, 1  ;;  %v6240_v12 = vld [vmem:[#allocation2 + $0xa0] sm:$0x3]  ;;  %v1918_v28 = vrot.slane %v6047_v15, 2  ;;  %v6301_v26 = vsel %vm1476_vm9, %v1517_v14, %v1518_v19 }
 0x325   : > { %1329 = vst.msk [vmem:[#allocation2 + $0x149] sm:$0x1] %vm1300_vm8, %v5137_v9  ;;  %v6188_v41 = vsel %vm1476_vm9, %v1498_v40, %v1500_v8  ;;  %v1510_v31 = vrot.slane %v6240_v12, 1  ;;  %v6318_v8 = vld [vmem:[#allocation2 + $0x108] sm:$0xff]  ;;  %v6364_v42 = vld [vmem:[#allocation2 + $0x120] sm:$0xff] }
 0x326   : > { %9102 = vst [vmem:[#allocation18_spill] sm:$0xff] %v6117_v56  ;;  %4525 = vmatmul.msk.f32.gmra.mxu1 %vm840_vm1, %v6122_v25  ;;  %v6219_v2 = vsel %vm1476_vm9, %v1503_v17, %v1505_v24  ;;  %v6307_v30 = vld [vmem:[#allocation2 + $0xd0] sm:$0x3]  ;;  %v6310_v40 = vsel %vm1911_vm10, %v1917_v32, %v1918_v28  ;;  %v1922_v24 = vrot.slane %v6090_v3, 2 }
 0x327   : > { %1330 = vst.msk [vmem:[#allocation2 + $0x161] sm:$0x1] %vm1300_vm8, %v5137_v9  ;;  %v6250_v54 = vsel %vm1476_vm9, %v1508_v43, %v1510_v31  ;;  %v6338_v43 = vld [vmem:[#allocation2 + $0x110] sm:$0xff] }
 0x328   : > { %1331 = vst.msk [vmem:[#allocation2 + $0x179] sm:$0x1] %vm1300_vm8, %v5137_v9  ;;  %4621 = vmatmul.msk.f32.gmra.mxu0 %vm840_vm1, %v6077_v53  ;;  %v6354_v27 = vsel %vm1911_vm10, %v1922_v24, %v1923_v33 }
 0x329   : > { %1332 = vst.msk [vmem:[#allocation2 + $0x191] sm:$0x1] %vm1300_vm8, %v5137_v9  ;;  %v1512_v9 = vrot.slane %v6185_v57, 1 }
 0x32a   : > { %9103 = vst [vmem:[#allocation19_spill] sm:$0xff] %v6250_v54 }
 0x32b   : > { %4565 = vmatmul.msk.f32.gmra.mxu3 %vm840_vm1, %v6135_v36  ;;  %v6267_v62 = vsel %vm1476_vm9, %v1512_v9, %v1513_v20  ;;  %9106 = vst [vmem:[#allocation22_spill] sm:$0xff] %v6301_v26 }
 0x32c   : > { %4528 = vmatmul.msk.f32.gmra.mxu2 %vm840_vm1, %v6138_v51  ;;  %9104 = vst [vmem:[#allocation20_spill] sm:$0xff] %v6267_v62 }
 0x32d   : > { %9110 = vst [vmem:[#allocation26_spill] sm:$0xff] %v6354_v27 }
 0x32e   : > { %4526 = vmatmul.msk.f32.gmra.mxu1 %vm840_vm1, %v6147_v22 }
 0x330   : > { %4622 = vmatmul.msk.f32.gmra.mxu0 %vm840_vm1, %v6117_v56 }
 0x333   : > { %4566 = vmatmul.msk.f32.gmra.mxu3 %vm840_vm1, %v6154_v37 }
 0x334   : > { %4529 = vmatmul.msk.f32.gmra.mxu2 %vm840_vm1, %v6157_v63 }
 0x336   : > { %4554 = vmatmul.msk.f32.vlgmr.msra.gmra.mxu1 %vm840_vm1, %v6003_v35  ;;  %v6274_v35 = vld [vmem:[#allocation2 + $0xb8] sm:$0x3] }
 0x338   : > { %4623 = vmatmul.msk.f32.gmra.mxu0 %vm840_vm1, %v5973_v60 }
 0x33b   : > { %4567 = vmatmul.msk.f32.gmra.mxu3 %vm840_vm1, %v6169_v21 }
 0x33c   : > { %4530 = vmatmul.msk.f32.gmra.mxu2 %vm840_vm1, %v6172_v47 }
 0x33e   : > { %4555 = vmatmul.msk.f32.gmra.mxu1 %vm840_vm1, %v6007_v10  ;;  %v1515_v10 = vrot.slane %v6274_v35, 1 }
 0x340   : > { %4624 = vmatmul.msk.f32.gmra.mxu0 %vm840_vm1, %v6038_v39  ;;  %v6284_v6 = vsel %vm1476_vm9, %v1513_v20, %v1515_v10  ;;  %v6349_v20 = vld [vmem:[#allocation2 + $0xe8] sm:$0x3]  ;;  %v1925_v10 = vrot.slane %v6094_v29, 2 }
 0x341   : > { %9105 = vst [vmem:[#allocation21_spill] sm:$0xff] %v6284_v6 }
 0x343   : > { %4568 = vmatmul.msk.f32.gmra.mxu3 %vm840_vm1, %v6185_v57 }
 0x344   : > { %4531 = vmatmul.msk.f32.gmra.mxu2 %vm840_vm1, %v6188_v41 }
 0x346   : > { %4556 = vmatmul.msk.f32.gmra.mxu1 %vm840_vm1, %v6026_v34  ;;  %v1520_v34 = vrot.slane %v6307_v30, 1 }
 0x348   : > { %4625 = vmatmul.msk.f32.gmra.mxu0 %vm840_vm1, %v6066_v7  ;;  %v6321_v58 = vsel %vm1476_vm9, %v1518_v19, %v1520_v34  ;;  %v6376_v19 = vsel %vm1911_vm10, %v1923_v33, %v1925_v10  ;;  %v1528_v34 = vrot.slane %v6298_v18, 1 }
 0x349   : > { %9107 = vst [vmem:[#allocation23_spill] sm:$0xff] %v6321_v58 }
 0x34a   : > { %9114 = vst [vmem:[#allocation30_spill] sm:$0xff] %v6376_v19 }
 0x34b   : > { %4569 = vmatmul.msk.f32.gmra.mxu3 %vm840_vm1, %v6200_v59 }
 0x34c   : > { %4532 = vmatmul.msk.f32.gmra.mxu2 %vm840_vm1, %v6203_v61 }
 0x34e   : > { %4557 = vmatmul.msk.f32.gmra.mxu1 %vm840_vm1, %v6047_v15  ;;  %v1920_v15 = vrot.slane %v6088_v16, 2  ;;  %v1523_v16 = vrot.slane %v6264_v0, 1 }
 0x350   : > { %4626 = vmatmul.msk.f32.gmra.mxu0 %vm840_vm1, %v6104_v23  ;;  %v6328_v17 = vsel %vm1911_vm10, %v1918_v28, %v1920_v15  ;;  %v6341_v31 = vsel %vm1476_vm9, %v1522_v46, %v1523_v16  ;;  %v1527_v28 = vrot.slane %v6281_v5, 1  ;;  %v1927_v15 = vrot.slane %v6117_v56, 2 }
 0x351   : > { %9108 = vst [vmem:[#allocation24_spill] sm:$0xff] %v6341_v31  ;;  %v1928_v46 = vrot.slane %v5973_v60, 2 }
 0x352   : > { %v6393_v24 = vsel %vm1476_vm9, %v1527_v28, %v1528_v34 }
 0x353   : > { %4570 = vmatmul.msk.f32.gmra.mxu3 %vm840_vm1, %v6216_v4  ;;  %9116 = vst [vmem:[#allocation32_spill] sm:$0xff] %v6393_v24  ;;  %v6404_v10 = vsel %vm1911_vm10, %v1927_v15, %v1928_v46 }
 0x354   : > { %4533 = vmatmul.msk.f32.gmra.mxu2 %vm840_vm1, %v6219_v2  ;;  %9118 = vst [vmem:[#allocation34_spill] sm:$0xff] %v6404_v10 }
 0x356   : > { %4558 = vmatmul.msk.f32.gmra.mxu1 %vm840_vm1, %v6090_v3 }
 0x358   : > { %4627 = vmatmul.msk.f32.gmra.mxu0 %vm840_vm1, %v6135_v36 }
 0x35b   : > { %4571 = vmatmul.msk.f32.gmra.mxu3 %vm840_vm1, %v6231_v11 }
 0x35c   : > { %4534 = vmatmul.msk.f32.gmra.mxu2 %vm840_vm1, %v6234_v44 }
 0x35e   : > { %4559 = vmatmul.msk.f32.gmra.mxu1 %vm840_vm1, %v6077_v53 }
 0x360   : > { %4628 = vmatmul.msk.f32.gmra.mxu0 %vm840_vm1, %v6154_v37 }
 0x363   : > { %4572 = vmatmul.msk.f32.gmra.mxu3 %vm840_vm1, %v6247_v45 }
 0x364   : > { %4535 = vmatmul.msk.f32.gmra.mxu2 %vm840_vm1, %v6250_v54 }
 0x366   : > { %4560 = vmatmul.msk.f32.gmra.mxu1 %vm840_vm1, %v6117_v56 }
 0x368   : > { %4629 = vmatmul.msk.f32.gmra.mxu0 %vm840_vm1, %v6169_v21 }
 0x36b   : > { %4573 = vmatmul.msk.f32.gmra.mxu3 %vm840_vm1, %v6264_v0 }
 0x36c   : > { %4536 = vmatmul.msk.f32.gmra.mxu2 %vm840_vm1, %v6267_v62 }
 0x36e   : > { %4586 = vmatmul.msk.f32.vlgmr.msrb.gmra.mxu1 %vm840_vm1, %v1914_v55  ;;  %v1525_v55 = vrot.slane %v6349_v20, 1 }
 0x370   : > { %4630 = vmatmul.msk.f32.gmra.mxu0 %vm840_vm1, %v6185_v57 }
 0x372   : > { %v6351_v1 = vpop.f32.mrf.mxu3 }
 0x373   : > { %4574 = vmatmul.msk.f32.gmra.mxu3 %vm840_vm1, %v6281_v5 }
 0x374   : > { %4537 = vmatmul.msk.f32.gmra.mxu2 %vm840_vm1, %v6284_v6 }
 0x376   : > { %4587 = vmatmul.msk.f32.gmra.mxu1 %vm840_vm1, %v1916_v48  ;;  %v6367_v48 = vsel %vm1476_vm9, %v1523_v16, %v1525_v55  ;;  %v6390_v16 = vld [vmem:[#allocation2 + $0x128] sm:$0xff]  ;;  %v6401_v55 = vld [vmem:[#allocation2 + $0x100] sm:$0x3] }
 0x377   : > { %9112 = vst [vmem:[#allocation28_spill] sm:$0xff] %v6367_v48  ;;  %v1530_v28 = vrot.slane %v6401_v55, 1 }
 0x378   : > { %4631 = vmatmul.msk.f32.gmra.mxu0 %vm840_vm1, %v6200_v59 }
 0x37b   : > { %4575 = vmatmul.msk.f32.gmra.mxu3 %vm840_vm1, %v6298_v18 }
 0x37c   : > { %4538 = vmatmul.msk.f32.gmra.mxu2 %vm840_vm1, %v6301_v26 }
 0x37e   : > { %4588 = vmatmul.msk.f32.gmra.mxu1 %vm840_vm1, %v6310_v40 }
 0x380   : > { %4632 = vmatmul.msk.f32.gmra.mxu0 %vm840_vm1, %v6216_v4 }
 0x383   : > { %4576 = vmatmul.msk.f32.gmra.mxu3 %vm840_vm1, %v6318_v8 }
 0x384   : > { %4539 = vmatmul.msk.f32.gmra.mxu2 %vm840_vm1, %v6321_v58 }
 0x386   : > { %4589 = vmatmul.msk.f32.gmra.mxu1 %vm840_vm1, %v6328_v17 }
 0x388   : > { %4633 = vmatmul.msk.f32.gmra.mxu0 %vm840_vm1, %v6231_v11 }
 0x38b   : > { %v6343_v9 = vpop.f32.mrf.mxu1  ;;  %4577 = vmatmul.msk.f32.gmra.mxu3 %vm840_vm1, %v6338_v43 }
 0x38c   : > { %9109 = vst [vmem:[#allocation25_spill] sm:$0xff] %v6343_v9  ;;  %4540 = vmatmul.msk.f32.gmra.mxu2 %vm840_vm1, %v6341_v31  ;;  %v6472_v31 = vld [vmem:[#allocation2 + $0x150] sm:$0xff] }
 0x38d   : > { %v6356_v53 = vpop.f32.mrf.mxu0 }
 0x38e   : > { %9111 = vst [vmem:[#allocation27_spill] sm:$0xff] %v6356_v53  ;;  %4590 = vmatmul.msk.f32.gmra.mxu1 %vm840_vm1, %v6354_v27 }
 0x390   : > { %4634 = vmatmul.msk.f32.gmra.mxu0 %vm840_vm1, %v6247_v45 }
 0x393   : > { %v6369_v14 = vpop.f32.mrf.mxu1  ;;  %4578 = vmatmul.msk.f32.gmra.mxu3 %vm840_vm1, %v6364_v42 }
 0x394   : > { %9113 = vst [vmem:[#allocation29_spill] sm:$0xff] %v6369_v14  ;;  %4541 = vmatmul.msk.f32.gmra.mxu2 %vm840_vm1, %v6367_v48  ;;  %v6419_v48 = vsel %vm1476_vm9, %v1528_v34, %v1530_v28  ;;  %v1532_v28 = vrot.slane %v6318_v8, 1 }
 0x395   : > { %v6378_v32 = vpop.f32.mrf.mxu0  ;;  %9120 = vst [vmem:[#allocation36_spill] sm:$0xff] %v6419_v48 }
 0x396   : > { %9115 = vst [vmem:[#allocation31_spill] sm:$0xff] %v6378_v32  ;;  %4591 = vmatmul.msk.f32.gmra.mxu1 %vm840_vm1, %v6376_v19  ;;  %v6382_v29 = vpop.f32.mrf.mxu3 }
 0x398   : > { %4635 = vmatmul.msk.f32.gmra.mxu0 %vm840_vm1, %v6264_v0 }
 0x39b   : > { %v6395_v33 = vpop.f32.mrf.mxu1  ;;  %4579 = vmatmul.msk.f32.gmra.mxu3 %vm840_vm1, %v6390_v16 }
 0x39c   : > { %9117 = vst [vmem:[#allocation33_spill] sm:$0xff] %v6395_v33  ;;  %4542 = vmatmul.msk.f32.gmra.mxu2 %vm840_vm1, %v6393_v24  ;;  %v1930_v33 = vrot.slane %v6144_v38, 2  ;;  %v6416_v24 = vld [vmem:[#allocation2 + $0x138] sm:$0xff] }
 0x39d   : > { %v6406_v32 = vpop.f32.mrf.mxu0 }
 0x39e   : > { %9119 = vst [vmem:[#allocation35_spill] sm:$0xff] %v6406_v32  ;;  %4592 = vmatmul.msk.f32.gmra.mxu1 %vm840_vm1, %v6404_v10  ;;  %v6410_v60 = vpop.f32.mrf.mxu3  ;;  %v6428_v32 = vsel %vm1911_vm10, %v1928_v46, %v1930_v33  ;;  %v1933_v46 = vrot.slane %v6066_v7, 2  ;;  %v6444_v33 = vld [vmem:[#allocation2 + $0x140] sm:$0xff] }
 0x39f   : > { %9122 = vst [vmem:[#allocation38_spill] sm:$0xff] %v6428_v32 }
 0x3a0   : > { %4636 = vmatmul.msk.f32.gmra.mxu0 %vm840_vm1, %v6281_v5 }
 0x3a3   : > { %v6421_v15 = vpop.f32.mrf.mxu1  ;;  %4580 = vmatmul.msk.f32.gmra.mxu3 %vm840_vm1, %v6416_v24 }
 0x3a4   : > { %9121 = vst [vmem:[#allocation37_spill] sm:$0xff] %v6421_v15  ;;  %4543 = vmatmul.msk.f32.gmra.mxu2 %vm840_vm1, %v6419_v48  ;;  %v1533_v15 = vrot.slane %v6338_v43, 1  ;;  %v1932_v48 = vrot.slane %v6038_v39, 2 }
 0x3a5   : > { %v6430_v56 = vpop.f32.mrf.mxu0 }
 0x3a6   : > { %9123 = vst [vmem:[#allocation39_spill] sm:$0xff] %v6430_v56  ;;  %4593 = vmatmul.msk.f32.gmra.mxu1 %vm840_vm1, %v6428_v32  ;;  %v6434_v38 = vpop.f32.mrf.mxu3  ;;  %v6447_v56 = vsel %vm1476_vm9, %v1532_v28, %v1533_v15  ;;  %v6458_v14 = vsel %vm1911_vm10, %v1932_v48, %v1933_v46 }
 0x3a7   : > { %v6436_v34 = vpop.f32.mrf.mxu2  ;;  %9125 = vst [vmem:[#allocation41_spill] sm:$0xff] %v6447_v56 }
 0x3a8   : > { %9124 = vst [vmem:[#allocation40_spill] sm:$0xff] %v6436_v34  ;;  %4637 = vmatmul.msk.f32.gmra.mxu0 %vm840_vm1, %v6298_v18  ;;  %v6455_v34 = vld [vmem:[#allocation2 + $0x118] sm:$0x3] }
 0x3a9   : > { %9127 = vst [vmem:[#allocation43_spill] sm:$0xff] %v6458_v14 }
 0x3ab   : > { %v6449_v53 = vpop.f32.mrf.mxu1  ;;  %4581 = vmatmul.msk.f32.gmra.mxu3 %vm840_vm1, %v6444_v33 }
 0x3ac   : > { %9126 = vst [vmem:[#allocation42_spill] sm:$0xff] %v6449_v53  ;;  %4544 = vmatmul.msk.f32.gmra.mxu2 %vm840_vm1, %v6447_v56  ;;  %v1535_v53 = vrot.slane %v6455_v34, 1  ;;  %v1935_v56 = vrot.slane %v6178_v50, 2 }
 0x3ad   : > { %v6460_v39 = vpop.f32.mrf.mxu0 }
 0x3ae   : > { %9128 = vst [vmem:[#allocation44_spill] sm:$0xff] %v6460_v39  ;;  %4594 = vmatmul.msk.f32.gmra.mxu1 %vm840_vm1, %v6458_v14  ;;  %v6464_v7 = vpop.f32.mrf.mxu3  ;;  %v6475_v48 = vsel %vm1476_vm9, %v1533_v15, %v1535_v53  ;;  %v1537_v53 = vrot.slane %v6364_v42, 1  ;;  %v1538_v15 = vrot.slane %v6390_v16, 1 }
 0x3af   : > { %v6466_v28 = vpop.f32.mrf.mxu2  ;;  %9130 = vst [vmem:[#allocation46_spill] sm:$0xff] %v6475_v48 }
 0x3b0   : > { %9129 = vst [vmem:[#allocation45_spill] sm:$0xff] %v6466_v28  ;;  %4638 = vmatmul.msk.f32.gmra.mxu0 %vm840_vm1, %v6318_v8  ;;  %v6484_v28 = vsel %vm1911_vm10, %v1933_v46, %v1935_v56  ;;  %v1937_v56 = vrot.slane %v6104_v23, 2  ;;  %v1938_v46 = vrot.slane %v6135_v36, 2  ;;  %v6504_v3 = vsel %vm1476_vm9, %v1537_v53, %v1538_v15 }
 0x3b1   : > { %9132 = vst [vmem:[#allocation48_spill] sm:$0xff] %v6484_v28 }
 0x3b2   : > { %9135 = vst [vmem:[#allocation51_spill] sm:$0xff] %v6504_v3 }
 0x3b3   : > { %v6477_v39 = vpop.f32.mrf.mxu1  ;;  %4582 = vmatmul.msk.f32.gmra.mxu3 %vm840_vm1, %v6472_v31 }
 0x3b4   : > { %9131 = vst [vmem:[#allocation47_spill] sm:$0xff] %v6477_v39  ;;  %4545 = vmatmul.msk.f32.gmra.mxu2 %vm840_vm1, %v6475_v48  ;;  %v6501_v48 = vld [vmem:[#allocation2 + $0x158] sm:$0xff] }
 0x3b5   : > { %v6492_v39 = vpop.f32.mrf.mxu0 }
 0x3b6   : > { %4595 = vmatmul.msk.f32.gmra.mxu1 %vm840_vm1, %v6484_v28  ;;  %v6488_v50 = vpop.f32.mrf.mxu3  ;;  %9133 = vst [vmem:[#allocation49_spill] sm:$0xff] %v6492_v39 }
 0x3b7   : > { %v1659_v9 = vpop.f32.mrf.mxu2 }
 0x3b8   : > { %v6495_v58 = vadd.f32 %v6351_v1, %v1659_v9  ;;  %4639 = vmatmul.msk.f32.gmra.mxu0 %vm840_vm1, %v6338_v43  ;;  %v6512_v9 = vld [vmem:[#allocation2 + $0x130] sm:$0x3]  ;;  %v6515_v1 = vsel %vm1911_vm10, %v1937_v56, %v1938_v46  ;;  %v6530_v56 = vld [vmem:[#allocation2 + $0x168] sm:$0xff] }
 0x3b9   : > { %9137 = vst [vmem:[#allocation53_spill] sm:$0xff] %v6515_v1  ;;  %v1540_v53 = vrot.slane %v6512_v9, 1 }
 0x3ba   : > { %9134 = vst [vmem:[#allocation50_spill] sm:$0xff] %v6495_v58 }
 0x3bb   : > { %v6506_v26 = vpop.f32.mrf.mxu1  ;;  %4583 = vmatmul.msk.f32.gmra.mxu3 %vm840_vm1, %v6501_v48 }
 0x3bc   : > { %9136 = vst [vmem:[#allocation52_spill] sm:$0xff] %v6506_v26  ;;  %4546 = vmatmul.msk.f32.gmra.mxu2 %vm840_vm1, %v6504_v3  ;;  %v1940_v3 = vrot.slane %v6209_v52, 2  ;;  %v6533_v26 = vsel %vm1476_vm9, %v1538_v15, %v1540_v53  ;;  %v1542_v15 = vrot.slane %v6416_v24, 1  ;;  %v1543_v53 = vrot.slane %v6444_v33, 1 }
 0x3bd   : > { %v6528_v39 = vpop.f32.mrf.mxu0  ;;  %9140 = vst [vmem:[#allocation56_spill] sm:$0xff] %v6533_v26 }
 0x3be   : > { %4596 = vmatmul.msk.f32.gmra.mxu1 %vm840_vm1, %v6515_v1  ;;  %v6519_v23 = vpop.f32.mrf.mxu3  ;;  %9139 = vst [vmem:[#allocation55_spill] sm:$0xff] %v6528_v39  ;;  %v6557_v39 = vld [vmem:[#allocation2 + $0x170] sm:$0xff] }
 0x3bf   : > { %v1662_v36 = vpop.f32.mrf.mxu2 }
 0x3c0   : > { %v6523_v58 = vadd.f32 %v6382_v29, %v1662_v36  ;;  %4640 = vmatmul.msk.f32.gmra.mxu0 %vm840_vm1, %v6364_v42  ;;  %v6542_v29 = vsel %vm1911_vm10, %v1938_v46, %v1940_v3  ;;  %v1942_v3 = vrot.slane %v6154_v37, 2  ;;  %v1943_v46 = vrot.slane %v6169_v21, 2 }
 0x3c1   : > { %9142 = vst [vmem:[#allocation58_spill] sm:$0xff] %v6542_v29 }
 0x3c2   : > { %9138 = vst [vmem:[#allocation54_spill] sm:$0xff] %v6523_v58  ;;  %v6573_v37 = vsel %vm1911_vm10, %v1942_v3, %v1943_v46 }
 0x3c3   : > { %v6535_v6 = vpop.f32.mrf.mxu1  ;;  %4584 = vmatmul.msk.f32.gmra.mxu3 %vm840_vm1, %v6530_v56  ;;  %9146 = vst [vmem:[#allocation62_spill] sm:$0xff] %v6573_v37 }
 0x3c4   : > { %9141 = vst [vmem:[#allocation57_spill] sm:$0xff] %v6535_v6  ;;  %4547 = vmatmul.msk.f32.gmra.mxu2 %vm840_vm1, %v6533_v26  ;;  %v1424_v26 = vld [vmem:[#allocation6 + $0x28] sm:$0xff]  ;;  %v6560_v6 = vsel %vm1476_vm9, %v1542_v15, %v1543_v53 }
 0x3c5   : > { %2531 = vmatpush.msrb.mxu3 %v1424_v26  ;;  %9144 = vst [vmem:[#allocation60_spill] sm:$0xff] %v6560_v6  ;;  %v6564_v54 = vpop.f32.mrf.mxu0 }
 0x3c6   : > { %4597 = vmatmul.msk.f32.gmra.mxu1 %vm840_vm1, %v6542_v29  ;;  %v6546_v52 = vpop.f32.mrf.mxu3  ;;  %9145 = vst [vmem:[#allocation61_spill] sm:$0xff] %v6564_v54 }
 0x3c7   : > { %v1665_v36 = vpop.f32.mrf.mxu2 }
 0x3c8   : > { %v6551_v58 = vadd.f32 %v6410_v60, %v1665_v36  ;;  %4641 = vmatmul.msk.f32.gmra.mxu0 %vm840_vm1, %v6390_v16  ;;  %v6570_v60 = vld [vmem:[#allocation2 + $0x148] sm:$0x3] }
 0x3c9   : > { %v1545_v36 = vrot.slane %v6570_v60, 1 }
 0x3ca   : > { %9143 = vst [vmem:[#allocation59_spill] sm:$0xff] %v6551_v58  ;;  %v1945_v58 = vrot.slane %v6240_v12, 2 }
 0x3cb   : > { %v6562_v62 = vpop.f32.mrf.mxu1  ;;  %4585 = vmatmul.msk.f32.gmra.mxu3 %vm840_vm1, %v6557_v39 }
 0x3cc   : > { %4548 = vmatmul.msk.f32.gmra.mxu2 %vm840_vm1, %v6560_v6  ;;  %v6587_v6 = vsel %vm1476_vm9, %v1543_v53, %v1545_v36  ;;  %v6596_v54 = vsel %vm1911_vm10, %v1943_v46, %v1945_v58  ;;  %v1548_v36 = vrot.slane %v6501_v48, 1  ;;  %v1947_v58 = vrot.slane %v6185_v57, 2 }
 0x3cd   : > { %9148 = vst [vmem:[#allocation64_spill] sm:$0xff] %v6587_v6  ;;  %v1948_v46 = vrot.slane %v6200_v59, 2 }
 0x3ce   : > { %4598 = vmatmul.msk.f32.gmra.mxu1 %vm840_vm1, %v6573_v37  ;;  %v6577_v21 = vpop.f32.mrf.mxu3  ;;  %9149 = vst [vmem:[#allocation65_spill] sm:$0xff] %v6596_v54 }
 0x3cf   : > { %v1668_v26 = vpop.f32.mrf.mxu2 }
 0x3d0   : > { %v6581_v15 = vadd.f32 %v6434_v38, %v1668_v26  ;;  %4642 = vmatmul.msk.f32.gmra.mxu0 %vm840_vm1, %v6416_v24  ;;  %v6598_v38 = vpop.f32.mrf.mxu0  ;;  %v1547_v26 = vrot.slane %v6472_v31, 1 }
 0x3d1   : > { %9150 = vst [vmem:[#allocation66_spill] sm:$0xff] %v6598_v38  ;;  %v6625_v38 = vsel %vm1911_vm10, %v1947_v58, %v1948_v46  ;;  %v1426_v58 = vld [vmem:[#allocation6 + $0x38] sm:$0xff] }
 0x3d2   : > { %9147 = vst [vmem:[#allocation63_spill] sm:$0xff] %v6581_v15  ;;  %v6614_v15 = vsel %vm1476_vm9, %v1547_v26, %v1548_v36  ;;  %2837 = vmatpush.msra.mxu0 %v1426_v58 }
 0x3d3   : > { %v6589_v3 = vpop.f32.mrf.mxu1  ;;  %4682 = vmatmul.msk.f32.vlgmr.msrb.gmra.mxu3 %vm840_vm1, %v6310_v40  ;;  %9152 = vst [vmem:[#allocation68_spill] sm:$0xff] %v6614_v15 }
 0x3d4   : > { %4549 = vmatmul.msk.f32.gmra.mxu2 %vm840_vm1, %v6587_v6  ;;  %9154 = vst [vmem:[#allocation70_spill] sm:$0xff] %v6625_v38 }
 0x3d6   : > { %4599 = vmatmul.msk.f32.gmra.mxu1 %vm840_vm1, %v6596_v54  ;;  %v6602_v12 = vpop.f32.mrf.mxu3 }
 0x3d7   : > { %v1671_v53 = vpop.f32.mrf.mxu2 }
 0x3d8   : > { %v6607_v40 = vadd.f32 %v6464_v7, %v1671_v53  ;;  %4643 = vmatmul.msk.f32.gmra.mxu0 %vm840_vm1, %v6444_v33  ;;  %v6622_v7 = vld [vmem:[#allocation2 + $0x160] sm:$0x3]  ;;  %v1427_v53 = vld [vmem:[#allocation6 + $0x40] sm:$0xff]  ;;  %v6632_v26 = vpop.f32.mrf.mxu0 }
 0x3d9   : > { %2991 = vmatpush.msra.mxu2 %v1427_v53  ;;  %v1950_v53 = vrot.slane %v6274_v35, 2  ;;  %v1552_v35 = vrot.slane %v6530_v56, 1 }
 0x3da   : > { %9151 = vst [vmem:[#allocation67_spill] sm:$0xff] %v6607_v40  ;;  %v1425_v40 = vld [vmem:[#allocation6 + $0x30] sm:$0xff] }
 0x3db   : > { %v6616_v6 = vpop.f32.mrf.mxu1  ;;  %4683 = vmatmul.msk.f32.gmra.mxu3 %vm840_vm1, %v6328_v17  ;;  %2682 = vmatpush.msra.mxu1 %v1425_v40  ;;  %v1550_v17 = vrot.slane %v6622_v7, 1 }
 0x3dc   : > { %9153 = vst [vmem:[#allocation69_spill] sm:$0xff] %v6616_v6  ;;  %4550 = vmatmul.msk.f32.gmra.mxu2 %vm840_vm1, %v6614_v15 }
 0x3dd   : > { %v6641_v40 = vsel %vm1476_vm9, %v1548_v36, %v1550_v17  ;;  %v1553_v36 = vrot.slane %v6557_v39, 1 }
 0x3de   : > { %4600 = vmatmul.msk.f32.gmra.mxu1 %vm840_vm1, %v6625_v38  ;;  %v6629_v57 = vpop.f32.mrf.mxu3  ;;  %9156 = vst [vmem:[#allocation72_spill] sm:$0xff] %v6641_v40 }
 0x3df   : > { %v1674_v59 = vpop.f32.mrf.mxu2 }
 0x3e0   : > { %v6635_v15 = vadd.f32 %v6488_v50, %v1674_v59  ;;  %4644 = vmatmul.msk.f32.gmra.mxu0 %vm840_vm1, %v6472_v31  ;;  %v6650_v50 = vsel %vm1911_vm10, %v1948_v46, %v1950_v53  ;;  %v1952_v46 = vrot.slane %v6216_v4, 2  ;;  %v1953_v53 = vrot.slane %v6231_v11, 2 }
 0x3e1   : > { %9157 = vst [vmem:[#allocation73_spill] sm:$0xff] %v6650_v50 }
 0x3e2   : > { %9155 = vst [vmem:[#allocation71_spill] sm:$0xff] %v6635_v15  ;;  %v6668_v15 = vsel %vm1476_vm9, %v1552_v35, %v1553_v36 }
 0x3e3   : > { %v6643_v6 = vpop.f32.mrf.mxu1  ;;  %4684 = vmatmul.msk.f32.gmra.mxu3 %vm840_vm1, %v6354_v27  ;;  %v6663_v27 = vpop.f32.mrf.mxu0  ;;  %9160 = vst [vmem:[#allocation76_spill] sm:$0xff] %v6668_v15 }
 0x3e4   : > { %4551 = vmatmul.msk.f32.gmra.mxu2 %vm840_vm1, %v6641_v40  ;;  %9159 = vst [vmem:[#allocation75_spill] sm:$0xff] %v6663_v27 }
 0x3e6   : > { %4601 = vmatmul.msk.f32.gmra.mxu1 %vm840_vm1, %v6650_v50  ;;  %v6656_v17 = vpop.f32.mrf.mxu3 }
 0x3e7   : > { %v1677_v59 = vpop.f32.mrf.mxu2 }
 0x3e8   : > { %v6659_v58 = vadd.f32 %v6519_v23, %v1677_v59  ;;  %4645 = vmatmul.msk.f32.gmra.mxu0 %vm840_vm1, %v6501_v48  ;;  %v6676_v23 = vld [vmem:[#allocation2 + $0x178] sm:$0x3]  ;;  %v6679_v59 = vsel %vm1911_vm10, %v1952_v46, %v1953_v53 }
 0x3e9   : > { %9161 = vst [vmem:[#allocation77_spill] sm:$0xff] %v6679_v59  ;;  %v1555_v11 = vrot.slane %v6676_v23, 1 }
 0x3ea   : > { %9158 = vst [vmem:[#allocation74_spill] sm:$0xff] %v6659_v58 }
 0x3eb   : > { %v6670_v40 = vpop.f32.mrf.mxu1  ;;  %4685 = vmatmul.msk.f32.gmra.mxu3 %vm840_vm1, %v6376_v19  ;;  %v1955_v19 = vrot.slane %v6307_v30, 2  ;;  %v6693_v46 = vpop.f32.mrf.mxu0 }
 0x3ec   : > { %4552 = vmatmul.msk.f32.gmra.mxu2 %vm840_vm1, %v6668_v15  ;;  %v6691_v15 = vsel %vm1476_vm9, %v1553_v36, %v1555_v11  ;;  %v1958_v11 = vrot.slane %v6264_v0, 2 }
 0x3ee   : > { %4602 = vmatmul.msk.f32.gmra.mxu1 %vm840_vm1, %v6679_v59  ;;  %v1872_v58 = vpop.f32.mrf.mxu3 }
 0x3ef   : > { %v1680_v4 = vpop.f32.mrf.mxu2 }
 0x3f0   : > { %v6685_v35 = vadd.f32 %v6546_v52, %v1680_v4  ;;  %4646 = vmatmul.msk.f32.gmra.mxu0 %vm840_vm1, %v6530_v56  ;;  %v6702_v52 = vsel %vm1911_vm10, %v1953_v53, %v1955_v19  ;;  %v1957_v4 = vrot.slane %v6247_v45, 2  ;;  %v6726_v53 = vld [vmem:[#allocation2 + $0x180] sm:$0xff] }
 0x3f1   : > { %9163 = vst [vmem:[#allocation79_spill] sm:$0xff] %v6702_v52 }
 0x3f2   : > { %9162 = vst [vmem:[#allocation78_spill] sm:$0xff] %v6685_v35 }
 0x3f3   : > { %v6695_v27 = vpop.f32.mrf.mxu1  ;;  %4686 = vmatmul.msk.f32.gmra.mxu3 %vm840_vm1, %v6404_v10  ;;  %v6719_v19 = vpop.f32.mrf.mxu0 }
 0x3f4   : > { %4553 = vmatmul.msk.f32.gmra.mxu2 %vm840_vm1, %v6691_v15 }
 0x3f6   : > { %4603 = vmatmul.msk.f32.gmra.mxu1 %vm840_vm1, %v6702_v52  ;;  %v1875_v35 = vpop.f32.mrf.mxu3 }
 0x3f7   : > { %v1683_v30 = vpop.f32.mrf.mxu2 }
 0x3f8   : > { %v6707_v36 = vadd.f32 %v6577_v21, %v1683_v30  ;;  %4647 = vmatmul.msk.f32.gmra.mxu0 %vm840_vm1, %v6557_v39  ;;  %v6722_v21 = vsel %vm1911_vm10, %v1957_v4, %v1958_v11  ;;  %v1960_v30 = vrot.slane %v6349_v20, 2 }
 0x3f9   : > { %9165 = vst [vmem:[#allocation81_spill] sm:$0xff] %v6722_v21 }
 0x3fa   : > { %9164 = vst [vmem:[#allocation80_spill] sm:$0xff] %v6707_v36  ;;  %v6741_v4 = vsel %vm1911_vm10, %v1958_v11, %v1960_v30  ;;  %v1963_v11 = vrot.slane %v6298_v18, 2 }
 0x3fb   : > { %v6713_v10 = vpop.f32.mrf.mxu1  ;;  %4687 = vmatmul.msk.f32.gmra.mxu3 %vm840_vm1, %v6428_v32  ;;  %9167 = vst [vmem:[#allocation83_spill] sm:$0xff] %v6741_v4 }
 0x3fc   : > { %4650 = vmatmul.msk.f32.vlgmr.msrb.gmra.mxu2 %vm840_vm1, %v6071_v13 }
 0x3fe   : > { %4604 = vmatmul.msk.f32.gmra.mxu1 %vm840_vm1, %v6722_v21  ;;  %v1878_v32 = vpop.f32.mrf.mxu3 }
 0x3ff   : > { %v1686_v45 = vpop.f32.mrf.mxu2 }
 0x400   : > { %v6729_v0 = vadd.f32 %v6602_v12, %v1686_v45  ;;  %4648 = vmatmul.msk.f32.gmra.mxu0 %vm840_vm1, %v6726_v53  ;;  %v6745_v12 = vpop.f32.mrf.mxu0 }
 0x402   : > { %9166 = vst [vmem:[#allocation82_spill] sm:$0xff] %v6729_v0  ;;  %v6747_v0 = vld [vmem:[#allocation2 + $0x188] sm:$0xff] }
 0x403   : > { %v6734_v13 = vpop.f32.mrf.mxu1  ;;  %4688 = vmatmul.msk.f32.gmra.mxu3 %vm840_vm1, %v6458_v14 }
 0x404   : > { %4651 = vmatmul.msk.f32.gmra.mxu2 %vm840_vm1, %v6122_v25  ;;  %v1962_v25 = vrot.slane %v6281_v5, 2 }
 0x406   : > { %4605 = vmatmul.msk.f32.gmra.mxu1 %vm840_vm1, %v6741_v4  ;;  %v6763_v14 = vsel %vm1911_vm10, %v1962_v25, %v1963_v11 }
 0x407   : > { %v1689_v45 = vpop.f32.mrf.mxu2  ;;  %9169 = vst [vmem:[#allocation85_spill] sm:$0xff] %v6763_v14 }
 0x408   : > { %v6750_v20 = vadd.f32 %v6629_v57, %v1689_v45  ;;  %4649 = vmatmul.msk.f32.gmra.mxu0 %vm840_vm1, %v6747_v0  ;;  %v1881_v45 = vpop.f32.mrf.mxu3  ;;  %v6772_v18 = vpop.f32.mrf.mxu0 }
 0x40a   : > { %9168 = vst [vmem:[#allocation84_spill] sm:$0xff] %v6750_v20 }
 0x40b   : > { %v6756_v30 = vpop.f32.mrf.mxu1  ;;  %4689 = vmatmul.msk.f32.gmra.mxu3 %vm840_vm1, %v6484_v28  ;;  %v1965_v28 = vrot.slane %v6401_v55, 2 }
 0x40c   : > { %4652 = vmatmul.msk.f32.gmra.mxu2 %vm840_vm1, %v6147_v22 }
 0x40d   : > { %v6782_v25 = vsel %vm1911_vm10, %v1963_v11, %v1965_v28 }
 0x40e   : > { %4606 = vmatmul.msk.f32.gmra.mxu1 %vm840_vm1, %v6763_v14  ;;  %9171 = vst [vmem:[#allocation87_spill] sm:$0xff] %v6782_v25 }
 0x40f   : > { %v1692_v57 = vpop.f32.mrf.mxu2 }
 0x410   : > { %v6768_v5 = vadd.f32 %v6656_v17, %v1692_v57  ;;  %4746 = vmatmul.msk.f32.vlgmr.msra.gmra.mxu0 %vm840_vm1, %v6147_v22  ;;  %v1884_v55 = vpop.f32.mrf.mxu3  ;;  %v1967_v57 = vrot.slane %v6318_v8, 2 }
 0x412   : > { %9170 = vst [vmem:[#allocation86_spill] sm:$0xff] %v6768_v5  ;;  %v6792_v5 = vpop.f32.mrf.mxu0 }
 0x413   : > { %v6775_v20 = vpop.f32.mrf.mxu1  ;;  %4690 = vmatmul.msk.f32.gmra.mxu3 %vm840_vm1, %v6515_v1  ;;  %v1968_v1 = vrot.slane %v6338_v43, 2  ;;  %v1970_v43 = vrot.slane %v6455_v34, 2  ;;  %v1972_v34 = vrot.slane %v6364_v42, 2 }
 0x414   : > { %4653 = vmatmul.msk.f32.gmra.mxu2 %vm840_vm1, %v6109_v49 }
 0x415   : > { %v6801_v28 = vsel %vm1911_vm10, %v1967_v57, %v1968_v1  ;;  %v6819_v57 = vsel %vm1911_vm10, %v1968_v1, %v1970_v43 }
 0x416   : > { %4607 = vmatmul.msk.f32.gmra.mxu1 %vm840_vm1, %v6782_v25  ;;  %9172 = vst [vmem:[#allocation88_spill] sm:$0xff] %v6801_v28 }
 0x417   : > { %v1695_v17 = vpop.f32.mrf.mxu2  ;;  %9173 = vst [vmem:[#allocation89_spill] sm:$0xff] %v6819_v57 }
 0x418   : > { %v6786_v22 = vadd.f32 %v1872_v58, %v1695_v17  ;;  %4747 = vmatmul.msk.f32.gmra.mxu0 %vm840_vm1, %v6109_v49  ;;  %v1887_v11 = vpop.f32.mrf.mxu3 }
 0x41a   : > { %v6816_v17 = vpop.f32.mrf.mxu0 }
 0x41b   : > { %v6794_v36 = vpop.f32.mrf.mxu1  ;;  %4691 = vmatmul.msk.f32.gmra.mxu3 %vm840_vm1, %v6542_v29 }
 0x41c   : > { %4654 = vmatmul.msk.f32.gmra.mxu2 %vm840_vm1, %v6138_v51 }
 0x41e   : > { %4608 = vmatmul.msk.f32.gmra.mxu1 %vm840_vm1, %v6801_v28 }
 0x41f   : > { %v1698_v49 = vpop.f32.mrf.mxu2 }
 0x420   : > { %v6805_v8 = vadd.f32 %v1875_v35, %v1698_v49  ;;  %4748 = vmatmul.msk.f32.gmra.mxu0 %vm840_vm1, %v6138_v51  ;;  %v1973_v49 = vrot.slane %v6390_v16, 2  ;;  %v1890_v1 = vpop.f32.mrf.mxu3  ;;  %v1975_v16 = vrot.slane %v6512_v9, 2  ;;  %v1977_v9 = vrot.slane %v6416_v24, 2 }
 0x422   : > { %v6836_v43 = vsel %vm1911_vm10, %v1972_v34, %v1973_v49  ;;  %v6854_v34 = vsel %vm1911_vm10, %v1973_v49, %v1975_v16 }
 0x423   : > { %v6810_v58 = vpop.f32.mrf.mxu1  ;;  %4692 = vmatmul.msk.f32.gmra.mxu3 %vm840_vm1, %v6573_v37  ;;  %9174 = vst [vmem:[#allocation90_spill] sm:$0xff] %v6836_v43 }
 0x424   : > { %4655 = vmatmul.msk.f32.gmra.mxu2 %vm840_vm1, %v6157_v63  ;;  %9175 = vst [vmem:[#allocation91_spill] sm:$0xff] %v6854_v34 }
 0x426   : > { %4609 = vmatmul.msk.f32.gmra.mxu1 %vm840_vm1, %v6819_v57 }
 0x427   : > { %v1701_v51 = vpop.f32.mrf.mxu2 }
 0x428   : > { %v6823_v35 = vadd.f32 %v1878_v32, %v1701_v51  ;;  %4749 = vmatmul.msk.f32.gmra.mxu0 %vm840_vm1, %v6157_v63  ;;  %v6840_v63 = vpop.f32.mrf.mxu0 }
 0x42b   : > { %v6829_v37 = vpop.f32.mrf.mxu1  ;;  %4693 = vmatmul.msk.f32.gmra.mxu3 %vm840_vm1, %v6596_v54 }
 0x42c   : > { %4656 = vmatmul.msk.f32.gmra.mxu2 %vm840_vm1, %v6172_v47 }
 0x42e   : > { %4610 = vmatmul.msk.f32.gmra.mxu1 %vm840_vm1, %v6836_v43 }
 0x42f   : > { %v1704_v42 = vpop.f32.mrf.mxu2 }
 0x430   : > { %v6842_v32 = vadd.f32 %v1881_v45, %v1704_v42  ;;  %4750 = vmatmul.msk.f32.gmra.mxu0 %vm840_vm1, %v6172_v47  ;;  %v1893_v42 = vpop.f32.mrf.mxu3  ;;  %v6862_v47 = vpop.f32.mrf.mxu0 }
 0x433   : > { %v6847_v51 = vpop.f32.mrf.mxu1  ;;  %4694 = vmatmul.msk.f32.gmra.mxu3 %vm840_vm1, %v6625_v38  ;;  %v1978_v38 = vrot.slane %v6444_v33, 2  ;;  %v1980_v33 = vrot.slane %v6570_v60, 2  ;;  %v1982_v60 = vrot.slane %v6472_v31, 2 }
 0x434   : > { %4657 = vmatmul.msk.f32.gmra.mxu2 %vm840_vm1, %v6188_v41 }
 0x436   : > { %4611 = vmatmul.msk.f32.gmra.mxu1 %vm840_vm1, %v6854_v34 }
 0x437   : > { %v1707_v45 = vpop.f32.mrf.mxu2 }
 0x438   : > { %v6858_v54 = vadd.f32 %v1884_v55, %v1707_v45  ;;  %4751 = vmatmul.msk.f32.gmra.mxu0 %vm840_vm1, %v6188_v41  ;;  %v6873_v55 = vsel %vm1911_vm10, %v1977_v9, %v1978_v38  ;;  %v1896_v24 = vpop.f32.mrf.mxu3  ;;  %v6882_v16 = vpop.f32.mrf.mxu0  ;;  %v6891_v9 = vsel %vm1911_vm10, %v1978_v38, %v1980_v33 }
 0x439   : > { %9177 = vst [vmem:[#allocation93_spill] sm:$0xff] %v6873_v55 }
 0x43a   : > { %9176 = vst [vmem:[#allocation92_spill] sm:$0xff] %v6858_v54  ;;  %v9205_v54 = vld [vmem:[#allocation27_spill] sm:$0xff] }
 0x43b   : > { %v6866_v29 = vpop.f32.mrf.mxu1  ;;  %4695 = vmatmul.msk.f32.gmra.mxu3 %vm840_vm1, %v6650_v50  ;;  %9179 = vst [vmem:[#allocation95_spill] sm:$0xff] %v6891_v9 }
 0x43c   : > { %4658 = vmatmul.msk.f32.gmra.mxu2 %vm840_vm1, %v6203_v61 }
 0x43e   : > { %4612 = vmatmul.msk.f32.gmra.mxu1 %vm840_vm1, %v6873_v55 }
 0x43f   : > { %v1710_v41 = vpop.f32.mrf.mxu2 }
 0x440   : > { %v6877_v49 = vadd.f32 %v1887_v11, %v1710_v41  ;;  %4752 = vmatmul.msk.f32.gmra.mxu0 %vm840_vm1, %v6203_v61  ;;  %v1983_v41 = vrot.slane %v6501_v48, 2  ;;  %v6907_v38 = vpop.f32.mrf.mxu0  ;;  %v1985_v48 = vrot.slane %v6622_v7, 2  ;;  %v1987_v7 = vrot.slane %v6530_v56, 2 }
 0x441   : > { %v1990_v56 = vrot.slane %v6676_v23, 2 }
 0x442   : > { %9178 = vst [vmem:[#allocation94_spill] sm:$0xff] %v6877_v49  ;;  %v9200_v49 = vld [vmem:[#allocation47_spill] sm:$0xff] }
 0x443   : > { %v6884_v45 = vpop.f32.mrf.mxu1  ;;  %4696 = vmatmul.msk.f32.gmra.mxu3 %vm840_vm1, %v6679_v59  ;;  %v1899_v59 = vpop.f32.mrf.mxu3 }
 0x444   : > { %4659 = vmatmul.msk.f32.gmra.mxu2 %vm840_vm1, %v6219_v2 }
 0x446   : > { %4613 = vmatmul.msk.f32.gmra.mxu1 %vm840_vm1, %v6891_v9 }
 0x447   : > { %v1713_v61 = vpop.f32.mrf.mxu2 }
 0x448   : > { %v6895_v11 = vadd.f32 %v1890_v1, %v1713_v61  ;;  %4753 = vmatmul.msk.f32.gmra.mxu0 %vm840_vm1, %v6219_v2  ;;  %v6910_v1 = vsel %vm1911_vm10, %v1982_v60, %v1983_v41  ;;  %v9183_v61 = vld [vmem:[#allocation19_spill] sm:$0xff] }
 0x449   : > { %9181 = vst [vmem:[#allocation97_spill] sm:$0xff] %v6910_v1 }
 0x44a   : > { %9180 = vst [vmem:[#allocation96_spill] sm:$0xff] %v6895_v11  ;;  %v9199_v11 = vld [vmem:[#allocation25_spill] sm:$0xff] }
 0x44b   : > { %v6901_v50 = vpop.f32.mrf.mxu1  ;;  %4697 = vmatmul.msk.f32.gmra.mxu3 %vm840_vm1, %v6702_v52  ;;  %v1902_v60 = vpop.f32.mrf.mxu3  ;;  %v6926_v52 = vsel %vm1911_vm10, %v1983_v41, %v1985_v48  ;;  %v9186_v41 = vld [vmem:[#allocation20_spill] sm:$0xff] }
 0x44c   : > { %4660 = vmatmul.msk.f32.gmra.mxu2 %vm840_vm1, %v6234_v44  ;;  %9184 = vst [vmem:[#allocation19_spill] sm:$0xff] %v6926_v52 }
 0x44e   : > { %4614 = vmatmul.msk.f32.gmra.mxu1 %vm840_vm1, %v6910_v1 }
 0x44f   : > { %v1716_v2 = vpop.f32.mrf.mxu2 }
 0x450   : > { %v6914_v31 = vadd.f32 %v1893_v42, %v1716_v2  ;;  %4754 = vmatmul.msk.f32.gmra.mxu0 %vm840_vm1, %v6234_v44  ;;  %v6930_v42 = vpop.f32.mrf.mxu0 }
 0x452   : > { %9182 = vst [vmem:[#allocation98_spill] sm:$0xff] %v6914_v31 }
 0x453   : > { %v6919_v33 = vpop.f32.mrf.mxu1  ;;  %4698 = vmatmul.msk.f32.gmra.mxu3 %vm840_vm1, %v6722_v21  ;;  %v1988_v21 = vrot.slane %v6557_v39, 2 }
 0x454   : > { %4661 = vmatmul.msk.f32.gmra.mxu2 %vm840_vm1, %v9183_v61 }
 0x455   : > { %v6945_v48 = vsel %vm1911_vm10, %v1987_v7, %v1988_v21  ;;  %v9190_v7 = vld [vmem:[#allocation21_spill] sm:$0xff] }
 0x456   : > { %4615 = vmatmul.msk.f32.gmra.mxu1 %vm840_vm1, %v6926_v52  ;;  %9187 = vst [vmem:[#allocation20_spill] sm:$0xff] %v6945_v48 }
 0x457   : > { %v1719_v44 = vpop.f32.mrf.mxu2 }
 0x458   : > { %v6932_v2 = vadd.f32 %v1896_v24, %v1719_v44  ;;  %4755 = vmatmul.msk.f32.gmra.mxu0 %vm840_vm1, %v9183_v61  ;;  %v1905_v24 = vpop.f32.mrf.mxu3  ;;  %v6953_v39 = vpop.f32.mrf.mxu0 }
 0x459   : > { %9189 = vst [vmem:[#allocation101_spill] sm:$0xff] %v6953_v39 }
 0x45a   : > { %9185 = vst [vmem:[#allocation99_spill] sm:$0xff] %v6932_v2  ;;  %v6963_v2 = vsel %vm1911_vm10, %v1988_v21, %v1990_v56  ;;  %v9195_v21 = vld [vmem:[#allocation17_spill] sm:$0xff] }
 0x45b   : > { %v6938_v31 = vpop.f32.mrf.mxu1  ;;  %4699 = vmatmul.msk.f32.gmra.mxu3 %vm840_vm1, %v6741_v4  ;;  %9191 = vst [vmem:[#allocation21_spill] sm:$0xff] %v6963_v2 }
 0x45c   : > { %4662 = vmatmul.msk.f32.gmra.mxu2 %vm840_vm1, %v9186_v41 }
 0x45e   : > { %4616 = vmatmul.msk.f32.gmra.mxu1 %vm840_vm1, %v6945_v48 }
 0x45f   : > { %v1722_v61 = vpop.f32.mrf.mxu2 }
 0x460   : > { %v6949_v44 = vadd.f32 %v1899_v59, %v1722_v61  ;;  %4756 = vmatmul.msk.f32.gmra.mxu0 %vm840_vm1, %v9186_v41  ;;  %v1908_v23 = vpop.f32.mrf.mxu3  ;;  %v6971_v61 = vpop.f32.mrf.mxu0 }
 0x461   : > { %9193 = vst [vmem:[#allocation103_spill] sm:$0xff] %v6971_v61  ;;  %v4944_v61 = vld [vmem:[#allocation2 + $0x38] sm:$0xff] }
 0x462   : > { %9188 = vst [vmem:[#allocation100_spill] sm:$0xff] %v6949_v44 }
 0x463   : > { %v6956_v4 = vpop.f32.mrf.mxu1  ;;  %4700 = vmatmul.msk.f32.gmra.mxu3 %vm840_vm1, %v6763_v14  ;;  %v9194_v14 = vld [vmem:[#allocation22_spill] sm:$0xff] }
 0x464   : > { %4663 = vmatmul.msk.f32.gmra.mxu2 %vm840_vm1, %v9190_v7 }
 0x466   : > { %4617 = vmatmul.msk.f32.gmra.mxu1 %vm840_vm1, %v6963_v2 }
 0x467   : > { %v1725_v59 = vpop.f32.mrf.mxu2 }
 0x468   : > { %v6967_v41 = vadd.f32 %v1902_v60, %v1725_v59  ;;  %4757 = vmatmul.msk.f32.gmra.mxu0 %vm840_vm1, %v9190_v7  ;;  %v2533_v7 = vpop.f32.mrf.mxu3 }
 0x46a   : > { %9192 = vst [vmem:[#allocation102_spill] sm:$0xff] %v6967_v41  ;;  %v9197_v41 = vld [vmem:[#allocation23_spill] sm:$0xff] }
 0x46b   : > { %v6973_v44 = vpop.f32.mrf.mxu1  ;;  %4701 = vmatmul.msk.f32.gmra.mxu3 %vm840_vm1, %v6782_v25  ;;  %v6991_v25 = vpop.f32.mrf.mxu0 }
 0x46c   : > { %4664 = vmatmul.msk.f32.gmra.mxu2 %vm840_vm1, %v9194_v14  ;;  %9198 = vst [vmem:[#allocation17_spill] sm:$0xff] %v6991_v25  ;;  %v9204_v25 = vld [vmem:[#allocation52_spill] sm:$0xff] }
 0x46e   : > { %4714 = vmatmul.msk.f32.vlgmr.msra.gmra.mxu1 %vm840_vm1, %v9195_v21  ;;  %v1816_v21 = vadd.f32 %v9200_v49, %v9199_v11  ;;  %v9203_v11 = vld [vmem:[#allocation29_spill] sm:$0xff] }
 0x46f   : > { %v1728_v56 = vpop.f32.mrf.mxu2 }
 0x470   : > { %v6981_v60 = vadd.f32 %v1905_v24, %v1728_v56  ;;  %4758 = vmatmul.msk.f32.gmra.mxu0 %vm840_vm1, %v9194_v14  ;;  %v2169_v14 = vadd.f32 %v6670_v40, %v1816_v21  ;;  %v2536_v49 = vpop.f32.mrf.mxu3 }
 0x472   : > { %9196 = vst [vmem:[#allocation22_spill] sm:$0xff] %v6981_v60  ;;  %v9202_v60 = vld [vmem:[#allocation24_spill] sm:$0xff] }
 0x473   : > { %v6985_v59 = vpop.f32.mrf.mxu1  ;;  %4702 = vmatmul.msk.f32.gmra.mxu3 %vm840_vm1, %v6801_v28 }
 0x474   : > { %4665 = vmatmul.msk.f32.gmra.mxu2 %vm840_vm1, %v9197_v41 }
 0x476   : > { %4715 = vmatmul.msk.f32.gmra.mxu1 %vm840_vm1, %v4944_v61  ;;  %v1819_v61 = vadd.f32 %v9204_v25, %v9203_v11  ;;  %v9209_v25 = vld [vmem:[#allocation31_spill] sm:$0xff]  ;;  %v4945_v11 = vld [vmem:[#allocation2 + $0x50] sm:$0xff] }
 0x477   : > { %v1731_v24 = vpop.f32.mrf.mxu2 }
 0x478   : > { %v6996_v56 = vadd.f32 %v1908_v23, %v1731_v24  ;;  %4759 = vmatmul.msk.f32.gmra.mxu0 %vm840_vm1, %v9197_v41  ;;  %v2320_v23 = vadd.f32 %v9205_v54, %v2169_v14  ;;  %v9206_v24 = vld [vmem:[#allocation18_spill] sm:$0xff]  ;;  %v7012_v41 = vpop.f32.mrf.mxu0  ;;  %v9208_v54 = vld [vmem:[#allocation28_spill] sm:$0xff] }
 0x47a   : > { %9201 = vst [vmem:[#allocation23_spill] sm:$0xff] %v6996_v56 }
 0x47b   : > { %v7001_v28 = vpop.f32.mrf.mxu1  ;;  %4703 = vmatmul.msk.f32.gmra.mxu3 %vm840_vm1, %v6819_v57  ;;  %v2170_v57 = vadd.f32 %v6695_v27, %v1819_v61 }
 0x47c   : > { %4666 = vmatmul.msk.f32.gmra.mxu2 %vm840_vm1, %v9202_v60 }
 0x47d   : > { %v2321_v14 = vadd.f32 %v9209_v25, %v2170_v57  ;;  %v9212_v57 = vld [vmem:[#allocation32_spill] sm:$0xff]  ;;  %v9213_v25 = vld [vmem:[#allocation35_spill] sm:$0xff] }
 0x47e   : > { %4716 = vmatmul.msk.f32.gmra.mxu1 %vm840_vm1, %v9206_v24 }
 0x47f   : > { %v2379_v40 = vpop.f32.mrf.mxu2 }
 0x480   : > { %v2475_v21 = vadd.f32 %v2379_v40, %v2320_v23  ;;  %4760 = vmatmul.msk.f32.gmra.mxu0 %vm840_vm1, %v9202_v60  ;;  %v2539_v23 = vpop.f32.mrf.mxu3  ;;  %v9210_v60 = vld [vmem:[#allocation33_spill] sm:$0xff]  ;;  %v7031_v61 = vpop.f32.mrf.mxu0 }
 0x481   : > { %v9211_v40 = vld [vmem:[#allocation57_spill] sm:$0xff] }
 0x482   : > { %v7017_v56 = vadd.f32 %v2533_v7, %v2475_v21  ;;  %v1822_v27 = vadd.f32 %v9211_v40, %v9210_v60 }
 0x483   : > { %v7019_v39 = vpop.f32.mrf.mxu1  ;;  %4704 = vmatmul.msk.f32.gmra.mxu3 %vm840_vm1, %v6836_v43 }
 0x484   : > { %9207 = vst [vmem:[#allocation25_spill] sm:$0xff] %v7017_v56  ;;  %4667 = vmatmul.msk.f32.gmra.mxu2 %vm840_vm1, %v9208_v54  ;;  %v2171_v21 = vadd.f32 %v6713_v10, %v1822_v27 }
 0x486   : > { %4717 = vmatmul.msk.f32.gmra.mxu1 %vm840_vm1, %v4945_v11  ;;  %v2322_v11 = vadd.f32 %v9213_v25, %v2171_v21  ;;  %v9215_v21 = vld [vmem:[#allocation36_spill] sm:$0xff] }
 0x487   : > { %v2382_v24 = vpop.f32.mrf.mxu2 }
 0x488   : > { %v2476_v7 = vadd.f32 %v2382_v24, %v2321_v14  ;;  %4761 = vmatmul.msk.f32.gmra.mxu0 %vm840_vm1, %v9208_v54  ;;  %v4946_v14 = vld [vmem:[#allocation2 + $0x60] sm:$0xff]  ;;  %v9214_v24 = vld [vmem:[#allocation37_spill] sm:$0xff] }
 0x489   : > { %v1825_v60 = vadd.f32 %v6562_v62, %v9214_v24  ;;  %v9216_v62 = vld [vmem:[#allocation39_spill] sm:$0xff] }
 0x48a   : > { %v7034_v43 = vadd.f32 %v2536_v49, %v2476_v7  ;;  %v2542_v49 = vpop.f32.mrf.mxu3  ;;  %v7051_v7 = vpop.f32.mrf.mxu0 }
 0x48b   : > { %v7036_v56 = vpop.f32.mrf.mxu1  ;;  %4705 = vmatmul.msk.f32.gmra.mxu3 %vm840_vm1, %v6854_v34  ;;  %v2172_v40 = vadd.f32 %v6734_v13, %v1825_v60 }
 0x48c   : > { %4668 = vmatmul.msk.f32.gmra.mxu2 %vm840_vm1, %v9212_v57 }
 0x48d   : > { %v2323_v25 = vadd.f32 %v9216_v62, %v2172_v40  ;;  %v9218_v40 = vld [vmem:[#allocation41_spill] sm:$0xff] }
 0x48e   : > { %4718 = vmatmul.msk.f32.gmra.mxu1 %vm840_vm1, %v4946_v14  ;;  %v9217_v14 = vld [vmem:[#allocation42_spill] sm:$0xff] }
 0x48f   : > { %v2385_v54 = vpop.f32.mrf.mxu2  ;;  %v1828_v13 = vadd.f32 %v6589_v3, %v9217_v14  ;;  %v9219_v3 = vld [vmem:[#allocation44_spill] sm:$0xff] }
 0x490   : > { %v2477_v10 = vadd.f32 %v2385_v54, %v2322_v11  ;;  %4762 = vmatmul.msk.f32.gmra.mxu0 %vm840_vm1, %v9212_v57  ;;  %v4947_v11 = vld [vmem:[#allocation2 + $0x68] sm:$0xff] }
 0x491   : > { %v2173_v54 = vadd.f32 %v6756_v30, %v1828_v13  ;;  %v9220_v30 = vld [vmem:[#allocation40_spill] sm:$0xff] }
 0x492   : > { %v7049_v27 = vadd.f32 %v2539_v23, %v2477_v10  ;;  %v2545_v60 = vpop.f32.mrf.mxu3  ;;  %v7074_v62 = vpop.f32.mrf.mxu0 }
 0x493   : > { %v7053_v34 = vpop.f32.mrf.mxu1  ;;  %4706 = vmatmul.msk.f32.gmra.mxu3 %vm840_vm1, %v6873_v55 }
 0x494   : > { %4669 = vmatmul.msk.f32.gmra.mxu2 %vm840_vm1, %v9215_v21 }
 0x496   : > { %4719 = vmatmul.msk.f32.gmra.mxu1 %vm840_vm1, %v4947_v11  ;;  %v4948_v11 = vld [vmem:[#allocation2 + $0x78] sm:$0xff] }
 0x497   : > { %v2388_v57 = vpop.f32.mrf.mxu2 }
 0x498   : > { %v2478_v23 = vadd.f32 %v2388_v57, %v2323_v25  ;;  %4763 = vmatmul.msk.f32.gmra.mxu0 %vm840_vm1, %v9215_v21  ;;  %v2324_v25 = vadd.f32 %v9219_v3, %v2173_v54  ;;  %v9222_v54 = vld [vmem:[#allocation46_spill] sm:$0xff] }
 0x49a   : > { %v7066_v24 = vadd.f32 %v2542_v49, %v2478_v23  ;;  %v9221_v49 = vld [vmem:[#allocation69_spill] sm:$0xff]  ;;  %v2548_v3 = vpop.f32.mrf.mxu3 }
 0x49b   : > { %v7068_v10 = vpop.f32.mrf.mxu1  ;;  %4707 = vmatmul.msk.f32.gmra.mxu3 %vm840_vm1, %v6891_v9  ;;  %v1831_v57 = vadd.f32 %v9221_v49, %v9220_v30  ;;  %v4949_v30 = vld [vmem:[#allocation2 + $0x80] sm:$0xff] }
 0x49c   : > { %4670 = vmatmul.msk.f32.gmra.mxu2 %vm840_vm1, %v9218_v40 }
 0x49d   : > { %v2174_v13 = vadd.f32 %v6775_v20, %v1831_v57  ;;  %v9224_v20 = vld [vmem:[#allocation45_spill] sm:$0xff] }
 0x49e   : > { %4720 = vmatmul.msk.f32.gmra.mxu1 %vm840_vm1, %v4948_v11  ;;  %v9223_v11 = vld [vmem:[#allocation49_spill] sm:$0xff] }
 0x49f   : > { %v2391_v21 = vpop.f32.mrf.mxu2  ;;  %v2325_v55 = vadd.f32 %v9223_v11, %v2174_v13  ;;  %v9225_v13 = vld [vmem:[#allocation51_spill] sm:$0xff] }
 0x4a0   : > { %v2479_v14 = vadd.f32 %v2391_v21, %v2324_v25  ;;  %4764 = vmatmul.msk.f32.gmra.mxu0 %vm840_vm1, %v9218_v40  ;;  %v7093_v25 = vpop.f32.mrf.mxu0  ;;  %v9226_v11 = vld [vmem:[#allocation55_spill] sm:$0xff] }
 0x4a2   : > { %v7083_v23 = vadd.f32 %v2545_v60, %v2479_v14  ;;  %v1834_v60 = vadd.f32 %v6643_v6, %v9224_v20  ;;  %v2551_v6 = vpop.f32.mrf.mxu3 }
 0x4a3   : > { %v7085_v9 = vpop.f32.mrf.mxu1  ;;  %4708 = vmatmul.msk.f32.gmra.mxu3 %vm840_vm1, %v6910_v1  ;;  %v4950_v1 = vld [vmem:[#allocation2 + $0x90] sm:$0xff] }
 0x4a4   : > { %4671 = vmatmul.msk.f32.gmra.mxu2 %vm840_vm1, %v9222_v54  ;;  %v2175_v49 = vadd.f32 %v6794_v36, %v1834_v60 }
 0x4a6   : > { %4721 = vmatmul.msk.f32.gmra.mxu1 %vm840_vm1, %v4949_v30  ;;  %v2326_v30 = vadd.f32 %v9226_v11, %v2175_v49  ;;  %v4951_v11 = vld [vmem:[#allocation2 + $0x98] sm:$0xff] }
 0x4a7   : > { %v2394_v40 = vpop.f32.mrf.mxu2 }
 0x4a8   : > { %v2480_v21 = vadd.f32 %v2394_v40, %v2325_v55  ;;  %4765 = vmatmul.msk.f32.gmra.mxu0 %vm840_vm1, %v9222_v54  ;;  %v7112_v36 = vpop.f32.mrf.mxu0 }
 0x4aa   : > { %v7100_v57 = vadd.f32 %v2548_v3, %v2480_v21  ;;  %v9227_v3 = vld [vmem:[#allocation50_spill] sm:$0xff]  ;;  %v9228_v21 = vld [vmem:[#allocation56_spill] sm:$0xff] }
 0x4ab   : > { %v7102_v14 = vpop.f32.mrf.mxu1  ;;  %4709 = vmatmul.msk.f32.gmra.mxu3 %vm840_vm1, %v6926_v52  ;;  %v2176_v40 = vadd.f32 %v6810_v58, %v9227_v3  ;;  %v2554_v58 = vpop.f32.mrf.mxu3 }
 0x4ac   : > { %4672 = vmatmul.msk.f32.gmra.mxu2 %vm840_vm1, %v9225_v13 }
 0x4ae   : > { %4722 = vmatmul.msk.f32.gmra.mxu1 %vm840_vm1, %v4950_v1  ;;  %v9229_v1 = vld [vmem:[#allocation61_spill] sm:$0xff] }
 0x4af   : > { %v2397_v55 = vpop.f32.mrf.mxu2  ;;  %v2327_v49 = vadd.f32 %v9229_v1, %v2176_v40  ;;  %v9232_v40 = vld [vmem:[#allocation60_spill] sm:$0xff]  ;;  %v2507_v1 = vrot.slane %v6726_v53, 2 }
 0x4b0   : > { %v2481_v54 = vadd.f32 %v2397_v55, %v2326_v30  ;;  %4766 = vmatmul.msk.f32.gmra.mxu0 %vm840_vm1, %v9225_v13  ;;  %v7132_v3 = vpop.f32.mrf.mxu0 }
 0x4b2   : > { %v7116_v20 = vadd.f32 %v2551_v6, %v2481_v54  ;;  %v9230_v6 = vld [vmem:[#allocation54_spill] sm:$0xff] }
 0x4b3   : > { %v7118_v60 = vpop.f32.mrf.mxu1  ;;  %4710 = vmatmul.msk.f32.gmra.mxu3 %vm840_vm1, %v6945_v48  ;;  %v2177_v55 = vadd.f32 %v6829_v37, %v9230_v6 }
 0x4b4   : > { %4673 = vmatmul.msk.f32.gmra.mxu2 %vm840_vm1, %v9228_v21 }
 0x4b6   : > { %4723 = vmatmul.msk.f32.gmra.mxu1 %vm840_vm1, %v4951_v11 }
 0x4b7   : > { %v2400_v13 = vpop.f32.mrf.mxu2 }
 0x4b8   : > { %v2482_v30 = vadd.f32 %v2400_v13, %v2327_v49  ;;  %4767 = vmatmul.msk.f32.gmra.mxu0 %vm840_vm1, %v9228_v21  ;;  %v2508_v21 = vrot.slane %v6747_v0, 2  ;;  %v9233_v49 = vld [vmem:[#allocation66_spill] sm:$0xff]  ;;  %v4952_v13 = vld [vmem:[#allocation2 + $0xa8] sm:$0xff] }
 0x4b9   : > { %v2328_v11 = vadd.f32 %v9233_v49, %v2177_v55  ;;  %v7157_v55 = vld [vmem:[#allocation2 + $0x190] sm:$0x3] }
 0x4ba   : > { %v7130_v54 = vadd.f32 %v2554_v58, %v2482_v30  ;;  %v9235_v58 = vld [vmem:[#allocation59_spill] sm:$0xff]  ;;  %v9237_v49 = vld [vmem:[#allocation64_spill] sm:$0xff] }
 0x4bb   : > { %v7134_v48 = vpop.f32.mrf.mxu1  ;;  %4711 = vmatmul.msk.f32.gmra.mxu3 %vm840_vm1, %v6963_v2  ;;  %v2178_v6 = vadd.f32 %v6847_v51, %v9235_v58  ;;  %v7151_v2 = vsel %vm1911_vm10, %v2507_v1, %v2508_v21  ;;  %v2510_v51 = vrot.slane %v7157_v55, 2  ;;  %v9239_v58 = vld [vmem:[#allocation63_spill] sm:$0xff] }
 0x4bc   : > { %9231 = vst [vmem:[#allocation47_spill] sm:$0xff] %v7130_v54  ;;  %4674 = vmatmul.msk.f32.gmra.mxu2 %vm840_vm1, %v9232_v40 }
 0x4bd   : > { %9236 = vst [vmem:[#allocation29_spill] sm:$0xff] %v7151_v2 }
 0x4be   : > { %4724 = vmatmul.msk.f32.gmra.mxu1 %vm840_vm1, %v4952_v13  ;;  %v4953_v13 = vld [vmem:[#allocation2 + $0xb0] sm:$0xff] }
 0x4bf   : > { %v2403_v37 = vpop.f32.mrf.mxu2 }
 0x4c0   : > { %v7144_v30 = vadd.f32 %v2403_v37, %v2328_v11  ;;  %4768 = vmatmul.msk.f32.gmra.mxu0 %vm840_vm1, %v9232_v40  ;;  %v7161_v11 = vpop.f32.mrf.mxu0  ;;  %v2329_v40 = vadd.f32 %v6632_v26, %v2178_v6  ;;  %v9241_v26 = vld [vmem:[#allocation68_spill] sm:$0xff]  ;;  %v9242_v6 = vld [vmem:[#allocation75_spill] sm:$0xff] }
 0x4c2   : > { %9234 = vst [vmem:[#allocation24_spill] sm:$0xff] %v7144_v30  ;;  %v7173_v30 = vsel %vm1911_vm10, %v2508_v21, %v2510_v51  ;;  %v9244_v21 = vld [vmem:[#allocation67_spill] sm:$0xff] }
 0x4c3   : > { %v7153_v52 = vpop.f32.mrf.mxu1  ;;  %4712 = vmatmul.msk.f32.gmra.mxu3 %vm840_vm1, %v7151_v2  ;;  %v2179_v2 = vadd.f32 %v6866_v29, %v9239_v58  ;;  %9240 = vst [vmem:[#allocation27_spill] sm:$0xff] %v7173_v30  ;;  %v2180_v51 = vadd.f32 %v6884_v45, %v9244_v21  ;;  %v9248_v21 = vld [vmem:[#allocation76_spill] sm:$0xff] }
 0x4c4   : > { %4675 = vmatmul.msk.f32.gmra.mxu2 %vm840_vm1, %v9237_v49 }
 0x4c6   : > { %4725 = vmatmul.msk.f32.gmra.mxu1 %vm840_vm1, %v4953_v13  ;;  %v4954_v13 = vld [vmem:[#allocation2 + $0xc0] sm:$0xff] }
 0x4c7   : > { %v2406_v1 = vpop.f32.mrf.mxu2 }
 0x4c8   : > { %v7166_v37 = vadd.f32 %v2406_v1, %v2329_v40  ;;  %4769 = vmatmul.msk.f32.gmra.mxu0 %vm840_vm1, %v9237_v49  ;;  %v2330_v40 = vadd.f32 %v9242_v6, %v2179_v2  ;;  %v7183_v49 = vpop.f32.mrf.mxu0  ;;  %v2331_v2 = vadd.f32 %v6693_v46, %v2180_v51  ;;  %v4955_v6 = vld [vmem:[#allocation2 + $0xc8] sm:$0xff]  ;;  %v4956_v51 = vld [vmem:[#allocation2 + $0xd8] sm:$0xff] }
 0x4ca   : > { %9238 = vst [vmem:[#allocation52_spill] sm:$0xff] %v7166_v37 }
 0x4cb   : > { %v7175_v54 = vpop.f32.mrf.mxu1  ;;  %4713 = vmatmul.msk.f32.gmra.mxu3 %vm840_vm1, %v7173_v30  ;;  %v9245_v30 = vld [vmem:[#allocation72_spill] sm:$0xff] }
 0x4cc   : > { %4676 = vmatmul.msk.f32.gmra.mxu2 %vm840_vm1, %v9241_v26 }
 0x4ce   : > { %4726 = vmatmul.msk.f32.gmra.mxu1 %vm840_vm1, %v4954_v13 }
 0x4cf   : > { %v2409_v1 = vpop.f32.mrf.mxu2 }
 0x4d0   : > { %v7185_v29 = vadd.f32 %v2409_v1, %v2330_v40  ;;  %4770 = vmatmul.msk.f32.gmra.mxu0 %vm840_vm1, %v9241_v26  ;;  %v7201_v26 = vpop.f32.mrf.mxu0  ;;  %v9247_v40 = vld [vmem:[#allocation71_spill] sm:$0xff] }
 0x4d1   : > { %v2181_v45 = vadd.f32 %v6901_v50, %v9247_v40 }
 0x4d2   : > { %9243 = vst [vmem:[#allocation18_spill] sm:$0xff] %v7185_v29 }
 0x4d3   : > { %v7191_v58 = vpop.f32.mrf.mxu1  ;;  %v2332_v46 = vadd.f32 %v6719_v19, %v2181_v45  ;;  %v4957_v45 = vld [vmem:[#allocation2 + $0xe0] sm:$0xff] }
 0x4d4   : > { %4677 = vmatmul.msk.f32.gmra.mxu2 %vm840_vm1, %v9245_v30 }
 0x4d6   : > { %4727 = vmatmul.msk.f32.gmra.mxu1 %vm840_vm1, %v4955_v6 }
 0x4d7   : > { %v2412_v13 = vpop.f32.mrf.mxu2 }
 0x4d8   : > { %v7197_v37 = vadd.f32 %v2412_v13, %v2331_v2  ;;  %4771 = vmatmul.msk.f32.gmra.mxu0 %vm840_vm1, %v9245_v30  ;;  %v9250_v30 = vld [vmem:[#allocation74_spill] sm:$0xff]  ;;  %v7217_v50 = vpop.f32.mrf.mxu0 }
 0x4d9   : > { %v2182_v13 = vadd.f32 %v6919_v33, %v9250_v30  ;;  %v9252_v33 = vld [vmem:[#allocation78_spill] sm:$0xff] }
 0x4da   : > { %9246 = vst [vmem:[#allocation28_spill] sm:$0xff] %v7197_v37  ;;  %v2183_v30 = vadd.f32 %v6938_v31, %v9252_v33  ;;  %v9253_v31 = vld [vmem:[#allocation80_spill] sm:$0xff] }
 0x4db   : > { %v7205_v1 = vpop.f32.mrf.mxu1  ;;  %v2333_v19 = vadd.f32 %v6745_v12, %v2182_v13 }
 0x4dc   : > { %4678 = vmatmul.msk.f32.gmra.mxu2 %vm840_vm1, %v9248_v21  ;;  %v2334_v13 = vadd.f32 %v6772_v18, %v2183_v30  ;;  %v4959_v30 = vld [vmem:[#allocation2 + $0xf8] sm:$0xff] }
 0x4de   : > { %4728 = vmatmul.msk.f32.gmra.mxu1 %vm840_vm1, %v4956_v51  ;;  %v2354_v51 = vrot.slane %v6747_v0, 1 }
 0x4df   : > { %v2415_v2 = vpop.f32.mrf.mxu2 }
 0x4e0   : > { %v7211_v6 = vadd.f32 %v2415_v2, %v2332_v46  ;;  %4772 = vmatmul.msk.f32.gmra.mxu0 %vm840_vm1, %v9248_v21  ;;  %v2353_v46 = vrot.slane %v6726_v53, 1  ;;  %v7237_v12 = vpop.f32.mrf.mxu0 }
 0x4e2   : > { %9249 = vst [vmem:[#allocation31_spill] sm:$0xff] %v7211_v6  ;;  %v2355_v6 = vsel %vm1476_vm9, %v2353_v46, %v2354_v51  ;;  %v2184_v46 = vadd.f32 %v6956_v4, %v9253_v31 }
 0x4e3   : > { %v7219_v40 = vpop.f32.mrf.mxu1 }
 0x4e4   : > { %4679 = vmatmul.msk.f32.gmra.mxu2 %vm840_vm1, %v6691_v15  ;;  %v2335_v18 = vadd.f32 %v6792_v5, %v2184_v46 }
 0x4e6   : > { %4729 = vmatmul.msk.f32.gmra.mxu1 %vm840_vm1, %v4957_v45  ;;  %v4958_v45 = vld [vmem:[#allocation2 + $0xf0] sm:$0xff] }
 0x4e7   : > { %v2418_v21 = vpop.f32.mrf.mxu2 }
 0x4e8   : > { %v7227_v2 = vadd.f32 %v2418_v21, %v2333_v19  ;;  %4773 = vmatmul.msk.f32.gmra.mxu0 %vm840_vm1, %v6691_v15  ;;  %v2356_v21 = vrot.slane %v7157_v55, 1 }
 0x4ea   : > { %9251 = vst [vmem:[#allocation33_spill] sm:$0xff] %v7227_v2  ;;  %v2357_v33 = vsel %vm1476_vm9, %v2354_v51, %v2356_v21  ;;  %v4960_v21 = vld [vmem:[#allocation2 + $0x108] sm:$0xff] }
 0x4eb   : > { %v7234_v37 = vpop.f32.mrf.mxu1 }
 0x4ec   : > { %4680 = vmatmul.msk.f32.gmra.mxu2 %vm840_vm1, %v2355_v6 }
 0x4ee   : > { %4730 = vmatmul.msk.f32.gmra.mxu1 %vm840_vm1, %v4958_v45  ;;  %v7253_v45 = vpop.f32.mrf.mxu0 }
 0x4ef   : > { %v2421_v19 = vpop.f32.mrf.mxu2 }
 0x4f0   : > { %v7242_v15 = vadd.f32 %v2421_v19, %v2334_v13  ;;  %4774 = vmatmul.msk.f32.gmra.mxu0 %vm840_vm1, %v2355_v6  ;;  %v9254_v6 = vld [vmem:[#allocation82_spill] sm:$0xff] }
 0x4f1   : > { %v2185_v4 = vadd.f32 %v6973_v44, %v9254_v6  ;;  %v9255_v19 = vld [vmem:[#allocation26_spill] sm:$0xff] }
 0x4f2   : > { %v9257_v44 = vld [vmem:[#allocation30_spill] sm:$0xff] }
 0x4f3   : > { %v7248_v2 = vpop.f32.mrf.mxu1  ;;  %v2336_v5 = vadd.f32 %v6816_v17, %v2185_v4 }
 0x4f4   : > { %4681 = vmatmul.msk.f32.gmra.mxu2 %vm840_vm1, %v2357_v33 }
 0x4f6   : > { %4731 = vmatmul.msk.f32.gmra.mxu1 %vm840_vm1, %v4959_v30  ;;  %v9256_v30 = vld [vmem:[#allocation84_spill] sm:$0xff] }
 0x4f7   : > { %v2424_v55 = vpop.f32.mrf.mxu2 }
 0x4f8   : > { %v7255_v13 = vadd.f32 %v2424_v55, %v2335_v18  ;;  %4775 = vmatmul.msk.f32.gmra.mxu0 %vm840_vm1, %v2357_v33  ;;  %v7268_v18 = vpop.f32.mrf.mxu0  ;;  %v2186_v33 = vadd.f32 %v6985_v59, %v9256_v30  ;;  %v9259_v59 = vld [vmem:[#allocation34_spill] sm:$0xff] }
 0x4fa   : > { %v2337_v6 = vadd.f32 %v6840_v63, %v2186_v33 }
 0x4fb   : > { %v7260_v51 = vpop.f32.mrf.mxu1 }
 0x4fc   : > { %4778 = vmatmul.msk.f32.vlgmr.msra.gmra.mxu2 %vm840_vm1, %v9255_v19  ;;  %v4961_v19 = vld [vmem:[#allocation2 + $0x110] sm:$0xff] }
 0x4fe   : > { %4732 = vmatmul.msk.f32.gmra.mxu1 %vm840_vm1, %v4960_v21 }
 0x4ff   : > { %v2427_v31 = vpop.f32.mrf.mxu2 }
 0x500   : > { %v7266_v46 = vadd.f32 %v2427_v31, %v2336_v5  ;;  %v9258_v5 = vld [vmem:[#allocation86_spill] sm:$0xff]  ;;  %v7282_v31 = vpop.f32.mrf.mxu0 }
 0x501   : > { %v2187_v21 = vadd.f32 %v7001_v28, %v9258_v5  ;;  %v2188_v28 = vadd.f32 %v7019_v39, %v6786_v22  ;;  %v9262_v39 = vld [vmem:[#allocation43_spill] sm:$0xff] }
 0x503   : > { %v7272_v55 = vpop.f32.mrf.mxu1  ;;  %v2338_v30 = vadd.f32 %v6862_v47, %v2187_v21  ;;  %v2339_v47 = vadd.f32 %v6882_v16, %v2188_v28  ;;  %v4963_v21 = vld [vmem:[#allocation2 + $0x128] sm:$0xff] }
 0x504   : > { %4779 = vmatmul.msk.f32.gmra.mxu2 %vm840_vm1, %v9257_v44  ;;  %v4962_v44 = vld [vmem:[#allocation2 + $0x120] sm:$0xff] }
 0x506   : > { %4733 = vmatmul.msk.f32.gmra.mxu1 %vm840_vm1, %v4961_v19 }
 0x507   : > { %v2430_v17 = vpop.f32.mrf.mxu2 }
 0x508   : > { %v7278_v4 = vadd.f32 %v2430_v17, %v2337_v6  ;;  %v7292_v6 = vpop.f32.mrf.mxu3  ;;  %v9260_v17 = vld [vmem:[#allocation38_spill] sm:$0xff]  ;;  %v7300_v5 = vpop.f32.mrf.mxu0 }
 0x509   : > { %9261 = vst [vmem:[#allocation57_spill] sm:$0xff] %v7300_v5  ;;  %v4964_v5 = vld [vmem:[#allocation2 + $0x138] sm:$0xff] }
 0x50b   : > { %v7284_v29 = vpop.f32.mrf.mxu1 }
 0x50c   : > { %4780 = vmatmul.msk.f32.gmra.mxu2 %vm840_vm1, %v9259_v59 }
 0x50e   : > { %4734 = vmatmul.msk.f32.gmra.mxu1 %vm840_vm1, %v4962_v44  ;;  %v2189_v44 = vadd.f32 %v7036_v56, %v6805_v8  ;;  %v2190_v8 = vadd.f32 %v7053_v34, %v6823_v35  ;;  %v2191_v35 = vadd.f32 %v7068_v10, %v6842_v32  ;;  %v9274_v10 = vld [vmem:[#allocation58_spill] sm:$0xff] }
 0x50f   : > { %v2433_v63 = vpop.f32.mrf.mxu2 }
 0x510   : > { %v7290_v33 = vadd.f32 %v2433_v63, %v2338_v30  ;;  %v7308_v63 = vpop.f32.mrf.mxu3  ;;  %v7316_v16 = vpop.f32.mrf.mxu0 }
 0x511   : > { %9263 = vst [vmem:[#allocation32_spill] sm:$0xff] %v7316_v16  ;;  %v4966_v16 = vld [vmem:[#allocation2 + $0x150] sm:$0xff] }
 0x513   : > { %v7296_v19 = vpop.f32.mrf.mxu1 }
 0x514   : > { %4781 = vmatmul.msk.f32.gmra.mxu2 %vm840_vm1, %v9260_v17  ;;  %v2340_v17 = vadd.f32 %v6907_v38, %v2189_v44  ;;  %v2341_v38 = vadd.f32 %v6930_v42, %v2190_v8  ;;  %v4965_v44 = vld [vmem:[#allocation2 + $0x140] sm:$0xff] }
 0x516   : > { %4735 = vmatmul.msk.f32.gmra.mxu1 %vm840_vm1, %v4963_v21  ;;  %v9264_v21 = vld [vmem:[#allocation48_spill] sm:$0xff] }
 0x517   : > { %v2436_v59 = vpop.f32.mrf.mxu2 }
 0x518   : > { %v7304_v30 = vadd.f32 %v2436_v59, %v2339_v47  ;;  %v7326_v59 = vpop.f32.mrf.mxu3 }
 0x519   : > { %9265 = vst [vmem:[#allocation35_spill] sm:$0xff] %v7326_v59 }
 0x51b   : > { %v7310_v22 = vpop.f32.mrf.mxu1 }
 0x51c   : > { %4782 = vmatmul.msk.f32.gmra.mxu2 %vm840_vm1, %v9262_v39 }
 0x51e   : > { %4736 = vmatmul.msk.f32.gmra.mxu1 %vm840_vm1, %v4964_v5 }
 0x51f   : > { %v2439_v28 = vpop.f32.mrf.mxu2 }
 0x520   : > { %v7318_v47 = vadd.f32 %v2439_v28, %v2340_v17  ;;  %v7332_v17 = vpop.f32.mrf.mxu0  ;;  %v9268_v28 = vld [vmem:[#allocation53_spill] sm:$0xff]  ;;  %v7342_v42 = vpop.f32.mrf.mxu3 }
 0x521   : > { %9267 = vst [vmem:[#allocation36_spill] sm:$0xff] %v7332_v17  ;;  %v9290_v17 = vld [vmem:[#allocation70_spill] sm:$0xff] }
 0x522   : > { %9270 = vst [vmem:[#allocation39_spill] sm:$0xff] %v7342_v42 }
 0x523   : > { %v7322_v56 = vpop.f32.mrf.mxu1 }
 0x524   : > { %4783 = vmatmul.msk.f32.gmra.mxu2 %vm840_vm1, %v9264_v21  ;;  %v9269_v21 = vld [vmem:[#allocation101_spill] sm:$0xff] }
 0x525   : > { %v2342_v59 = vadd.f32 %v9269_v21, %v2191_v35  ;;  %v4967_v21 = vld [vmem:[#allocation2 + $0x158] sm:$0xff] }
 0x526   : > { %4737 = vmatmul.msk.f32.gmra.mxu1 %vm840_vm1, %v4965_v44  ;;  %v9272_v44 = vld [vmem:[#allocation92_spill] sm:$0xff] }
 0x527   : > { %v2442_v5 = vpop.f32.mrf.mxu2 }
 0x528   : > { %v7330_v39 = vadd.f32 %v2442_v5, %v2341_v38  ;;  %v2192_v5 = vadd.f32 %v7085_v9, %v9272_v44 }
 0x52a   : > { %9266 = vst [vmem:[#allocation37_spill] sm:$0xff] %v7330_v39  ;;  %v7348_v39 = vpop.f32.mrf.mxu0 }
 0x52b   : > { %v7336_v34 = vpop.f32.mrf.mxu1  ;;  %9273 = vst [vmem:[#allocation41_spill] sm:$0xff] %v7348_v39 }
 0x52c   : > { %4784 = vmatmul.msk.f32.gmra.mxu2 %vm840_vm1, %v9268_v28  ;;  %v9275_v28 = vld [vmem:[#allocation103_spill] sm:$0xff] }
 0x52d   : > { %v2343_v35 = vadd.f32 %v9275_v28, %v2192_v5  ;;  %v4968_v28 = vld [vmem:[#allocation2 + $0x168] sm:$0xff] }
 0x52e   : > { %4738 = vmatmul.msk.f32.gmra.mxu1 %vm840_vm1, %v4966_v16 }
 0x52f   : > { %v2445_v8 = vpop.f32.mrf.mxu2 }
 0x530   : > { %v7344_v38 = vadd.f32 %v2445_v8, %v2342_v59  ;;  %v7358_v59 = vpop.f32.mrf.mxu3  ;;  %v9278_v8 = vld [vmem:[#allocation94_spill] sm:$0xff] }
 0x531   : > { %9277 = vst [vmem:[#allocation40_spill] sm:$0xff] %v7358_v59  ;;  %v2193_v9 = vadd.f32 %v7102_v14, %v9278_v8 }
 0x532   : > { %9271 = vst [vmem:[#allocation42_spill] sm:$0xff] %v7344_v38  ;;  %v9279_v38 = vld [vmem:[#allocation62_spill] sm:$0xff]  ;;  %v7366_v39 = vpop.f32.mrf.mxu0 }
 0x533   : > { %v7350_v32 = vpop.f32.mrf.mxu1  ;;  %9280 = vst [vmem:[#allocation69_spill] sm:$0xff] %v7366_v39  ;;  %v9286_v39 = vld [vmem:[#allocation65_spill] sm:$0xff] }
 0x534   : > { %4785 = vmatmul.msk.f32.gmra.mxu2 %vm840_vm1, %v9274_v10  ;;  %v9281_v10 = vld [vmem:[#allocation17_spill] sm:$0xff] }
 0x535   : > { %v2344_v5 = vadd.f32 %v9281_v10, %v2193_v9  ;;  %v7383_v9 = vld [vmem:[#allocation2 + $0x1a0] sm:$0xff] }
 0x536   : > { %4739 = vmatmul.msk.f32.gmra.mxu1 %vm840_vm1, %v4967_v21  ;;  %v2814_v10 = vrot.slane %v7383_v9, 1 }
 0x537   : > { %v2448_v16 = vpop.f32.mrf.mxu2 }
 0x538   : > { %v7356_v42 = vadd.f32 %v2448_v16, %v2343_v35  ;;  %v7372_v16 = vld [vmem:[#allocation2 + $0x198] sm:$0xff]  ;;  %v7376_v8 = vpop.f32.mrf.mxu3 }
 0x539   : > { %9284 = vst [vmem:[#allocation49_spill] sm:$0xff] %v7376_v8  ;;  %v9289_v8 = vld [vmem:[#allocation98_spill] sm:$0xff] }
 0x53a   : > { %9276 = vst [vmem:[#allocation44_spill] sm:$0xff] %v7356_v42  ;;  %v9283_v42 = vld [vmem:[#allocation96_spill] sm:$0xff] }
 0x53b   : > { %v7362_v44 = vpop.f32.mrf.mxu1  ;;  %v2194_v14 = vadd.f32 %v7118_v60, %v9283_v42 }
 0x53c   : > { %4786 = vmatmul.msk.f32.gmra.mxu2 %vm840_vm1, %v9279_v38  ;;  %v2813_v38 = vrot.slane %v7372_v16, 1 }
 0x53e   : > { %4740 = vmatmul.msk.f32.gmra.mxu1 %vm840_vm1, %v4968_v28  ;;  %v4969_v28 = vld [vmem:[#allocation2 + $0x170] sm:$0xff]  ;;  %v2815_v42 = vsel %vm1476_vm9, %v2813_v38, %v2814_v10 }
 0x53f   : > { %v2451_v21 = vpop.f32.mrf.mxu2  ;;  %4776 = vmatmul.msk.f32.gmra.mxu0 %vm840_vm1, %v2815_v42 }
 0x540   : > { %v7370_v35 = vadd.f32 %v2451_v21, %v2344_v5  ;;  %v2345_v5 = vadd.f32 %v7012_v41, %v2194_v14  ;;  %v7388_v21 = vpop.f32.mrf.mxu0  ;;  %v7400_v41 = vld [vmem:[#allocation2 + $0x1a8] sm:$0x3]  ;;  %v2575_v14 = vpop.f32.mrf.mxu3 }
 0x541   : > { %9287 = vst [vmem:[#allocation51_spill] sm:$0xff] %v7388_v21 }
 0x542   : > { %9282 = vst [vmem:[#allocation46_spill] sm:$0xff] %v7370_v35 }
 0x543   : > { %v7378_v59 = vpop.f32.mrf.mxu1 }
 0x544   : > { %9285 = vst [vmem:[#allocation45_spill] sm:$0xff] %v7378_v59  ;;  %4787 = vmatmul.msk.f32.gmra.mxu2 %vm840_vm1, %v9286_v39  ;;  %v2195_v39 = vadd.f32 %v7134_v48, %v9289_v8 }
 0x546   : > { %4741 = vmatmul.msk.f32.gmra.mxu1 %vm840_vm1, %v4969_v28  ;;  %v2816_v28 = vrot.slane %v7400_v41, 1  ;;  %v2346_v21 = vadd.f32 %v7031_v61, %v2195_v39  ;;  %v9293_v39 = vld [vmem:[#allocation100_spill] sm:$0xff] }
 0x547   : > { %v2454_v60 = vpop.f32.mrf.mxu2 }
 0x548   : > { %v7391_v35 = vadd.f32 %v2454_v60, %v2345_v5  ;;  %v2817_v5 = vsel %vm1476_vm9, %v2814_v10, %v2816_v28  ;;  %v7410_v48 = vpop.f32.mrf.mxu0  ;;  %v2197_v28 = vadd.f32 %v7175_v54, %v9293_v39  ;;  %v9295_v54 = vld [vmem:[#allocation102_spill] sm:$0xff]  ;;  %v9296_v39 = vld [vmem:[#allocation79_spill] sm:$0xff] }
 0x549   : > { %4777 = vmatmul.msk.f32.gmra.mxu0 %vm840_vm1, %v2817_v5 }
 0x54a   : > { %9288 = vst [vmem:[#allocation55_spill] sm:$0xff] %v7391_v35  ;;  %v9292_v35 = vld [vmem:[#allocation73_spill] sm:$0xff] }
 0x54b   : > { %v7396_v59 = vpop.f32.mrf.mxu1 }
 0x54c   : > { %4788 = vmatmul.msk.f32.gmra.mxu2 %vm840_vm1, %v9290_v17  ;;  %v9291_v17 = vld [vmem:[#allocation99_spill] sm:$0xff] }
 0x54d   : > { %v2196_v8 = vadd.f32 %v7153_v52, %v9291_v17  ;;  %v9294_v17 = vld [vmem:[#allocation77_spill] sm:$0xff] }
 0x54e   : > { %4742 = vmatmul.msk.f32.gmra.mxu1 %vm840_vm1, %v6726_v53  ;;  %v2578_v53 = vpop.f32.mrf.mxu3 }
 0x54f   : > { %v2457_v38 = vpop.f32.mrf.mxu2  ;;  %v2347_v61 = vadd.f32 %v7051_v7, %v2196_v8  ;;  %v2348_v7 = vadd.f32 %v7074_v62, %v2197_v28 }
 0x550   : > { %v7407_v60 = vadd.f32 %v2457_v38, %v2346_v21  ;;  %v2643_v38 = vadd.f32 %v2575_v14, %v7242_v15  ;;  %v7426_v52 = vpop.f32.mrf.mxu0  ;;  %v2198_v15 = vadd.f32 %v7191_v58, %v9295_v54  ;;  %v2644_v14 = vadd.f32 %v2578_v53, %v7255_v13  ;;  %v9298_v54 = vld [vmem:[#allocation81_spill] sm:$0xff] }
 0x552   : > { %v2349_v62 = vadd.f32 %v7093_v25, %v2198_v15 }
 0x553   : > { %v7414_v42 = vpop.f32.mrf.mxu1 }
 0x554   : > { %4789 = vmatmul.msk.f32.gmra.mxu2 %vm840_vm1, %v9292_v35 }
 0x556   : > { %4743 = vmatmul.msk.f32.gmra.mxu1 %vm840_vm1, %v6747_v0 }
 0x557   : > { %v2460_v10 = vpop.f32.mrf.mxu2 }
 0x558   : > { %v7421_v21 = vadd.f32 %v2460_v10, %v2347_v61  ;;  %v2581_v61 = vpop.f32.mrf.mxu3 }
 0x559   : > { %v2645_v13 = vadd.f32 %v2581_v61, %v7266_v46 }
 0x55b   : > { %v2726_v5 = vpop.f32.mrf.mxu1 }
 0x55c   : > { %4790 = vmatmul.msk.f32.gmra.mxu2 %vm840_vm1, %v9294_v17  ;;  %v7430_v35 = vadd.f32 %v2726_v5, %v2643_v38  ;;  %v7444_v5 = vpop.f32.mrf.mxu0 }
 0x55e   : > { %4744 = vmatmul.msk.f32.gmra.mxu1 %vm840_vm1, %v7372_v16 }
 0x55f   : > { %v2463_v0 = vpop.f32.mrf.mxu2 }
 0x560   : > { %v7435_v8 = vadd.f32 %v2463_v0, %v2348_v7  ;;  %v9297_v7 = vld [vmem:[#allocation22_spill] sm:$0xff]  ;;  %v2584_v53 = vpop.f32.mrf.mxu3 }
 0x561   : > { %v2199_v58 = vadd.f32 %v7205_v1, %v9297_v7  ;;  %v9299_v1 = vld [vmem:[#allocation23_spill] sm:$0xff]  ;;  %v2646_v61 = vadd.f32 %v2584_v53, %v7278_v4  ;;  %v9303_v53 = vld [vmem:[#allocation85_spill] sm:$0xff] }
 0x562   : > { %v2200_v46 = vadd.f32 %v7219_v40, %v9299_v1  ;;  %v9300_v7 = vld [vmem:[#allocation83_spill] sm:$0xff] }
 0x563   : > { %v2729_v10 = vpop.f32.mrf.mxu1  ;;  %v2350_v25 = vadd.f32 %v7112_v36, %v2199_v58 }
 0x564   : > { %4791 = vmatmul.msk.f32.gmra.mxu2 %vm840_vm1, %v9296_v39  ;;  %v7442_v38 = vadd.f32 %v2729_v10, %v2644_v14  ;;  %v7459_v15 = vpop.f32.mrf.mxu0  ;;  %v3157_v39 = vld [vmem:[%s8989_s13] sm:$0xff] }
 0x565   : > { %3248 = vmatpush.msra.mxu3 %v3157_v39  ;;  %3372 = vmatpush.msrb.mxu1 %v3157_v39 }
 0x566   : > { %4745 = vmatmul.msk.f32.gmra.mxu1 %vm840_vm1, %v7383_v9 }
 0x567   : > { %v2466_v28 = vpop.f32.mrf.mxu2 }
 0x568   : > { %v7449_v17 = vadd.f32 %v2466_v28, %v2349_v62  ;;  %v2587_v58 = vpop.f32.mrf.mxu3 }
 0x569   : > { %v2647_v40 = vadd.f32 %v2587_v58, %v7290_v33  ;;  %v9304_v58 = vld [vmem:[#allocation87_spill] sm:$0xff] }
 0x56b   : > { %v2732_v0 = vpop.f32.mrf.mxu1 }
 0x56c   : > { %4792 = vmatmul.msk.f32.gmra.mxu2 %vm840_vm1, %v9298_v54  ;;  %v7456_v14 = vadd.f32 %v2732_v0, %v2645_v13  ;;  %v2351_v13 = vadd.f32 %v7132_v3, %v2200_v46 }
 0x56f   : > { %v2469_v10 = vpop.f32.mrf.mxu2 }
 0x570   : > { %v7464_v62 = vadd.f32 %v2469_v10, %v2350_v25  ;;  %v7476_v25 = vpop.f32.mrf.mxu0  ;;  %v9302_v10 = vld [vmem:[#allocation25_spill] sm:$0xff] }
 0x571   : > { %v2780_v39 = vadd.f32 %v7234_v37, %v9302_v10 }
 0x573   : > { %v2735_v28 = vpop.f32.mrf.mxu1 }
 0x574   : > { %4793 = vmatmul.msk.f32.gmra.mxu2 %vm840_vm1, %v9300_v7  ;;  %v7471_v36 = vadd.f32 %v2735_v28, %v2646_v61  ;;  %v2935_v61 = vadd.f32 %v7161_v11, %v2780_v39  ;;  %v2590_v28 = vpop.f32.mrf.mxu3  ;;  %v2781_v7 = vadd.f32 %v7248_v2, %v7034_v43 }
 0x576   : > { %v2936_v10 = vadd.f32 %v7183_v49, %v2781_v7 }
 0x577   : > { %v2472_v0 = vpop.f32.mrf.mxu2 }
 0x578   : > { %v7474_v54 = vadd.f32 %v2472_v0, %v2351_v13  ;;  %v2648_v13 = vadd.f32 %v2590_v28, %v7304_v30  ;;  %v7491_v37 = vpop.f32.mrf.mxu0  ;;  %v9305_v30 = vld [vmem:[#allocation88_spill] sm:$0xff] }
 0x57a   : > { %9301 = vst [vmem:[#allocation50_spill] sm:$0xff] %v7474_v54 }
 0x57b   : > { %v2738_v4 = vpop.f32.mrf.mxu1 }
 0x57c   : > { %4794 = vmatmul.msk.f32.gmra.mxu2 %vm840_vm1, %v9303_v53  ;;  %v7483_v1 = vadd.f32 %v2738_v4, %v2647_v40  ;;  %v2593_v40 = vpop.f32.mrf.mxu3  ;;  %v2782_v4 = vadd.f32 %v7260_v51, %v7049_v27 }
 0x57d   : > { %v2649_v43 = vadd.f32 %v2593_v40, %v7318_v47 }
 0x57e   : > { %v2937_v28 = vadd.f32 %v7201_v26, %v2782_v4  ;;  %v9307_v26 = vld [vmem:[#allocation90_spill] sm:$0xff] }
 0x57f   : > { %v2993_v3 = vpop.f32.mrf.mxu2 }
 0x580   : > { %v7486_v46 = vadd.f32 %v2993_v3, %v2935_v61  ;;  %v2899_v61 = vpop.f32.mrf.mxu0 }
 0x583   : > { %v2741_v33 = vpop.f32.mrf.mxu1 }
 0x584   : > { %4795 = vmatmul.msk.f32.gmra.mxu2 %vm840_vm1, %v9304_v58  ;;  %v7495_v0 = vadd.f32 %v2741_v33, %v2648_v13  ;;  %v2783_v13 = vadd.f32 %v7272_v55, %v7066_v24  ;;  %v9306_v33 = vld [vmem:[#allocation89_spill] sm:$0xff]  ;;  %v2784_v58 = vadd.f32 %v7284_v29, %v7083_v23  ;;  %v2785_v24 = vadd.f32 %v7296_v19, %v7100_v57  ;;  %v9308_v55 = vld [vmem:[#allocation91_spill] sm:$0xff] }
 0x585   : > { %v2786_v23 = vadd.f32 %v7310_v22, %v7116_v20  ;;  %v9309_v29 = vld [vmem:[#allocation93_spill] sm:$0xff]  ;;  %v9310_v57 = vld [vmem:[#allocation47_spill] sm:$0xff] }
 0x586   : > { %v2938_v27 = vadd.f32 %v7217_v50, %v2783_v13  ;;  %v2940_v50 = vadd.f32 %v7253_v45, %v2785_v24  ;;  %v2787_v19 = vadd.f32 %v7322_v56, %v9310_v57  ;;  %v9314_v13 = vld [vmem:[#allocation57_spill] sm:$0xff]  ;;  %v9315_v56 = vld [vmem:[#allocation52_spill] sm:$0xff]  ;;  %v9319_v24 = vld [vmem:[#allocation35_spill] sm:$0xff] }
 0x587   : > { %v2996_v11 = vpop.f32.mrf.mxu2 }
 0x588   : > { %v7498_v39 = vadd.f32 %v2996_v11, %v2936_v10  ;;  %v2939_v10 = vadd.f32 %v7237_v12, %v2784_v58  ;;  %v2941_v12 = vadd.f32 %v7268_v18, %v2786_v23  ;;  %v2942_v45 = vadd.f32 %v7282_v31, %v2787_v19  ;;  %v9313_v18 = vld [vmem:[#allocation97_spill] sm:$0xff]  ;;  %v9320_v23 = vld [vmem:[#allocation20_spill] sm:$0xff] }
 0x58b   : > { %v2744_v2 = vpop.f32.mrf.mxu1 }
 0x58c   : > { %4796 = vmatmul.msk.f32.gmra.mxu2 %vm840_vm1, %v9305_v30  ;;  %v2800_v53 = vadd.f32 %v2744_v2, %v2649_v43 }
 0x58e   : > { %v7506_v3 = vadd.f32 %v2899_v61, %v2800_v53  ;;  %v9311_v53 = vld [vmem:[#allocation95_spill] sm:$0xff] }
 0x58f   : > { %v2999_v49 = vpop.f32.mrf.mxu2 }
 0x590   : > { %v7508_v7 = vadd.f32 %v2999_v49, %v2937_v28  ;;  %v9312_v28 = vld [vmem:[#allocation24_spill] sm:$0xff] }
 0x591   : > { %v2637_v20 = vadd.f32 %v7292_v6, %v9312_v28  ;;  %v9317_v6 = vld [vmem:[#allocation32_spill] sm:$0xff]  ;;  %v9326_v28 = vld [vmem:[#allocation41_spill] sm:$0xff] }
 0x593   : > { %v2788_v49 = vadd.f32 %v7336_v34, %v2637_v20  ;;  %v9318_v34 = vld [vmem:[#allocation18_spill] sm:$0xff] }
 0x594   : > { %4797 = vmatmul.msk.f32.gmra.mxu2 %vm840_vm1, %v9306_v33 }
 0x595   : > { %v2943_v33 = vadd.f32 %v9314_v13, %v2788_v49 }
 0x597   : > { %v3002_v51 = vpop.f32.mrf.mxu2 }
 0x598   : > { %v7515_v47 = vadd.f32 %v3002_v51, %v2938_v27  ;;  %v2638_v51 = vadd.f32 %v7308_v63, %v9315_v56  ;;  %v9321_v63 = vld [vmem:[#allocation36_spill] sm:$0xff]  ;;  %v9329_v56 = vld [vmem:[#allocation29_spill] sm:$0xff] }
 0x59a   : > { %v2789_v31 = vadd.f32 %v7350_v32, %v2638_v51  ;;  %v9322_v32 = vld [vmem:[#allocation28_spill] sm:$0xff]  ;;  %v9330_v51 = vld [vmem:[#allocation69_spill] sm:$0xff] }
 0x59c   : > { %4798 = vmatmul.msk.f32.gmra.mxu2 %vm840_vm1, %v9307_v26  ;;  %v9316_v26 = vld [vmem:[#allocation19_spill] sm:$0xff] }
 0x59f   : > { %v3005_v11 = vpop.f32.mrf.mxu2 }
 0x5a0   : > { %v7522_v40 = vadd.f32 %v3005_v11, %v2939_v10  ;;  %v2944_v10 = vadd.f32 %v9317_v6, %v2789_v31  ;;  %v9331_v6 = vld [vmem:[#allocation33_spill] sm:$0xff] }
 0x5a4   : > { %4799 = vmatmul.msk.f32.gmra.mxu2 %vm840_vm1, %v9308_v55  ;;  %v2639_v55 = vadd.f32 %v9319_v24, %v9318_v34 }
 0x5a7   : > { %v3008_v4 = vpop.f32.mrf.mxu2 }
 0x5a8   : > { %v7529_v43 = vadd.f32 %v3008_v4, %v2940_v50  ;;  %v2790_v4 = vadd.f32 %v7362_v44, %v2639_v55  ;;  %v9327_v44 = vld [vmem:[#allocation31_spill] sm:$0xff] }
 0x5a9   : > { %v9333_v55 = vld [vmem:[#allocation27_spill] sm:$0xff] }
 0x5ac   : > { %4800 = vmatmul.msk.f32.gmra.mxu2 %vm840_vm1, %v9309_v29  ;;  %v2945_v29 = vadd.f32 %v9321_v63, %v2790_v4  ;;  %v2967_v4 = vrot.slane %v7372_v16, 2 }
 0x5af   : > { %v3011_v2 = vpop.f32.mrf.mxu2 }
 0x5b0   : > { %v7536_v30 = vadd.f32 %v3011_v2, %v2941_v12  ;;  %v9323_v2 = vld [vmem:[#allocation39_spill] sm:$0xff] }
 0x5b1   : > { %v2640_v57 = vadd.f32 %v9323_v2, %v9322_v32  ;;  %v2970_v2 = vrot.slane %v7400_v41, 2  ;;  %v2951_v41 = vadd.f32 %v7444_v5, %v7456_v14  ;;  %v7628_v5 = vpop.f32.mrf.mxu0 }
 0x5b4   : > { %4801 = vmatmul.msk.f32.gmra.mxu2 %vm840_vm1, %v9311_v53  ;;  %v9324_v53 = vld [vmem:[#allocation45_spill] sm:$0xff] }
 0x5b7   : > { %v3014_v61 = vpop.f32.mrf.mxu2 }
 0x5b8   : > { %v7545_v22 = vadd.f32 %v3014_v61, %v2942_v45  ;;  %v2791_v45 = vadd.f32 %v9324_v53, %v2640_v57  ;;  %v9325_v61 = vld [vmem:[#allocation21_spill] sm:$0xff] }
 0x5ba   : > { %v2946_v20 = vadd.f32 %v9326_v28, %v2791_v45  ;;  %v2950_v45 = vadd.f32 %v7426_v52, %v7442_v38  ;;  %v7622_v52 = vpop.f32.mrf.mxu1  ;;  %v2953_v38 = vadd.f32 %v7476_v25, %v7483_v1 }
 0x5bc   : > { %4802 = vmatmul.msk.f32.gmra.mxu2 %vm840_vm1, %v9313_v18  ;;  %v9328_v18 = vld [vmem:[#allocation40_spill] sm:$0xff] }
 0x5bd   : > { %v2641_v13 = vadd.f32 %v9328_v18, %v9327_v44 }
 0x5bf   : > { %v3017_v27 = vpop.f32.mrf.mxu2 }
 0x5c0   : > { %v7553_v58 = vadd.f32 %v3017_v27, %v2943_v33  ;;  %v2792_v27 = vadd.f32 %v7396_v59, %v2641_v13  ;;  %v2968_v59 = vrot.slane %v7383_v9, 2  ;;  %v7603_v9 = vpop.f32.mrf.mxu3 }
 0x5c2   : > { %v2947_v31 = vadd.f32 %v9330_v51, %v2792_v27  ;;  %v2969_v32 = vsel %vm1911_vm10, %v2967_v4, %v2968_v59  ;;  %v2971_v16 = vsel %vm1911_vm10, %v2968_v59, %v2970_v2  ;;  %v7632_v51 = vpop.f32.mrf.mxu1 }
 0x5c4   : > { %4803 = vmatmul.msk.f32.gmra.mxu2 %vm840_vm1, %v9316_v26 }
 0x5c7   : > { %v3020_v11 = vpop.f32.mrf.mxu2 }
 0x5c8   : > { %v7561_v50 = vadd.f32 %v3020_v11, %v2944_v10  ;;  %v9332_v10 = vld [vmem:[#allocation49_spill] sm:$0xff] }
 0x5c9   : > { %v2642_v11 = vadd.f32 %v9332_v10, %v9331_v6 }
 0x5ca   : > { %v7642_v25 = vpop.f32.mrf.mxu1 }
 0x5cb   : > { %v2793_v24 = vadd.f32 %v7414_v42, %v2642_v11  ;;  %v2949_v42 = vadd.f32 %v7410_v48, %v7430_v35 }
 0x5cc   : > { %4804 = vmatmul.msk.f32.gmra.mxu2 %vm840_vm1, %v9320_v23  ;;  %v9334_v23 = vld [vmem:[#allocation51_spill] sm:$0xff] }
 0x5cd   : > { %v2948_v63 = vadd.f32 %v9334_v23, %v2793_v24 }
 0x5cf   : > { %v3023_v12 = vpop.f32.mrf.mxu2 }
 0x5d0   : > { %v7569_v19 = vadd.f32 %v3023_v12, %v2945_v29 }
 0x5d4   : > { %4805 = vmatmul.msk.f32.gmra.mxu2 %vm840_vm1, %v9325_v61 }
 0x5d7   : > { %v3026_v49 = vpop.f32.mrf.mxu2 }
 0x5d8   : > { %v7577_v33 = vadd.f32 %v3026_v49, %v2946_v20  ;;  %v7610_v20 = vpop.f32.mrf.mxu3  ;;  %v2952_v49 = vadd.f32 %v7459_v15, %v7471_v36  ;;  %v2954_v15 = vadd.f32 %v7491_v37, %v7495_v0  ;;  %v7653_v37 = vpop.f32.mrf.mxu1 }
 0x5dc   : > { %4806 = vmatmul.msk.f32.gmra.mxu2 %vm840_vm1, %v9329_v56 }
 0x5df   : > { %v3029_v26 = vpop.f32.mrf.mxu2 }
 0x5e0   : > { %v7585_v34 = vadd.f32 %v3029_v26, %v2947_v31  ;;  %v7618_v18 = vpop.f32.mrf.mxu3  ;;  %v7638_v26 = vpop.f32.mrf.mxu0 }
 0x5e1   : > { %v7661_v23 = vpop.f32.mrf.mxu1 }
 0x5e4   : > { %4807 = vmatmul.msk.f32.gmra.mxu2 %vm840_vm1, %v9333_v55 }
 0x5e7   : > { %v3032_v29 = vpop.f32.mrf.mxu2 }
 0x5e8   : > { %v7593_v12 = vadd.f32 %v3032_v29, %v2948_v63  ;;  %v7630_v14 = vpop.f32.mrf.mxu3  ;;  %v7647_v11 = vpop.f32.mrf.mxu0 }
 0x5ec   : > { %4808 = vmatmul.msk.f32.gmra.mxu2 %vm840_vm1, %v2969_v32 }
 0x5ef   : > { %v3035_v57 = vpop.f32.mrf.mxu2 }
 0x5f0   : > { %v7600_v53 = vadd.f32 %v3035_v57, %v2949_v42  ;;  %v7640_v6 = vpop.f32.mrf.mxu3  ;;  %v7655_v0 = vpop.f32.mrf.mxu0 }
 0x5f4   : > { %4809 = vmatmul.msk.f32.gmra.mxu2 %vm840_vm1, %v2971_v16 }
 0x5f7   : > { %v3038_v61 = vpop.f32.mrf.mxu2 }
 0x5f8   : > { %v7608_v28 = vadd.f32 %v3038_v61, %v2950_v45  ;;  %v7649_v24 = vpop.f32.mrf.mxu3  ;;  %v7674_v32 = vpop.f32.mrf.mxu0 }
 0x5ff   : > { %v3041_v48 = vpop.f32.mrf.mxu2 }
 0x600   : > { %v7614_v35 = vadd.f32 %v3041_v48, %v2951_v41  ;;  %v7659_v59 = vpop.f32.mrf.mxu3 }
 0x607   : > { %v3044_v44 = vpop.f32.mrf.mxu2 }
 0x608   : > { %v7620_v13 = vadd.f32 %v3044_v44, %v2952_v49  ;;  %v7680_v42 = vpop.f32.mrf.mxu3 }
 0x60f   : > { %v3047_v27 = vpop.f32.mrf.mxu2 }
 0x610   : > { %v7626_v56 = vadd.f32 %v3047_v27, %v2953_v38  ;;  %v2620_v54 = vpop.f32.mrf.mxu3 }
 0x617   : > { %v3050_v36 = vpop.f32.mrf.mxu2 }
 0x618   : > { %v7636_v31 = vadd.f32 %v3050_v36, %v2954_v15 }
 0x61f   : > { %v3053_v1 = vpop.f32.mrf.mxu2 }
 0x620   : > { %v7645_v10 = vadd.f32 %v3053_v1, %v7506_v3  ;;  %v7666_v3 = vld [vmem:[%s8980_s4] ss:$0 sm:$0xff] }
 0x621   : > { %v7672_v29 = vadd.f32 %v7666_v3, %v7498_v39  ;;  %v7678_v2 = vadd.f32 %v7666_v3, %v7486_v46  ;;  %v7684_v57 = vadd.f32 %v7666_v3, %v7508_v7  ;;  %v7690_v45 = vadd.f32 %v7666_v3, %v7515_v47  ;;  %v7692_v39 = vpop.f32.mrf.mxu1 }
 0x622   : > { %v7702_v7 = vadd.f32 %v7666_v3, %v7522_v40  ;;  %v7715_v27 = vadd.f32 %v7666_v3, %v7529_v43 }
 0x623   : > { %9336 = vst [vmem:[#allocation61_spill] sm:$0xff] %v7672_v29  ;;  %v3254_v16 = vmul.f32 %v7672_v29, %v7672_v29  ;;  %v3253_v61 = vmul.f32 %v7678_v2, %v7678_v2  ;;  %v3162_v46 = vsel %vm840_vm1, %v7672_v29, 0.0  ;;  %v3255_v41 = vmul.f32 %v7684_v57, %v7684_v57  ;;  %v7727_v29 = vpop.f32.mrf.mxu0 }
 0x624   : > { %9337 = vst [vmem:[#allocation54_spill] sm:$0xff] %v7678_v2  ;;  %v3161_v48 = vsel %vm840_vm1, %v7678_v2, 0.0  ;;  %v3164_v44 = vsel %vm840_vm1, %v7684_v57, 0.0  ;;  %v3256_v38 = vmul.f32 %v7690_v45, %v7690_v45  ;;  %v3166_v1 = vsel %vm840_vm1, %v7690_v45, 0.0 }
 0x625   : > { %9338 = vst [vmem:[#allocation60_spill] sm:$0xff] %v7684_v57  ;;  %v3286_v49 = vsel %vm840_vm1, %v3254_v16, 0.0  ;;  %v3285_v40 = vsel %vm840_vm1, %v3253_v61, 0.0  ;;  %v3163_v15 = vadd.f32 %v3162_v46, %v3161_v48  ;;  %v3288_v36 = vsel %vm840_vm1, %v3255_v41, 0.0 }
 0x626   : > { %9339 = vst [vmem:[#allocation66_spill] sm:$0xff] %v7690_v45  ;;  %v3257_v16 = vmul.f32 %v7702_v7, %v7702_v7  ;;  %v7725_v57 = vadd.f32 %v7666_v3, %v7536_v30  ;;  %v3287_v2 = vadd.f32 %v3286_v49, %v3285_v40  ;;  %v3290_v61 = vsel %vm840_vm1, %v3256_v38, 0.0 }
 0x627   : > { %v7651_v55 = vpop.f32.mrf.mxu2  ;;  %9341 = vst [vmem:[#allocation64_spill] sm:$0xff] %v7715_v27  ;;  %v3165_v43 = vadd.f32 %v3164_v44, %v3163_v15  ;;  %v3168_v46 = vsel %vm840_vm1, %v7702_v7, 0.0  ;;  %v3258_v41 = vmul.f32 %v7715_v27, %v7715_v27  ;;  %v7736_v48 = vadd.f32 %v7666_v3, %v7545_v22 }
 0x628   : > { %9342 = vst [vmem:[#allocation63_spill] sm:$0xff] %v7725_v57  ;;  %v3289_v45 = vadd.f32 %v3288_v36, %v3287_v2  ;;  %v3292_v49 = vsel %vm840_vm1, %v3257_v16, 0.0  ;;  %v3170_v44 = vsel %vm840_vm1, %v7715_v27, 0.0  ;;  %v3259_v38 = vmul.f32 %v7725_v57, %v7725_v57  ;;  %v9344_v36 = vld [vmem:[#allocation42_spill] sm:$0xff] }
 0x629   : > { %v3167_v30 = vadd.f32 %v3166_v1, %v3165_v43  ;;  %v7747_v40 = vadd.f32 %v7666_v3, %v7553_v58  ;;  %v7749_v15 = vpop.f32.mrf.mxu1  ;;  %v2651_v1 = vadd.f32 %v7610_v20, %v9344_v36  ;;  %v3294_v43 = vsel %vm840_vm1, %v3258_v41, 0.0  ;;  %v9346_v20 = vld [vmem:[#allocation46_spill] sm:$0xff] }
 0x62a   : > { %v3291_v22 = vadd.f32 %v3290_v61, %v3289_v45  ;;  %v3172_v27 = vsel %vm840_vm1, %v7725_v57, 0.0  ;;  %v3260_v58 = vmul.f32 %v7736_v48, %v7736_v48  ;;  %v7764_v45 = vadd.f32 %v7666_v3, %v7561_v50 }
 0x62b   : > { %v3169_v2 = vadd.f32 %v3168_v46, %v3167_v30  ;;  %v2653_v30 = vadd.f32 %v7630_v14, %v9346_v20  ;;  %v3296_v41 = vsel %vm840_vm1, %v3259_v38, 0.0  ;;  %v3261_v57 = vmul.f32 %v7747_v40, %v7747_v40 }
 0x62c   : > { %v3293_v61 = vadd.f32 %v3292_v49, %v3291_v22  ;;  %v7777_v50 = vadd.f32 %v7666_v3, %v7569_v19  ;;  %v2655_v14 = vadd.f32 %v7649_v24, %v7407_v60  ;;  %v3298_v38 = vsel %vm840_vm1, %v3260_v58, 0.0 }
 0x62d   : > { %v3171_v46 = vadd.f32 %v3170_v44, %v3169_v2  ;;  %v3176_v22 = vsel %vm840_vm1, %v7747_v40, 0.0  ;;  %v3262_v2 = vmul.f32 %v7764_v45, %v7764_v45  ;;  %v7792_v19 = vadd.f32 %v7666_v3, %v7577_v33 }
 0x62e   : > { %v3295_v49 = vadd.f32 %v3294_v43, %v3293_v61  ;;  %v3300_v58 = vsel %vm840_vm1, %v3261_v57, 0.0  ;;  %v3178_v61 = vsel %vm840_vm1, %v7764_v45, 0.0  ;;  %v3263_v33 = vmul.f32 %v7777_v50, %v7777_v50 }
 0x62f   : > { %v7657_v4 = vpop.f32.mrf.mxu2  ;;  %v3173_v44 = vadd.f32 %v3172_v27, %v3171_v46  ;;  %v7794_v27 = vpop.f32.mrf.mxu0  ;;  %v7808_v46 = vadd.f32 %v7666_v3, %v7585_v34  ;;  %v7811_v20 = vadd.f32 %v2620_v54, %v7449_v17  ;;  %v3302_v57 = vsel %vm840_vm1, %v3262_v2, 0.0 }
 0x630   : > { %v3297_v24 = vadd.f32 %v3296_v41, %v3295_v49  ;;  %v3264_v34 = vmul.f32 %v7792_v19, %v7792_v19  ;;  %v2802_v17 = vadd.f32 %v7632_v51, %v2651_v1  ;;  %v7838_v2 = vadd.f32 %v7666_v3, %v7600_v53 }
 0x631   : > { %v7821_v41 = vpop.f32.mrf.mxu1  ;;  %v2804_v51 = vadd.f32 %v7653_v37, %v2653_v30 }
 0x632   : > { %v2957_v37 = vadd.f32 %v7638_v26, %v2802_v17  ;;  %v2806_v17 = vadd.f32 %v7692_v39, %v2655_v14 }
 0x637   : > { %v7668_v63 = vpop.f32.mrf.mxu2 }
 0x638   : > { %9335 = vst [vmem:[#allocation56_spill] sm:$0xff] %v7668_v63 }
 0x63f   : > { %v7706_v47 = vpop.f32.mrf.mxu2 }
 0x640   : > { %9340 = vst [vmem:[#allocation59_spill] sm:$0xff] %v7706_v47  ;;  %v9343_v47 = vld [vmem:[#allocation37_spill] sm:$0xff] }
 0x641   : > { %v2650_v63 = vadd.f32 %v7603_v9, %v9343_v47  ;;  %v9345_v9 = vld [vmem:[#allocation44_spill] sm:$0xff] }
 0x642   : > { %v2652_v47 = vadd.f32 %v7618_v18, %v9345_v9  ;;  %v9347_v18 = vld [vmem:[#allocation55_spill] sm:$0xff]  ;;  %v3174_v9 = vsel %vm840_vm1, %v7736_v48, 0.0 }
 0x643   : > { %v2654_v36 = vadd.f32 %v7640_v6, %v9347_v18  ;;  %v7783_v6 = vadd.f32 %v7659_v59, %v7421_v21  ;;  %v2801_v60 = vadd.f32 %v7622_v52, %v2650_v63  ;;  %v3175_v43 = vadd.f32 %v3174_v9, %v3173_v44  ;;  %v2623_v59 = vpop.f32.mrf.mxu3 }
 0x644   : > { %v7799_v21 = vadd.f32 %v7680_v42, %v7435_v8  ;;  %v3299_v52 = vadd.f32 %v3298_v38, %v3297_v24  ;;  %v7814_v8 = vadd.f32 %v2623_v59, %v7464_v62  ;;  %v3180_v18 = vsel %vm840_vm1, %v7777_v50, 0.0 }
 0x645   : > { %v3177_v63 = vadd.f32 %v3176_v22, %v3175_v43  ;;  %v7827_v9 = vadd.f32 %v7666_v3, %v7593_v12  ;;  %v2956_v49 = vadd.f32 %v7628_v5, %v2801_v60  ;;  %v3304_v44 = vsel %vm840_vm1, %v3263_v33, 0.0 }
 0x646   : > { %v3301_v62 = vadd.f32 %v3300_v58, %v3299_v52  ;;  %v3182_v38 = vsel %vm840_vm1, %v7792_v19, 0.0  ;;  %v3265_v22 = vmul.f32 %v7808_v46, %v7808_v46  ;;  %v2803_v12 = vadd.f32 %v7642_v25, %v2652_v47 }
 0x647   : > { %v7755_v16 = vpop.f32.mrf.mxu2  ;;  %v3179_v54 = vadd.f32 %v3178_v61, %v3177_v63  ;;  %v3306_v5 = vsel %vm840_vm1, %v3264_v34, 0.0  ;;  %v3184_v60 = vsel %vm840_vm1, %v7808_v46, 0.0  ;;  %v3266_v43 = vmul.f32 %v7827_v9, %v7827_v9 }
 0x648   : > { %v3303_v1 = vadd.f32 %v3302_v57, %v3301_v62  ;;  %v7849_v59 = vadd.f32 %v7666_v3, %v7608_v28  ;;  %v2805_v53 = vadd.f32 %v7661_v23, %v2654_v36  ;;  %v3308_v47 = vsel %vm840_vm1, %v3265_v22, 0.0  ;;  %v7862_v28 = vpop.f32.mrf.mxu0 }
 0x649   : > { %v3181_v24 = vadd.f32 %v3180_v18, %v3179_v54  ;;  %v3186_v30 = vsel %vm840_vm1, %v7827_v9, 0.0  ;;  %v3267_v61 = vmul.f32 %v7838_v2, %v7838_v2  ;;  %v7860_v33 = vadd.f32 %v7666_v3, %v7614_v35 }
 0x64a   : > { %v3305_v58 = vadd.f32 %v3304_v44, %v3303_v1  ;;  %v7866_v36 = vadd.f32 %v7666_v3, %v7620_v13  ;;  %v2958_v26 = vadd.f32 %v7647_v11, %v2803_v12  ;;  %v3310_v57 = vsel %vm840_vm1, %v3266_v43, 0.0  ;;  %v2771_v44 = vpop.f32.mrf.mxu1 }
 0x64b   : > { %v3183_v25 = vadd.f32 %v3182_v38, %v3181_v24  ;;  %v3188_v18 = vsel %vm840_vm1, %v7838_v2, 0.0  ;;  %v3268_v35 = vmul.f32 %v7849_v59, %v7849_v59  ;;  %v2959_v34 = vadd.f32 %v7655_v0, %v2804_v51 }
 0x64c   : > { %v3307_v52 = vadd.f32 %v3306_v5, %v3305_v58  ;;  %v2960_v13 = vadd.f32 %v7674_v32, %v2805_v53  ;;  %v3312_v11 = vsel %vm840_vm1, %v3267_v61, 0.0  ;;  %v3190_v38 = vsel %vm840_vm1, %v7849_v59, 0.0  ;;  %v9348_v61 = vld [vmem:[#allocation56_spill] sm:$0xff] }
 0x64d   : > { %v3185_v23 = vadd.f32 %v3184_v60, %v3183_v25  ;;  %v3269_v22 = vmul.f32 %v7860_v33, %v7860_v33  ;;  %v7886_v12 = vadd.f32 %v7666_v3, %v7626_v56  ;;  %v2807_v0 = vadd.f32 %v7749_v15, %v7783_v6 }
 0x64e   : > { %v3309_v62 = vadd.f32 %v3308_v47, %v3307_v52  ;;  %v3270_v32 = vmul.f32 %v7866_v36, %v7866_v36  ;;  %v3314_v51 = vsel %vm840_vm1, %v3268_v35, 0.0  ;;  %v3192_v1 = vsel %vm840_vm1, %v7860_v33, 0.0 }
 0x64f   : > { %v7816_v42 = vpop.f32.mrf.mxu2  ;;  %v3187_v54 = vadd.f32 %v3186_v30, %v3185_v23  ;;  %v7897_v24 = vadd.f32 %v7666_v3, %v7636_v31  ;;  %v3110_v56 = vadd.f32 %v7651_v55, %v2956_v49  ;;  %v3111_v15 = vadd.f32 %v7657_v4, %v2957_v37 }
 0x650   : > { %v3311_v39 = vadd.f32 %v3310_v57, %v3309_v62  ;;  %v2961_v6 = vadd.f32 %v7727_v29, %v2806_v17  ;;  %v3316_v43 = vsel %vm840_vm1, %v3269_v22, 0.0  ;;  %v3194_v53 = vsel %vm840_vm1, %v7866_v36, 0.0 }
 0x651   : > { %v3189_v14 = vadd.f32 %v3188_v18, %v3187_v54  ;;  %v3271_v58 = vmul.f32 %v7886_v12, %v7886_v12  ;;  %v7909_v31 = vadd.f32 %v7666_v3, %v7645_v10  ;;  %v3318_v49 = vsel %vm840_vm1, %v3270_v32, 0.0  ;;  %v2926_v10 = vpop.f32.mrf.mxu0  ;;  %v9349_v54 = vld [vmem:[#allocation59_spill] sm:$0xff] }
 0x652   : > { %v3313_v5 = vadd.f32 %v3312_v11, %v3311_v39  ;;  %v2962_v4 = vadd.f32 %v7794_v27, %v2807_v0  ;;  %v3196_v29 = vsel %vm840_vm1, %v7886_v12, 0.0  ;;  %v3272_v47 = vmul.f32 %v7897_v24, %v7897_v24 }
 0x653   : > { %v3191_v60 = vadd.f32 %v3190_v38, %v3189_v14  ;;  %v7918_v30 = vadd.f32 %v7666_v3, %v3110_v56  ;;  %v3112_v52 = vadd.f32 %v9348_v61, %v2958_v26  ;;  %v2808_v23 = vadd.f32 %v7821_v41, %v7799_v21  ;;  %v2774_v41 = vpop.f32.mrf.mxu1 }
 0x654   : > { %v3315_v25 = vadd.f32 %v3314_v51, %v3313_v5  ;;  %v7924_v27 = vadd.f32 %v7666_v3, %v3111_v15  ;;  %v3320_v35 = vsel %vm840_vm1, %v3271_v58, 0.0  ;;  %v3198_v17 = vsel %vm840_vm1, %v7897_v24, 0.0 }
 0x655   : > { %v3193_v55 = vadd.f32 %v3192_v1, %v3191_v60  ;;  %v3273_v62 = vmul.f32 %v7909_v31, %v7909_v31  ;;  %v3113_v11 = vadd.f32 %v9349_v54, %v2959_v34  ;;  %v2809_v26 = vadd.f32 %v2771_v44, %v7811_v20 }
 0x656   : > { %v3317_v57 = vadd.f32 %v3316_v43, %v3315_v25  ;;  %v3114_v21 = vadd.f32 %v7755_v16, %v2960_v13  ;;  %v3322_v0 = vsel %vm840_vm1, %v3272_v47, 0.0  ;;  %v3200_v39 = vsel %vm840_vm1, %v7909_v31, 0.0 }
 0x657   : > { %v7869_v63 = vpop.f32.mrf.mxu2  ;;  %v3195_v18 = vadd.f32 %v3194_v53, %v3193_v55  ;;  %v3274_v14 = vmul.f32 %v7918_v30, %v7918_v30  ;;  %v7940_v32 = vadd.f32 %v7666_v3, %v3112_v52  ;;  %v3275_v20 = vmul.f32 %v7924_v27, %v7924_v27 }
 0x658   : > { %v3319_v38 = vadd.f32 %v3318_v49, %v3317_v57  ;;  %v2963_v44 = vadd.f32 %v7862_v28, %v2808_v23  ;;  %v3324_v16 = vsel %vm840_vm1, %v3273_v62, 0.0  ;;  %v3202_v13 = vsel %vm840_vm1, %v7918_v30, 0.0 }
 0x659   : > { %v3197_v22 = vadd.f32 %v3196_v29, %v3195_v18  ;;  %v7949_v1 = vadd.f32 %v7666_v3, %v3113_v11  ;;  %v3115_v56 = vadd.f32 %v7816_v42, %v2961_v6  ;;  %v7953_v15 = vadd.f32 %v7666_v3, %v3114_v21  ;;  %v2929_v42 = vpop.f32.mrf.mxu0 }
 0x65a   : > { %v3321_v51 = vadd.f32 %v3320_v35, %v3319_v38  ;;  %v2964_v43 = vadd.f32 %v2926_v10, %v2809_v26  ;;  %v3326_v58 = vsel %vm840_vm1, %v3274_v14, 0.0  ;;  %v3204_v28 = vsel %vm840_vm1, %v7924_v27, 0.0  ;;  %v2626_v26 = vpop.f32.mrf.mxu3 }
 0x65b   : > { %v3199_v34 = vadd.f32 %v3198_v17, %v3197_v22  ;;  %v3276_v25 = vmul.f32 %v7940_v32, %v7940_v32  ;;  %v3116_v55 = vadd.f32 %v7869_v63, %v2962_v4  ;;  %v2810_v49 = vadd.f32 %v2774_v41, %v7814_v8  ;;  %v2777_v38 = vpop.f32.mrf.mxu1 }
 0x65c   : > { %v3323_v5 = vadd.f32 %v3322_v0, %v3321_v51  ;;  %v3328_v47 = vsel %vm840_vm1, %v3275_v20, 0.0  ;;  %v3206_v61 = vsel %vm840_vm1, %v7940_v32, 0.0  ;;  %v3277_v52 = vmul.f32 %v7949_v1, %v7949_v1  ;;  %v9350_v0 = vld [vmem:[#allocation50_spill] sm:$0xff] }
 0x65d   : > { %v3201_v60 = vadd.f32 %v3200_v39, %v3199_v34  ;;  %v7968_v10 = vadd.f32 %v7666_v3, %v3115_v56  ;;  %v3278_v8 = vmul.f32 %v7953_v15, %v7953_v15  ;;  %v3330_v63 = vsel %vm840_vm1, %v3276_v25, 0.0 }
 0x65e   : > { %v3325_v6 = vadd.f32 %v3324_v16, %v3323_v5  ;;  %v3208_v4 = vsel %vm840_vm1, %v7949_v1, 0.0  ;;  %v7976_v35 = vadd.f32 %v7666_v3, %v3116_v55  ;;  %v2965_v62 = vadd.f32 %v2929_v42, %v2810_v49 }
 0x65f   : > { %v3077_v37 = vpop.f32.mrf.mxu2  ;;  %v3203_v29 = vadd.f32 %v3202_v13, %v3201_v60  ;;  %v3210_v22 = vsel %vm840_vm1, %v7953_v15, 0.0  ;;  %v3279_v21 = vmul.f32 %v7968_v10, %v7968_v10  ;;  %v2660_v39 = vadd.f32 %v2626_v26, %v9350_v0 }
 0x660   : > { %v3117_v23 = vadd.f32 %v3077_v37, %v2963_v44  ;;  %v3327_v57 = vadd.f32 %v3326_v58, %v3325_v6  ;;  %v3332_v37 = vsel %vm840_vm1, %v3277_v52, 0.0  ;;  %v3334_v34 = vsel %vm840_vm1, %v3278_v8, 0.0 }
 0x661   : > { %v3205_v18 = vadd.f32 %v3204_v28, %v3203_v29  ;;  %v3212_v44 = vsel %vm840_vm1, %v7968_v10, 0.0  ;;  %v3280_v16 = vmul.f32 %v7976_v35, %v7976_v35  ;;  %v2811_v5 = vadd.f32 %v2777_v38, %v2660_v39  ;;  %v2932_v55 = vpop.f32.mrf.mxu0 }
 0x662   : > { %v3329_v54 = vadd.f32 %v3328_v47, %v3327_v57  ;;  %v7984_v41 = vadd.f32 %v7666_v3, %v3117_v23  ;;  %v3214_v58 = vsel %vm840_vm1, %v7976_v35, 0.0 }
 0x663   : > { %v3207_v11 = vadd.f32 %v3206_v61, %v3205_v18  ;;  %v3338_v6 = vsel %vm840_vm1, %v3280_v16, 0.0  ;;  %v2966_v23 = vadd.f32 %v2932_v55, %v2811_v5 }
 0x664   : > { %v3331_v14 = vadd.f32 %v3330_v63, %v3329_v54  ;;  %v3281_v28 = vmul.f32 %v7984_v41, %v7984_v41  ;;  %v3216_v29 = vsel %vm840_vm1, %v7984_v41, 0.0 }
 0x665   : > { %v3209_v51 = vadd.f32 %v3208_v4, %v3207_v11 }
 0x666   : > { %v3333_v60 = vadd.f32 %v3332_v37, %v3331_v14  ;;  %v3340_v57 = vsel %vm840_vm1, %v3281_v28, 0.0 }
 0x667   : > { %v3080_v53 = vpop.f32.mrf.mxu2 }
 0x668   : > { %v3118_v17 = vadd.f32 %v3080_v53, %v2964_v43  ;;  %v3211_v43 = vadd.f32 %v3210_v22, %v3209_v51  ;;  %v3336_v53 = vsel %vm840_vm1, %v3279_v21, 0.0  ;;  %v3335_v49 = vadd.f32 %v3334_v34, %v3333_v60 }
 0x66a   : > { %v7993_v13 = vadd.f32 %v7666_v3, %v3118_v17  ;;  %v3213_v42 = vadd.f32 %v3212_v44, %v3211_v43  ;;  %v3337_v61 = vadd.f32 %v3336_v53, %v3335_v49 }
 0x66c   : > { %v3282_v47 = vmul.f32 %v7993_v13, %v7993_v13  ;;  %v3215_v52 = vadd.f32 %v3214_v58, %v3213_v42  ;;  %v3218_v18 = vsel %vm840_vm1, %v7993_v13, 0.0  ;;  %v3339_v63 = vadd.f32 %v3338_v6, %v3337_v61  ;;  %v3158_v6 = vld [vmem:[%s8990_s14] sm:$0xf] }
 0x66d   : > { %4812 = vmatpush.msk.msrb.mxu3 %vm1065_vm2, %v3158_v6  ;;  %4814 = vmatpush.msk.msra.mxu1 %vm1065_vm2, %v3158_v6 }
 0x66e   : > { %v3217_v4 = vadd.f32 %v3216_v29, %v3215_v52  ;;  %v3341_v26 = vadd.f32 %v3340_v57, %v3339_v63 }
 0x66f   : > { %v3083_v20 = vpop.f32.mrf.mxu2 }
 0x670   : > { %v3119_v56 = vadd.f32 %v3083_v20, %v2965_v62  ;;  %v3342_v62 = vsel %vm840_vm1, %v3282_v47, 0.0  ;;  %v3219_v38 = vadd.f32 %v3218_v18, %v3217_v4 }
 0x671   : > { %v3343_v21 = vadd.f32 %v3342_v62, %v3341_v26  ;;  %v3609_v26 = vld [vmem:[%s8981_s5] sm:$0xff] }
 0x672   : > { %v8001_v25 = vadd.f32 %v7666_v3, %v3119_v56 }
 0x674   : > { %v3283_v8 = vmul.f32 %v8001_v25, %v8001_v25  ;;  %v3220_v54 = vsel %vm840_vm1, %v8001_v25, 0.0 }
 0x675   : > { %v3221_v0 = vadd.f32 %v3220_v54, %v3219_v38 }
 0x676   : > { %v3344_v37 = vsel %vm840_vm1, %v3283_v8, 0.0 }
 0x677   : > { %v3086_v17 = vpop.f32.mrf.mxu2  ;;  %v3345_v51 = vadd.f32 %v3344_v37, %v3343_v21  ;;  %v9351_v21 = vld [vmem:[#allocation54_spill] sm:$0xff] }
 0x678   : > { %v3120_v11 = vadd.f32 %v3086_v17, %v2966_v23 }
 0x67a   : > { %v8018_v22 = vadd.f32 %v7666_v3, %v3120_v11 }
 0x67c   : > { %v3222_v39 = vsel %vm840_vm1, %v8018_v22, 0.0  ;;  %v3284_v14 = vmul.f32 %v8018_v22, %v8018_v22 }
 0x67d   : > { %v3223_v34 = vadd.f32 %v3222_v39, %v3221_v0  ;;  %v9352_v39 = vld [vmem:[#allocation61_spill] sm:$0xff] }
 0x67e   : > { %v3346_v20 = vsel %vm840_vm1, %v3284_v14, 0.0 }
 0x67f   : > { %v3224_v44 = vrot.slane %v3223_v34, 4  ;;  %v3347_v16 = vadd.f32 %v3346_v20, %v3345_v51  ;;  %v9353_v51 = vld [vmem:[#allocation60_spill] sm:$0xff] }
 0x681   : > { %v3225_v56 = vadd.f32 %v3224_v44, %v3223_v34  ;;  %v3348_v5 = vrot.slane %v3347_v16, 4 }
 0x683   : > { %v3226_v60 = vrot.slane %v3225_v56, 2  ;;  %v3349_v43 = vadd.f32 %v3348_v5, %v3347_v16 }
 0x685   : > { %v3227_v3 = vadd.f32 %v3226_v60, %v3225_v56  ;;  %v3350_v53 = vrot.slane %v3349_v43, 2 }
 0x687   : > { %v3228_v58 = vrot.slane %v3227_v3, 1  ;;  %v3351_v28 = vadd.f32 %v3350_v53, %v3349_v43 }
 0x689   : > { %v3229_v55 = vadd.f32 %v3228_v58, %v3227_v3  ;;  %v3352_v49 = vrot.slane %v3351_v28, 1 }
 0x68b   : > { %v3353_v42 = vadd.f32 %v3352_v49, %v3351_v28  ;;  %4810 = vmatmul.msk.f32.vlgmr.msra.gmra.mxu3 %vm840_vm1, %v3229_v55  ;;  %v8108_v49 = vld [vmem:[%s8985_s9] ss:$0 sm:$0xff] }
 0x68c   : > { %3725 = vmatpush.msra.mxu3 %v3609_v26 }
 0x68d   : > { %4811 = vmatmul.msk.f32.vlgmr.msrb.gmra.mxu1 %vm840_vm1, %v3353_v42 }
 0x70a   : > { %v3374_v29 = vpop.f32.mrf.mxu1 }
 0x70b   : > { %v3378_v52 = vmul.f32 0.001953125, %v3374_v29 }
 0x70e   : > { %v3250_v47 = vpop.f32.mrf.mxu3 }
 0x70f   : > { %v3377_v61 = vmul.f32 0.001953125, %v3250_v47 }
 0x711   : > { %v3379_v23 = vmul.f32 %v3377_v61, %v3377_v61  ;;  %4813 = vmatmul.msk.f32.vlgmr.msrb.gmra.mxu3 %vm1061_vm3, %v3377_v61 }
 0x713   : > { %v3380_v57 = vsub.f32 %v3378_v52, %v3379_v23 }
 0x715   : > { %v3407_v18 = vadd.f32 1e-05, %v3380_v57 }
 0x717   : > { %4940 = vrsqrt.f32 %v3407_v18  ;;  %vm3414_vm12 = vweird.f32 %v3407_v18 }
 0x71d   : > { %v4941_v8 = vpop.eup %4940 }
 0x71e   : > { %v3409_v63 = vmul.f32 %v4941_v8, %v3407_v18  ;;  %vm3415_vm11 = vweird.f32 %v4941_v8  ;;  %v8121_v18 = vld [vmem:[%s8986_s10] ss:$0 sm:$0xff] }
 0x71f   : > { %vm3416_vm13 = vmor %vm3414_vm12, %vm3415_vm11 }
 0x720   : > { %v3410_v4 = vmul.f32 %v4941_v8, %v3409_v63 }
 0x722   : > { %v3411_v17 = vmul.f32 0.5, %v3410_v4 }
 0x724   : > { %v3412_v62 = vsub.f32 1.5, %v3411_v17 }
 0x726   : > { %v3413_v54 = vmul.f32 %v4941_v8, %v3412_v62 }
 0x728   : > { %v3417_v11 = vsel %vm3416_vm13, %v4941_v8, %v3413_v54 }
 0x729   : > { %4815 = vmatmul.msk.f32.vlgmr.msra.gmra.mxu1 %vm1061_vm3, %v3417_v11 }
 0x794   : > { %v3404_v38 = vpop.f32.mrf.mxu3 }
 0x795   : > { %v8037_v37 = vperm.slane %v3404_v38, 0 }
 0x797   : > { %v3442_v0 = vsub.f32 %v9351_v21, %v8037_v37  ;;  %v3443_v14 = vsub.f32 %v9352_v39, %v8037_v37  ;;  %v3444_v34 = vsub.f32 %v9353_v51, %v8037_v37  ;;  %v3450_v20 = vsub.f32 %v7747_v40, %v8037_v37  ;;  %v9354_v51 = vld [vmem:[#allocation66_spill] sm:$0xff] }
 0x798   : > { %v3451_v44 = vsub.f32 %v7764_v45, %v8037_v37  ;;  %v3452_v16 = vsub.f32 %v7777_v50, %v8037_v37  ;;  %v3453_v56 = vsub.f32 %v7792_v19, %v8037_v37  ;;  %v3454_v5 = vsub.f32 %v7808_v46, %v8037_v37 }
 0x799   : > { %v3455_v60 = vsub.f32 %v7827_v9, %v8037_v37  ;;  %v3456_v43 = vsub.f32 %v7838_v2, %v8037_v37  ;;  %v3457_v40 = vsub.f32 %v7849_v59, %v8037_v37  ;;  %v3458_v45 = vsub.f32 %v7860_v33, %v8037_v37 }
 0x79a   : > { %v3459_v50 = vsub.f32 %v7866_v36, %v8037_v37  ;;  %v3460_v19 = vsub.f32 %v7886_v12, %v8037_v37  ;;  %v3461_v46 = vsub.f32 %v7897_v24, %v8037_v37  ;;  %v3462_v9 = vsub.f32 %v7909_v31, %v8037_v37 }
 0x79b   : > { %v3463_v2 = vsub.f32 %v7918_v30, %v8037_v37  ;;  %v3464_v33 = vsub.f32 %v7924_v27, %v8037_v37  ;;  %v3465_v36 = vsub.f32 %v7940_v32, %v8037_v37  ;;  %v3466_v12 = vsub.f32 %v7949_v1, %v8037_v37 }
 0x79c   : > { %v3467_v24 = vsub.f32 %v7953_v15, %v8037_v37  ;;  %v3468_v31 = vsub.f32 %v7968_v10, %v8037_v37  ;;  %v3469_v30 = vsub.f32 %v7976_v35, %v8037_v37  ;;  %v3470_v53 = vsub.f32 %v7984_v41, %v8037_v37 }
 0x79d   : > { %v3471_v27 = vsub.f32 %v7993_v13, %v8037_v37  ;;  %v3472_v32 = vsub.f32 %v8001_v25, %v8037_v37  ;;  %v3473_v1 = vsub.f32 %v8018_v22, %v8037_v37 }
 0x7a6   : > { %v3438_v3 = vpop.f32.mrf.mxu1 }
 0x7a7   : > { %v8073_v59 = vperm.slane %v3438_v3, 0 }
 0x7a9   : > { %v3475_v15 = vmul.f32 %v8073_v59, %v3442_v0  ;;  %v3476_v58 = vmul.f32 %v8073_v59, %v3443_v14  ;;  %v3483_v10 = vmul.f32 %v8073_v59, %v3450_v20  ;;  %v3484_v35 = vmul.f32 %v8073_v59, %v3451_v44 }
 0x7aa   : > { %v3485_v28 = vmul.f32 %v8073_v59, %v3452_v16  ;;  %v3486_v41 = vmul.f32 %v8073_v59, %v3453_v56  ;;  %v3487_v13 = vmul.f32 %v8073_v59, %v3454_v5  ;;  %v3488_v55 = vmul.f32 %v8073_v59, %v3455_v60 }
 0x7ab   : > { %v3489_v25 = vmul.f32 %v8073_v59, %v3456_v43  ;;  %v3490_v22 = vmul.f32 %v8073_v59, %v3457_v40  ;;  %v3491_v42 = vmul.f32 %v8073_v59, %v3458_v45  ;;  %v3492_v6 = vmul.f32 %v8073_v59, %v3459_v50 }
 0x7ac   : > { %v3493_v29 = vmul.f32 %v8073_v59, %v3460_v19  ;;  %v3494_v47 = vmul.f32 %v8073_v59, %v3461_v46  ;;  %v3495_v61 = vmul.f32 %v8073_v59, %v3462_v9  ;;  %v3496_v52 = vmul.f32 %v8073_v59, %v3463_v2 }
 0x7ad   : > { %v3497_v23 = vmul.f32 %v8073_v59, %v3464_v33  ;;  %v3498_v57 = vmul.f32 %v8073_v59, %v3465_v36  ;;  %v3499_v8 = vmul.f32 %v8073_v59, %v3466_v12  ;;  %v3500_v63 = vmul.f32 %v8073_v59, %v3467_v24 }
 0x7ae   : > { %v3501_v4 = vmul.f32 %v8073_v59, %v3468_v31  ;;  %v3502_v17 = vmul.f32 %v8073_v59, %v3469_v30  ;;  %v3503_v62 = vmul.f32 %v8073_v59, %v3470_v53  ;;  %v3504_v54 = vmul.f32 %v8073_v59, %v3471_v27 }
 0x7af   : > { %v3505_v11 = vmul.f32 %v8073_v59, %v3472_v32  ;;  %v3506_v26 = vmul.f32 %v8073_v59, %v3473_v1  ;;  %v3510_v38 = vmul.f32 %v8108_v49, %v3475_v15  ;;  %v3477_v21 = vmul.f32 %v8073_v59, %v3444_v34 }
 0x7b0   : > { %v3511_v0 = vmul.f32 %v8108_v49, %v3476_v58  ;;  %v3445_v20 = vsub.f32 %v9354_v51, %v8037_v37  ;;  %v3518_v56 = vmul.f32 %v8108_v49, %v3483_v10  ;;  %v3519_v5 = vmul.f32 %v8108_v49, %v3484_v35 }
 0x7b1   : > { %v3545_v39 = vadd.f32 %v8121_v18, %v3510_v38  ;;  %v3512_v16 = vmul.f32 %v8108_v49, %v3477_v21  ;;  %v3520_v34 = vmul.f32 %v8108_v49, %v3485_v28  ;;  %v3521_v60 = vmul.f32 %v8108_v49, %v3486_v41 }
 0x7b2   : > { %v3546_v44 = vadd.f32 %v8121_v18, %v3511_v0  ;;  %v3522_v43 = vmul.f32 %v8108_v49, %v3487_v13  ;;  %v3523_v40 = vmul.f32 %v8108_v49, %v3488_v55  ;;  %v3524_v45 = vmul.f32 %v8108_v49, %v3489_v25 }
 0x7b3   : > { %v3577_v14 = vmax.f32 %v3545_v39, 0.0  ;;  %v3525_v50 = vmul.f32 %v8108_v49, %v3490_v22  ;;  %v8149_v19 = vadd.f32 %v8121_v18, %v3518_v56  ;;  %v8152_v3 = vadd.f32 %v8121_v18, %v3519_v5  ;;  %v9355_v56 = vld [vmem:[#allocation64_spill] sm:$0xff] }
 0x7b4   : > { %v8155_v46 = vadd.f32 %v8121_v18, %v3520_v34  ;;  %v8158_v9 = vadd.f32 %v8121_v18, %v3521_v60  ;;  %v8161_v2 = vadd.f32 %v8121_v18, %v3522_v43  ;;  %v8164_v33 = vadd.f32 %v8121_v18, %v3523_v40  ;;  %v9356_v40 = vld [vmem:[#allocation63_spill] sm:$0xff] }
 0x7b5   : > { %4816 = vmatmul.msk.f32.vlgmr.msra.gmra.mxu3 %vm840_vm1, %v3577_v14  ;;  %v8167_v36 = vadd.f32 %v8121_v18, %v3524_v45  ;;  %v8170_v12 = vadd.f32 %v8121_v18, %v3525_v50  ;;  %v3478_v24 = vmul.f32 %v8073_v59, %v3445_v20  ;;  %v3578_v31 = vmax.f32 %v3546_v44, 0.0 }
 0x7b6   : > { %v3547_v30 = vadd.f32 %v8121_v18, %v3512_v16  ;;  %v3526_v53 = vmul.f32 %v8108_v49, %v3491_v42  ;;  %v3527_v27 = vmul.f32 %v8108_v49, %v3492_v6  ;;  %v3528_v32 = vmul.f32 %v8108_v49, %v3493_v29 }
 0x7b7   : > { %v3529_v1 = vmul.f32 %v8108_v49, %v3494_v47  ;;  %v3530_v15 = vmul.f32 %v8108_v49, %v3495_v61  ;;  %v3531_v58 = vmul.f32 %v8108_v49, %v3496_v52  ;;  %v3532_v10 = vmul.f32 %v8108_v49, %v3497_v23 }
 0x7b8   : > { %v3533_v35 = vmul.f32 %v8108_v49, %v3498_v57  ;;  %v8184_v28 = vadd.f32 %v8121_v18, %v3526_v53  ;;  %v8187_v41 = vadd.f32 %v8121_v18, %v3527_v27  ;;  %v8190_v13 = vadd.f32 %v8121_v18, %v3528_v32 }
 0x7b9   : > { %v8193_v55 = vadd.f32 %v8121_v18, %v3529_v1  ;;  %v8196_v25 = vadd.f32 %v8121_v18, %v3530_v15  ;;  %v8199_v22 = vadd.f32 %v8121_v18, %v3531_v58  ;;  %v8202_v42 = vadd.f32 %v8121_v18, %v3532_v10 }
 0x7ba   : > { %v8205_v6 = vadd.f32 %v8121_v18, %v3533_v35  ;;  %v3579_v29 = vmax.f32 %v3547_v30, 0.0  ;;  %v3513_v47 = vmul.f32 %v8108_v49, %v3478_v24  ;;  %v3534_v61 = vmul.f32 %v8108_v49, %v3499_v8 }
 0x7bb   : > { %v3535_v52 = vmul.f32 %v8108_v49, %v3500_v63  ;;  %v3536_v23 = vmul.f32 %v8108_v49, %v3501_v4  ;;  %v3537_v57 = vmul.f32 %v8108_v49, %v3502_v17  ;;  %v3538_v38 = vmul.f32 %v8108_v49, %v3503_v62 }
 0x7bc   : > { %v3539_v21 = vmul.f32 %v8108_v49, %v3504_v54  ;;  %v3540_v0 = vmul.f32 %v8108_v49, %v3505_v11  ;;  %v3541_v39 = vmul.f32 %v8108_v49, %v3506_v26  ;;  %v8217_v14 = vadd.f32 %v8121_v18, %v3534_v61 }
 0x7bd   : > { %4817 = vmatmul.msk.f32.gmra.mxu3 %vm840_vm1, %v3578_v31  ;;  %v8220_v51 = vadd.f32 %v8121_v18, %v3535_v52  ;;  %v8223_v8 = vadd.f32 %v8121_v18, %v3536_v23  ;;  %v8226_v63 = vadd.f32 %v8121_v18, %v3537_v57  ;;  %v8229_v4 = vadd.f32 %v8121_v18, %v3538_v38 }
 0x7be   : > { %v8232_v17 = vadd.f32 %v8121_v18, %v3539_v21  ;;  %v8235_v62 = vadd.f32 %v8121_v18, %v3540_v0  ;;  %v8238_v54 = vadd.f32 %v8121_v18, %v3541_v39  ;;  %v3446_v11 = vsub.f32 %v7702_v7, %v8037_v37 }
 0x7bf   : > { %v3548_v20 = vadd.f32 %v8121_v18, %v3513_v47  ;;  %v3447_v5 = vsub.f32 %v9355_v56, %v8037_v37  ;;  %v3448_v45 = vsub.f32 %v9356_v40, %v8037_v37  ;;  %v3449_v53 = vsub.f32 %v7736_v48, %v8037_v37 }
 0x7c0   : > { %v3479_v26 = vmul.f32 %v8073_v59, %v3446_v11  ;;  %v3585_v35 = vmax.f32 %v8149_v19, 0.0  ;;  %v3586_v48 = vmax.f32 %v8152_v3, 0.0  ;;  %v3587_v37 = vmax.f32 %v8155_v46, 0.0 }
 0x7c1   : > { %v3580_v44 = vmax.f32 %v3548_v20, 0.0  ;;  %v3480_v34 = vmul.f32 %v8073_v59, %v3447_v5  ;;  %v3481_v50 = vmul.f32 %v8073_v59, %v3448_v45  ;;  %v3482_v27 = vmul.f32 %v8073_v59, %v3449_v53 }
 0x7c2   : > { %v3514_v16 = vmul.f32 %v8108_v49, %v3479_v26  ;;  %v3588_v59 = vmax.f32 %v8158_v9, 0.0  ;;  %v3591_v19 = vmax.f32 %v8167_v36, 0.0  ;;  %v3592_v3 = vmax.f32 %v8170_v12, 0.0 }
 0x7c3   : > { %v3515_v7 = vmul.f32 %v8108_v49, %v3480_v34  ;;  %v3516_v30 = vmul.f32 %v8108_v49, %v3481_v50  ;;  %v3517_v15 = vmul.f32 %v8108_v49, %v3482_v27  ;;  %v3589_v49 = vmax.f32 %v8161_v2, 0.0 }
 0x7c4   : > { %v3549_v60 = vadd.f32 %v8121_v18, %v3514_v16  ;;  %v3593_v46 = vmax.f32 %v8184_v28, 0.0  ;;  %v3594_v2 = vmax.f32 %v8187_v41, 0.0  ;;  %v3596_v47 = vmax.f32 %v8193_v55, 0.0 }
 0x7c5   : > { %4818 = vmatmul.msk.f32.gmra.mxu3 %vm840_vm1, %v3579_v29  ;;  %v3550_v24 = vadd.f32 %v8121_v18, %v3515_v7  ;;  %v3551_v32 = vadd.f32 %v8121_v18, %v3516_v30  ;;  %v3552_v58 = vadd.f32 %v8121_v18, %v3517_v15  ;;  %v3590_v18 = vmax.f32 %v8164_v33, 0.0 }
 0x7c6   : > { %v3581_v43 = vmax.f32 %v3549_v60, 0.0  ;;  %v3595_v29 = vmax.f32 %v8190_v13, 0.0  ;;  %v3597_v28 = vmax.f32 %v8196_v25, 0.0  ;;  %v3598_v41 = vmax.f32 %v8199_v22, 0.0 }
 0x7c7   : > { %v3582_v31 = vmax.f32 %v3550_v24, 0.0  ;;  %v3583_v1 = vmax.f32 %v3551_v32, 0.0  ;;  %v3584_v10 = vmax.f32 %v3552_v58, 0.0  ;;  %v3599_v13 = vmax.f32 %v8202_v42, 0.0 }
 0x7c8   : > { %v3600_v55 = vmax.f32 %v8205_v6, 0.0  ;;  %v3601_v25 = vmax.f32 %v8217_v14, 0.0  ;;  %v3602_v22 = vmax.f32 %v8220_v51, 0.0  ;;  %v3603_v42 = vmax.f32 %v8223_v8, 0.0 }
 0x7c9   : > { %v3604_v0 = vmax.f32 %v8226_v63, 0.0  ;;  %v3605_v14 = vmax.f32 %v8229_v4, 0.0  ;;  %v3606_v11 = vmax.f32 %v8232_v17, 0.0  ;;  %v3607_v26 = vmax.f32 %v8235_v62, 0.0 }
 0x7ca   : > { %v3608_v20 = vmax.f32 %v8238_v54, 0.0  ;;  %v8348_v54 = vld [vmem:[%s8982_s6] ss:$0 sm:$0xff] }
 0x7cd   : > { %4819 = vmatmul.msk.f32.gmra.mxu3 %vm840_vm1, %v3580_v44 }
 0x7d5   : > { %4820 = vmatmul.msk.f32.gmra.mxu3 %vm840_vm1, %v3581_v43 }
 0x7dd   : > { %4821 = vmatmul.msk.f32.gmra.mxu3 %vm840_vm1, %v3582_v31 }
 0x7e5   : > { %4822 = vmatmul.msk.f32.gmra.mxu3 %vm840_vm1, %v3583_v1 }
 0x7ed   : > { %4823 = vmatmul.msk.f32.gmra.mxu3 %vm840_vm1, %v3584_v10 }
 0x7f5   : > { %4824 = vmatmul.msk.f32.gmra.mxu3 %vm840_vm1, %v3585_v35 }
 0x7fd   : > { %4825 = vmatmul.msk.f32.gmra.mxu3 %vm840_vm1, %v3586_v48 }
 0x805   : > { %4826 = vmatmul.msk.f32.gmra.mxu3 %vm840_vm1, %v3587_v37 }
 0x80d   : > { %4827 = vmatmul.msk.f32.gmra.mxu3 %vm840_vm1, %v3588_v59 }
 0x815   : > { %4828 = vmatmul.msk.f32.gmra.mxu3 %vm840_vm1, %v3589_v49 }
 0x81d   : > { %4829 = vmatmul.msk.f32.gmra.mxu3 %vm840_vm1, %v3590_v18 }
 0x825   : > { %4830 = vmatmul.msk.f32.gmra.mxu3 %vm840_vm1, %v3591_v19 }
 0x82d   : > { %4831 = vmatmul.msk.f32.gmra.mxu3 %vm840_vm1, %v3592_v3 }
 0x835   : > { %4832 = vmatmul.msk.f32.gmra.mxu3 %vm840_vm1, %v3593_v46 }
 0x838   : > { %v3727_v9 = vpop.f32.mrf.mxu3 }
 0x839   : > { %v8354_v43 = vadd.f32 %v8348_v54, %v3727_v9 }
 0x83b   : > { %v3922_v24 = vmul.f32 %v8354_v43, %v8354_v43  ;;  %v3830_v27 = vsel %vm626_vm0, %v8354_v43, 0.0 }
 0x83d   : > { %4833 = vmatmul.msk.f32.gmra.mxu3 %vm840_vm1, %v3594_v2  ;;  %v3954_v10 = vsel %vm626_vm0, %v3922_v24, 0.0 }
 0x840   : > { %v3730_v33 = vpop.f32.mrf.mxu3 }
 0x841   : > { %v8351_v60 = vadd.f32 %v8348_v54, %v3730_v33 }
 0x843   : > { %v3923_v45 = vmul.f32 %v8351_v60, %v8351_v60  ;;  %v3831_v31 = vsel %vm626_vm0, %v8351_v60, 0.0 }
 0x844   : > { %v3832_v35 = vadd.f32 %v3831_v31, %v3830_v27 }
 0x845   : > { %4834 = vmatmul.msk.f32.gmra.mxu3 %vm840_vm1, %v3595_v29  ;;  %v3955_v32 = vsel %vm626_vm0, %v3923_v45, 0.0 }
 0x846   : > { %v3956_v19 = vadd.f32 %v3955_v32, %v3954_v10 }
 0x848   : > { %v3733_v36 = vpop.f32.mrf.mxu3 }
 0x849   : > { %v8359_v40 = vadd.f32 %v8348_v54, %v3733_v36 }
 0x84b   : > { %v3924_v30 = vmul.f32 %v8359_v40, %v8359_v40  ;;  %v3833_v1 = vsel %vm626_vm0, %v8359_v40, 0.0 }
 0x84c   : > { %v3834_v3 = vadd.f32 %v3833_v1, %v3832_v35 }
 0x84d   : > { %4835 = vmatmul.msk.f32.gmra.mxu3 %vm840_vm1, %v3596_v47  ;;  %v3957_v37 = vsel %vm626_vm0, %v3924_v30, 0.0 }
 0x84e   : > { %v3958_v29 = vadd.f32 %v3957_v37, %v3956_v19 }
 0x850   : > { %v3736_v12 = vpop.f32.mrf.mxu3 }
 0x851   : > { %v8364_v50 = vadd.f32 %v8348_v54, %v3736_v12 }
 0x853   : > { %v3925_v15 = vmul.f32 %v8364_v50, %v8364_v50  ;;  %v3835_v59 = vsel %vm626_vm0, %v8364_v50, 0.0 }
 0x854   : > { %v3836_v36 = vadd.f32 %v3835_v59, %v3834_v3 }
 0x855   : > { %4836 = vmatmul.msk.f32.gmra.mxu3 %vm840_vm1, %v3597_v28  ;;  %v3959_v46 = vsel %vm626_vm0, %v3925_v15, 0.0 }
 0x858   : > { %v3739_v61 = vpop.f32.mrf.mxu3 }
 0x859   : > { %v8373_v53 = vadd.f32 %v8348_v54, %v3739_v61 }
 0x85b   : > { %v3926_v49 = vmul.f32 %v8373_v53, %v8373_v53  ;;  %v3837_v9 = vsel %vm626_vm0, %v8373_v53, 0.0 }
 0x85d   : > { %4837 = vmatmul.msk.f32.gmra.mxu3 %vm840_vm1, %v3598_v41  ;;  %v3961_v47 = vsel %vm626_vm0, %v3926_v49, 0.0  ;;  %v3960_v41 = vadd.f32 %v3959_v46, %v3958_v29 }
 0x860   : > { %v3742_v52 = vpop.f32.mrf.mxu3 }
 0x861   : > { %v8383_v58 = vadd.f32 %v8348_v54, %v3742_v52  ;;  %v3838_v52 = vadd.f32 %v3837_v9, %v3836_v36 }
 0x863   : > { %v3927_v2 = vmul.f32 %v8383_v58, %v8383_v58  ;;  %v3839_v12 = vsel %vm626_vm0, %v8383_v58, 0.0 }
 0x865   : > { %4838 = vmatmul.msk.f32.gmra.mxu3 %vm840_vm1, %v3599_v13  ;;  %v3963_v13 = vsel %vm626_vm0, %v3927_v2, 0.0 }
 0x868   : > { %v3745_v23 = vpop.f32.mrf.mxu3 }
 0x869   : > { %v8394_v18 = vadd.f32 %v8348_v54, %v3745_v23 }
 0x86b   : > { %v3928_v28 = vmul.f32 %v8394_v18, %v8394_v18  ;;  %v3841_v23 = vsel %vm626_vm0, %v8394_v18, 0.0 }
 0x86d   : > { %4839 = vmatmul.msk.f32.gmra.mxu3 %vm840_vm1, %v3600_v55 }
 0x870   : > { %v3748_v57 = vpop.f32.mrf.mxu3 }
 0x871   : > { %v8402_v33 = vadd.f32 %v8348_v54, %v3748_v57 }
 0x873   : > { %v3929_v55 = vmul.f32 %v8402_v33, %v8402_v33 }
 0x875   : > { %4840 = vmatmul.msk.f32.gmra.mxu3 %vm840_vm1, %v3601_v25  ;;  %v3962_v25 = vadd.f32 %v3961_v47, %v3960_v41 }
 0x878   : > { %v8301_v38 = vpop.f32.mrf.mxu3 }
 0x879   : > { %v8411_v61 = vadd.f32 %v8348_v54, %v8301_v38  ;;  %v3965_v38 = vsel %vm626_vm0, %v3928_v28, 0.0 }
 0x87b   : > { %v3845_v45 = vsel %vm626_vm0, %v8411_v61, 0.0 }
 0x87d   : > { %4841 = vmatmul.msk.f32.gmra.mxu3 %vm840_vm1, %v3602_v22  ;;  %v3840_v22 = vadd.f32 %v3839_v12, %v3838_v52 }
 0x880   : > { %v8305_v21 = vpop.f32.mrf.mxu3 }
 0x881   : > { %v8420_v57 = vadd.f32 %v8348_v54, %v8305_v21  ;;  %v3967_v21 = vsel %vm626_vm0, %v3929_v55, 0.0 }
 0x883   : > { %v3931_v24 = vmul.f32 %v8420_v57, %v8420_v57 }
 0x885   : > { %4842 = vmatmul.msk.f32.gmra.mxu3 %vm840_vm1, %v3603_v42  ;;  %v3971_v37 = vsel %vm626_vm0, %v3931_v24, 0.0 }
 0x888   : > { %v8309_v6 = vpop.f32.mrf.mxu3 }
 0x88d   : > { %4843 = vmatmul.msk.f32.gmra.mxu3 %vm840_vm1, %v3604_v0  ;;  %v3843_v0 = vsel %vm626_vm0, %v8402_v33, 0.0 }
 0x890   : > { %v8313_v39 = vpop.f32.mrf.mxu3 }
 0x891   : > { %v8440_v31 = vadd.f32 %v8348_v54, %v8313_v39 }
 0x893   : > { %v3933_v59 = vmul.f32 %v8440_v31, %v8440_v31  ;;  %v3851_v9 = vsel %vm626_vm0, %v8440_v31, 0.0 }
 0x895   : > { %4844 = vmatmul.msk.f32.gmra.mxu3 %vm840_vm1, %v3605_v14  ;;  %v3930_v14 = vmul.f32 %v8411_v61, %v8411_v61 }
 0x897   : > { %v3969_v32 = vsel %vm626_vm0, %v3930_v14, 0.0 }
 0x898   : > { %v8317_v51 = vpop.f32.mrf.mxu3 }
 0x899   : > { %v8449_v15 = vadd.f32 %v8348_v54, %v8317_v51 }
 0x89b   : > { %v3934_v2 = vmul.f32 %v8449_v15, %v8449_v15  ;;  %v3853_v12 = vsel %vm626_vm0, %v8449_v15, 0.0 }
 0x89d   : > { %4845 = vmatmul.msk.f32.gmra.mxu3 %vm840_vm1, %v3606_v11  ;;  %v8431_v11 = vadd.f32 %v8348_v54, %v8309_v6  ;;  %v3847_v6 = vsel %vm626_vm0, %v8420_v57, 0.0 }
 0x89f   : > { %v3932_v1 = vmul.f32 %v8431_v11, %v8431_v11  ;;  %v3849_v39 = vsel %vm626_vm0, %v8431_v11, 0.0 }
 0x8a0   : > { %v8321_v8 = vpop.f32.mrf.mxu3 }
 0x8a1   : > { %v8458_v49 = vadd.f32 %v8348_v54, %v8321_v8  ;;  %v3973_v51 = vsel %vm626_vm0, %v3932_v1, 0.0  ;;  %v3975_v8 = vsel %vm626_vm0, %v3933_v59, 0.0 }
 0x8a3   : > { %v3935_v28 = vmul.f32 %v8458_v49, %v8458_v49 }
 0x8a5   : > { %4846 = vmatmul.msk.f32.gmra.mxu3 %vm840_vm1, %v3607_v26  ;;  %v3964_v26 = vadd.f32 %v3963_v13, %v3962_v25 }
 0x8a7   : > { %v3966_v30 = vadd.f32 %v3965_v38, %v3964_v26 }
 0x8a8   : > { %v8325_v63 = vpop.f32.mrf.mxu3 }
 0x8a9   : > { %v3968_v10 = vadd.f32 %v3967_v21, %v3966_v30  ;;  %v8469_v29 = vadd.f32 %v8348_v54, %v8325_v63  ;;  %v3855_v63 = vsel %vm626_vm0, %v8458_v49, 0.0 }
 0x8ab   : > { %v3970_v19 = vadd.f32 %v3969_v32, %v3968_v10  ;;  %v3936_v55 = vmul.f32 %v8469_v29, %v8469_v29 }
 0x8ad   : > { %4847 = vmatmul.msk.f32.gmra.mxu3 %vm840_vm1, %v3608_v20  ;;  %v3842_v20 = vadd.f32 %v3841_v23, %v3840_v22  ;;  %v3972_v36 = vadd.f32 %v3971_v37, %v3970_v19  ;;  %v3977_v23 = vsel %vm626_vm0, %v3934_v2, 0.0 }
 0x8af   : > { %v3844_v27 = vadd.f32 %v3843_v0, %v3842_v20  ;;  %v3974_v52 = vadd.f32 %v3973_v51, %v3972_v36  ;;  %v3979_v0 = vsel %vm626_vm0, %v3935_v28, 0.0 }
 0x8b0   : > { %v8329_v4 = vpop.f32.mrf.mxu3 }
 0x8b1   : > { %v3846_v35 = vadd.f32 %v3845_v45, %v3844_v27  ;;  %v8478_v41 = vadd.f32 %v8348_v54, %v8329_v4  ;;  %v3976_v22 = vadd.f32 %v3975_v8, %v3974_v52  ;;  %v3857_v4 = vsel %vm626_vm0, %v8469_v29, 0.0 }
 0x8b3   : > { %v3848_v3 = vadd.f32 %v3847_v6, %v3846_v35  ;;  %v3937_v14 = vmul.f32 %v8478_v41, %v8478_v41  ;;  %v3978_v20 = vadd.f32 %v3977_v23, %v3976_v22  ;;  %v3859_v24 = vsel %vm626_vm0, %v8478_v41, 0.0 }
 0x8b5   : > { %v3850_v47 = vadd.f32 %v3849_v39, %v3848_v3  ;;  %v3980_v32 = vadd.f32 %v3979_v0, %v3978_v20 }
 0x8b7   : > { %v3852_v13 = vadd.f32 %v3851_v9, %v3850_v47 }
 0x8b8   : > { %v8331_v44 = vpop.f32.mrf.mxu3 }
 0x8b9   : > { %v8487_v25 = vadd.f32 %v8348_v54, %v8331_v44  ;;  %v3854_v38 = vadd.f32 %v3853_v12, %v3852_v13  ;;  %v3981_v44 = vsel %vm626_vm0, %v3936_v55, 0.0 }
 0x8ba   : > { %v3982_v37 = vadd.f32 %v3981_v44, %v3980_v32 }
 0x8bb   : > { %v3856_v21 = vadd.f32 %v3855_v63, %v3854_v38  ;;  %v3938_v30 = vmul.f32 %v8487_v25, %v8487_v25  ;;  %v3861_v1 = vsel %vm626_vm0, %v8487_v25, 0.0 }
 0x8bd   : > { %v3858_v6 = vadd.f32 %v3857_v4, %v3856_v21  ;;  %v3985_v59 = vsel %vm626_vm0, %v3938_v30, 0.0 }
 0x8bf   : > { %v3860_v39 = vadd.f32 %v3859_v24, %v3858_v6 }
 0x8c0   : > { %v8333_v16 = vpop.f32.mrf.mxu3 }
 0x8c1   : > { %v8496_v26 = vadd.f32 %v8348_v54, %v8333_v16  ;;  %v3983_v16 = vsel %vm626_vm0, %v3937_v14, 0.0  ;;  %v3862_v9 = vadd.f32 %v3861_v1, %v3860_v39 }
 0x8c2   : > { %v3984_v51 = vadd.f32 %v3983_v16, %v3982_v37 }
 0x8c3   : > { %v3939_v10 = vmul.f32 %v8496_v26, %v8496_v26 }
 0x8c4   : > { %v3986_v8 = vadd.f32 %v3985_v59, %v3984_v51 }
 0x8c5   : > { %v3987_v2 = vsel %vm626_vm0, %v3939_v10, 0.0 }
 0x8c6   : > { %v3988_v63 = vadd.f32 %v3987_v2, %v3986_v8 }
 0x8c8   : > { %v8335_v17 = vpop.f32.mrf.mxu3 }
 0x8c9   : > { %v8505_v27 = vadd.f32 %v8348_v54, %v8335_v17  ;;  %v3863_v17 = vsel %vm626_vm0, %v8496_v26, 0.0 }
 0x8ca   : > { %v3864_v12 = vadd.f32 %v3863_v17, %v3862_v9  ;;  %v3825_v9 = vld [vmem:[%s8991_s15 + $0x10] sm:$0xff] }
 0x8cb   : > { %v3940_v19 = vmul.f32 %v8505_v27, %v8505_v27 }
 0x8d0   : > { %v8337_v56 = vpop.f32.mrf.mxu3 }
 0x8d1   : > { %v8514_v35 = vadd.f32 %v8348_v54, %v8337_v56  ;;  %v3865_v56 = vsel %vm626_vm0, %v8505_v27, 0.0 }
 0x8d2   : > { %v3866_v55 = vadd.f32 %v3865_v56, %v3864_v12 }
 0x8d3   : > { %v3941_v36 = vmul.f32 %v8514_v35, %v8514_v35  ;;  %v3867_v52 = vsel %vm626_vm0, %v8514_v35, 0.0 }
 0x8d4   : > { %v3868_v14 = vadd.f32 %v3867_v52, %v3866_v55 }
 0x8d8   : > { %v8339_v5 = vpop.f32.mrf.mxu3 }
 0x8d9   : > { %v8523_v3 = vadd.f32 %v8348_v54, %v8339_v5  ;;  %v3989_v5 = vsel %vm626_vm0, %v3940_v19, 0.0 }
 0x8da   : > { %v3990_v4 = vadd.f32 %v3989_v5, %v3988_v63  ;;  %v3824_v5 = vld [vmem:[%s8991_s15 + $0x8] sm:$0xff] }
 0x8db   : > { %v3942_v13 = vmul.f32 %v8523_v3, %v8523_v3  ;;  %v3869_v22 = vsel %vm626_vm0, %v8523_v3, 0.0 }
 0x8dc   : > { %v3870_v30 = vadd.f32 %v3869_v22, %v3868_v14  ;;  %v3823_v22 = vld [vmem:[%s8991_s15] sm:$0xff] }
 0x8dd   : > { %v3993_v20 = vsel %vm626_vm0, %v3942_v13, 0.0 }
 0x8e0   : > { %v8341_v62 = vpop.f32.mrf.mxu3 }
 0x8e1   : > { %v8532_v47 = vadd.f32 %v8348_v54, %v8341_v62  ;;  %v3991_v62 = vsel %vm626_vm0, %v3941_v36, 0.0 }
 0x8e2   : > { %v3992_v24 = vadd.f32 %v3991_v62, %v3990_v4 }
 0x8e3   : > { %v3943_v38 = vmul.f32 %v8532_v47, %v8532_v47 }
 0x8e4   : > { %v3994_v1 = vadd.f32 %v3993_v20, %v3992_v24 }
 0x8e5   : > { %v3995_v32 = vsel %vm626_vm0, %v3943_v38, 0.0 }
 0x8e6   : > { %v3996_v19 = vadd.f32 %v3995_v32, %v3994_v1 }
 0x8e8   : > { %v8343_v34 = vpop.f32.mrf.mxu3 }
 0x8e9   : > { %v8541_v23 = vadd.f32 %v8348_v54, %v8343_v34  ;;  %v3871_v34 = vsel %vm626_vm0, %v8532_v47, 0.0 }
 0x8ea   : > { %v3872_v10 = vadd.f32 %v3871_v34, %v3870_v30 }
 0x8eb   : > { %v3944_v21 = vmul.f32 %v8541_v23, %v8541_v23 }
 0x8f0   : > { %v8356_v7 = vpop.f32.mrf.mxu3 }
 0x8f1   : > { %v8550_v0 = vadd.f32 %v8348_v54, %v8356_v7  ;;  %v3873_v7 = vsel %vm626_vm0, %v8541_v23, 0.0 }
 0x8f2   : > { %v3874_v51 = vadd.f32 %v3873_v7, %v3872_v10 }
 0x8f3   : > { %v3945_v6 = vmul.f32 %v8550_v0, %v8550_v0  ;;  %v3875_v39 = vsel %vm626_vm0, %v8550_v0, 0.0 }
 0x8f4   : > { %v3876_v12 = vadd.f32 %v3875_v39, %v3874_v51 }
 0x8f5   : > { %v3999_v2 = vsel %vm626_vm0, %v3945_v6, 0.0 }
 0x8f8   : > { %v8386_v48 = vpop.f32.mrf.mxu3 }
 0x8f9   : > { %v8559_v44 = vadd.f32 %v8348_v54, %v8386_v48  ;;  %v3997_v48 = vsel %vm626_vm0, %v3944_v21, 0.0 }
 0x8fa   : > { %v3998_v8 = vadd.f32 %v3997_v48, %v3996_v19 }
 0x8fb   : > { %v3946_v59 = vmul.f32 %v8559_v44, %v8559_v44  ;;  %v3877_v56 = vsel %vm626_vm0, %v8559_v44, 0.0 }
 0x8fc   : > { %v3878_v62 = vadd.f32 %v3877_v56, %v3876_v12 }
 0x8fd   : > { %v4001_v52 = vsel %vm626_vm0, %v3946_v59, 0.0 }
 0x900   : > { %v8422_v42 = vpop.f32.mrf.mxu3 }
 0x901   : > { %v8568_v16 = vadd.f32 %v8348_v54, %v8422_v42  ;;  %v3826_v42 = vld [vmem:[%s8991_s15 + $0x18] sm:$0xff] }
 0x902   : > { %3914 = vmatpush.msrb.mxu1 %v3826_v42 }
 0x903   : > { %v3947_v36 = vmul.f32 %v8568_v16, %v8568_v16  ;;  %v3879_v13 = vsel %vm626_vm0, %v8568_v16, 0.0 }
 0x904   : > { %3915 = vmatpush.msrb.mxu1 %v3825_v9  ;;  %v3880_v34 = vadd.f32 %v3879_v13, %v3878_v62 }
 0x905   : > { %v4003_v38 = vsel %vm626_vm0, %v3947_v36, 0.0 }
 0x906   : > { %3916 = vmatpush.msrb.mxu1 %v3824_v5 }
 0x908   : > { %v8460_v46 = vpop.f32.mrf.mxu3  ;;  %3917 = vmatpush.msrb.mxu1 %v3823_v22 }
 0x909   : > { %v8577_v17 = vadd.f32 %v8348_v54, %v8460_v46 }
 0x90a   : > { %4038 = vmatpush.msra.mxu1 %v3826_v42 }
 0x90b   : > { %v3948_v63 = vmul.f32 %v8577_v17, %v8577_v17  ;;  %v3881_v4 = vsel %vm626_vm0, %v8577_v17, 0.0 }
 0x90c   : > { %v3882_v1 = vadd.f32 %v3881_v4, %v3880_v34  ;;  %4039 = vmatpush.msra.mxu1 %v3825_v9 }
 0x90d   : > { %v4005_v24 = vsel %vm626_vm0, %v3948_v63, 0.0 }
 0x90e   : > { %4040 = vmatpush.msra.mxu1 %v3824_v5 }
 0x910   : > { %v3808_v45 = vpop.f32.mrf.mxu3  ;;  %4041 = vmatpush.msra.mxu1 %v3823_v22 }
 0x911   : > { %v8591_v46 = vadd.f32 %v8348_v54, %v3808_v45  ;;  %v4000_v45 = vadd.f32 %v3999_v2, %v3998_v8 }
 0x913   : > { %v3949_v14 = vmul.f32 %v8591_v46, %v8591_v46  ;;  %v3883_v30 = vsel %vm626_vm0, %v8591_v46, 0.0 }
 0x914   : > { %v3884_v59 = vadd.f32 %v3883_v30, %v3882_v1 }
 0x915   : > { %v4007_v10 = vsel %vm626_vm0, %v3949_v14, 0.0 }
 0x918   : > { %v3811_v28 = vpop.f32.mrf.mxu3 }
 0x919   : > { %v8602_v55 = vadd.f32 %v8348_v54, %v3811_v28  ;;  %v4002_v28 = vadd.f32 %v4001_v52, %v4000_v45 }
 0x91b   : > { %v3950_v32 = vmul.f32 %v8602_v55, %v8602_v55  ;;  %v4004_v6 = vadd.f32 %v4003_v38, %v4002_v28 }
 0x91d   : > { %v4006_v39 = vadd.f32 %v4005_v24, %v4004_v6  ;;  %v4009_v19 = vsel %vm626_vm0, %v3950_v32, 0.0 }
 0x91f   : > { %v4008_v42 = vadd.f32 %v4007_v10, %v4006_v39 }
 0x920   : > { %v3814_v37 = vpop.f32.mrf.mxu3 }
 0x921   : > { %v8613_v20 = vadd.f32 %v8348_v54, %v3814_v37  ;;  %v3885_v37 = vsel %vm626_vm0, %v8602_v55, 0.0  ;;  %v4010_v12 = vadd.f32 %v4009_v19, %v4008_v42 }
 0x922   : > { %v3886_v56 = vadd.f32 %v3885_v37, %v3884_v59  ;;  %v3827_v59 = vld [vmem:[%s9357_s19] sm:$0xf]  ;;  %s4387_s19 = sshll.u32 %s8823_s12, 4  ;;  %s4388_s19 = int_to_ptr.vmem [resolvable:$true] %s4387_s19 }
 0x923   : > { %v3951_v48 = vmul.f32 %v8613_v20, %v8613_v20  ;;  %v3887_v51 = vsel %vm626_vm0, %v8613_v20, 0.0 }
 0x924   : > { %v3888_v52 = vadd.f32 %v3887_v51, %v3886_v56 }
 0x925   : > { %v4011_v36 = vsel %vm626_vm0, %v3951_v48, 0.0 }
 0x926   : > { %v4012_v45 = vadd.f32 %v4011_v36, %v4010_v12 }
 0x928   : > { %v3817_v21 = vpop.f32.mrf.mxu3 }
 0x929   : > { %v8621_v7 = vadd.f32 %v8348_v54, %v3817_v21 }
 0x92b   : > { %v3952_v2 = vmul.f32 %v8621_v7, %v8621_v7  ;;  %v3889_v8 = vsel %vm626_vm0, %v8621_v7, 0.0 }
 0x92c   : > { %v3890_v62 = vadd.f32 %v3889_v8, %v3888_v52 }
 0x92d   : > { %v4013_v9 = vsel %vm626_vm0, %v3952_v2, 0.0 }
 0x92e   : > { %v4014_v4 = vadd.f32 %v4013_v9, %v4012_v45 }
 0x930   : > { %v3820_v13 = vpop.f32.mrf.mxu3 }
 0x931   : > { %v8638_v63 = vadd.f32 %v8348_v54, %v3820_v13 }
 0x933   : > { %v3891_v38 = vsel %vm626_vm0, %v8638_v63, 0.0  ;;  %v3953_v5 = vmul.f32 %v8638_v63, %v8638_v63 }
 0x934   : > { %v3892_v14 = vadd.f32 %v3891_v38, %v3890_v62 }
 0x935   : > { %v4015_v28 = vsel %vm626_vm0, %v3953_v5, 0.0 }
 0x936   : > { %v3893_v34 = vrot.slane %v3892_v14, 4  ;;  %v4016_v21 = vadd.f32 %v4015_v28, %v4014_v4 }
 0x938   : > { %v3894_v22 = vadd.f32 %v3893_v34, %v3892_v14  ;;  %v4017_v24 = vrot.slane %v4016_v21, 4 }
 0x93a   : > { %v3895_v30 = vrot.slane %v3894_v22, 2  ;;  %v4018_v32 = vadd.f32 %v4017_v24, %v4016_v21 }
 0x93c   : > { %v3896_v54 = vadd.f32 %v3895_v30, %v3894_v22  ;;  %v4019_v6 = vrot.slane %v4018_v32, 2 }
 0x93e   : > { %v3897_v1 = vrot.slane %v3896_v54, 1  ;;  %v4020_v37 = vadd.f32 %v4019_v6, %v4018_v32 }
 0x940   : > { %v3898_v10 = vadd.f32 %v3897_v1, %v3896_v54  ;;  %v4021_v48 = vrot.slane %v4020_v37, 1 }
 0x942   : > { %4848 = vmatmul.msk.f32.vlgmr.msrb.gmra.mxu1 %vm626_vm0, %v3898_v10  ;;  %v4022_v39 = vadd.f32 %v4021_v48, %v4020_v37 }
 0x943   : > { %4850 = vmatpush.msk.msrb.mxu1 %vm1065_vm2, %v3827_v59 }
 0x94a   : > { %4849 = vmatmul.msk.f32.vlgmr.msra.gmra.mxu1 %vm626_vm0, %v4022_v39 }
 0x94b   : > { %4852 = vmatpush.msk.msra.mxu1 %vm1065_vm2, %v3827_v59 }
 0x9bf   : > { %v3919_v19 = vpop.f32.mrf.mxu1 }
 0x9c0   : > { %v4046_v51 = vmul.f32 0.00048828125, %v3919_v19 }
 0x9c2   : > { %4851 = vmatmul.msk.f32.vlgmr.msrb.gmra.mxu1 %vm1061_vm3, %v4046_v51  ;;  %v4048_v42 = vmul.f32 %v4046_v51, %v4046_v51 }
 0x9c7   : > { %v4043_v2 = vpop.f32.mrf.mxu1 }
 0x9c8   : > { %v4047_v56 = vmul.f32 0.00048828125, %v4043_v2 }
 0x9ca   : > { %v4049_v36 = vsub.f32 %v4047_v56, %v4048_v42 }
 0x9cc   : > { %v4076_v8 = vadd.f32 1e-05, %v4049_v36 }
 0x9ce   : > { %4942 = vrsqrt.f32 %v4076_v8  ;;  %vm4083_vm15 = vweird.f32 %v4076_v8 }
 0x9d4   : > { %v4943_v12 = vpop.eup %4942 }
 0x9d5   : > { %v4078_v52 = vmul.f32 %v4943_v12, %v4076_v8  ;;  %vm4084_vm14 = vweird.f32 %v4943_v12 }
 0x9d6   : > { %vm4085_vm1 = vmor %vm4083_vm15, %vm4084_vm14 }
 0x9d7   : > { %v4079_v13 = vmul.f32 %v4943_v12, %v4078_v52 }
 0x9d9   : > { %v4080_v9 = vmul.f32 0.5, %v4079_v13 }
 0x9db   : > { %v4081_v45 = vsub.f32 1.5, %v4080_v9 }
 0x9dd   : > { %v4082_v62 = vmul.f32 %v4943_v12, %v4081_v45 }
 0x9df   : > { %v4086_v38 = vsel %vm4085_vm1, %v4943_v12, %v4082_v62 }
 0x9e0   : > { %4853 = vmatmul.msk.f32.vlgmr.msra.gmra.mxu1 %vm1061_vm3, %v4086_v38 }
 0xa3f   : > { %v4073_v5 = vpop.f32.mrf.mxu1 }
 0xa40   : > { %v8654_v4 = vperm.slane %v4073_v5, 0 }
 0xa42   : > { %v4111_v14 = vsub.f32 %v8354_v43, %v8654_v4  ;;  %v4112_v28 = vsub.f32 %v8351_v60, %v8654_v4  ;;  %v4113_v34 = vsub.f32 %v8359_v40, %v8654_v4  ;;  %v4114_v21 = vsub.f32 %v8364_v50, %v8654_v4 }
 0xa43   : > { %v4115_v22 = vsub.f32 %v8373_v53, %v8654_v4  ;;  %v4116_v24 = vsub.f32 %v8383_v58, %v8654_v4  ;;  %v4117_v30 = vsub.f32 %v8394_v18, %v8654_v4  ;;  %v4118_v43 = vsub.f32 %v8402_v33, %v8654_v4 }
 0xa44   : > { %v4119_v60 = vsub.f32 %v8411_v61, %v8654_v4  ;;  %v4120_v40 = vsub.f32 %v8420_v57, %v8654_v4  ;;  %v4121_v50 = vsub.f32 %v8431_v11, %v8654_v4  ;;  %v4122_v53 = vsub.f32 %v8440_v31, %v8654_v4 }
 0xa45   : > { %v4123_v58 = vsub.f32 %v8449_v15, %v8654_v4  ;;  %v4124_v18 = vsub.f32 %v8458_v49, %v8654_v4  ;;  %v4125_v33 = vsub.f32 %v8469_v29, %v8654_v4  ;;  %v4126_v61 = vsub.f32 %v8478_v41, %v8654_v4 }
 0xa46   : > { %v4127_v57 = vsub.f32 %v8487_v25, %v8654_v4  ;;  %v4128_v11 = vsub.f32 %v8496_v26, %v8654_v4  ;;  %v4129_v31 = vsub.f32 %v8505_v27, %v8654_v4  ;;  %v4130_v15 = vsub.f32 %v8514_v35, %v8654_v4 }
 0xa47   : > { %v4131_v49 = vsub.f32 %v8523_v3, %v8654_v4  ;;  %v4132_v29 = vsub.f32 %v8532_v47, %v8654_v4  ;;  %v4133_v41 = vsub.f32 %v8541_v23, %v8654_v4  ;;  %v4134_v25 = vsub.f32 %v8550_v0, %v8654_v4 }
 0xa48   : > { %v4135_v26 = vsub.f32 %v8559_v44, %v8654_v4  ;;  %v4136_v27 = vsub.f32 %v8568_v16, %v8654_v4  ;;  %v4137_v35 = vsub.f32 %v8577_v17, %v8654_v4  ;;  %v4138_v3 = vsub.f32 %v8591_v46, %v8654_v4 }
 0xa49   : > { %v4139_v47 = vsub.f32 %v8602_v55, %v8654_v4  ;;  %v4140_v23 = vsub.f32 %v8613_v20, %v8654_v4  ;;  %v4141_v0 = vsub.f32 %v8621_v7, %v8654_v4  ;;  %v4142_v44 = vsub.f32 %v8638_v63, %v8654_v4  ;;  %v8723_v7 = vld [vmem:[%s9358_s29] ss:$0 sm:$0xff]  ;;  %s5078_s29 = scalar_lea.hbm %s5077_s20, 256 }
 0xa4a   : > { %p5079_p1 = scmp.ne.s32.totalorder %s5077_s20, %s5078_s29 }
 0xa4c   : > { %p5080_p4 = pnand %p5079_p1, %p5299_p3 }
 0xa4e   : > { %p5081_p8 = pneg %p5080_p4 }
 0xa5d   : > { %v4107_v32 = vpop.f32.mrf.mxu1 }
 0xa5e   : > { %v4143_v54 = vperm.slane %v4107_v32, 0 }
 0xa60   : > { %v4144_v6 = vmul.f32 %v4143_v54, %v4111_v14  ;;  %v4145_v16 = vmul.f32 %v4143_v54, %v4112_v28  ;;  %v4146_v1 = vmul.f32 %v4143_v54, %v4113_v34  ;;  %v4147_v10 = vmul.f32 %v4143_v54, %v4114_v21  ;;  %v8728_v21 = vld [vmem:[%s9359_s0] ss:$0 sm:$0xff]  ;;  %s5082_s0 = scalar_lea.hbm %s9360_s22, 512 }
 0xa61   : > { %v4148_v17 = vmul.f32 %v4143_v54, %v4115_v22  ;;  %v4149_v37 = vmul.f32 %v4143_v54, %v4116_v24  ;;  %v4150_v48 = vmul.f32 %v4143_v54, %v4117_v30  ;;  %v4151_v46 = vmul.f32 %v4143_v54, %v4118_v43  ;;  %p5084_p9 = scmp.lt.s32.totalorder %s5082_s0, %s5078_s29 }
 0xa62   : > { %v4152_v39 = vmul.f32 %v4143_v54, %v4119_v60  ;;  %v4153_v59 = vmul.f32 %v4143_v54, %v4120_v40  ;;  %v4154_v55 = vmul.f32 %v4143_v54, %v4121_v50  ;;  %v4155_v19 = vmul.f32 %v4143_v54, %v4122_v53 }
 0xa63   : > { %v4156_v51 = vmul.f32 %v4143_v54, %v4123_v58  ;;  %v4157_v20 = vmul.f32 %v4143_v54, %v4124_v18  ;;  %v4158_v2 = vmul.f32 %v4143_v54, %v4125_v33  ;;  %v4159_v42 = vmul.f32 %v4143_v54, %v4126_v61  ;;  %p5085_p2 = por %p5084_p9, %p5083_p11 }
 0xa64   : > { %v4160_v63 = vmul.f32 %v4143_v54, %v4127_v57  ;;  %v4161_v56 = vmul.f32 %v4143_v54, %v4128_v11  ;;  %v4162_v36 = vmul.f32 %v4143_v54, %v4129_v31  ;;  %v4163_v8 = vmul.f32 %v4143_v54, %v4130_v15 }
 0xa65   : > { %v4164_v12 = vmul.f32 %v4143_v54, %v4131_v49  ;;  %v4165_v52 = vmul.f32 %v4143_v54, %v4132_v29  ;;  %v4166_v13 = vmul.f32 %v4143_v54, %v4133_v41  ;;  %v4167_v9 = vmul.f32 %v4143_v54, %v4134_v25  ;;  %p5086_p10 = pnand %p5085_p2, %p5081_p8 }
 0xa66   : > { %v4168_v45 = vmul.f32 %v4143_v54, %v4135_v26  ;;  %v4169_v62 = vmul.f32 %v4143_v54, %v4136_v27  ;;  %v4170_v38 = vmul.f32 %v4143_v54, %v4137_v35  ;;  %v4171_v5 = vmul.f32 %v4143_v54, %v4138_v3 }
 0xa67   : > { %v4172_v4 = vmul.f32 %v4143_v54, %v4139_v47  ;;  %v4173_v14 = vmul.f32 %v4143_v54, %v4140_v23  ;;  %v4174_v28 = vmul.f32 %v4143_v54, %v4141_v0  ;;  %v4175_v34 = vmul.f32 %v4143_v54, %v4142_v44 }
 0xa68   : > { %v4179_v22 = vmul.f32 %v8723_v7, %v4144_v6  ;;  %v4180_v24 = vmul.f32 %v8723_v7, %v4145_v16  ;;  %v4181_v30 = vmul.f32 %v8723_v7, %v4146_v1  ;;  %v4182_v43 = vmul.f32 %v8723_v7, %v4147_v10 }
 0xa69   : > { %v4183_v60 = vmul.f32 %v8723_v7, %v4148_v17  ;;  %v4184_v32 = vmul.f32 %v8723_v7, %v4149_v37  ;;  %v4185_v40 = vmul.f32 %v8723_v7, %v4150_v48  ;;  %v4186_v50 = vmul.f32 %v8723_v7, %v4151_v46 }
 0xa6a   : > { %v4187_v53 = vmul.f32 %v8723_v7, %v4152_v39  ;;  %v4188_v58 = vmul.f32 %v8723_v7, %v4153_v59  ;;  %v4189_v18 = vmul.f32 %v8723_v7, %v4154_v55  ;;  %v4190_v33 = vmul.f32 %v8723_v7, %v4155_v19 }
 0xa6b   : > { %v4191_v61 = vmul.f32 %v8723_v7, %v4156_v51  ;;  %v4192_v57 = vmul.f32 %v8723_v7, %v4157_v20  ;;  %v4193_v11 = vmul.f32 %v8723_v7, %v4158_v2  ;;  %v4194_v31 = vmul.f32 %v8723_v7, %v4159_v42 }
 0xa6c   : > { %v8747_v15 = vmul.f32 %v8723_v7, %v4160_v63  ;;  %v4214_v54 = vadd.f32 %v8728_v21, %v4179_v22  ;;  %v4215_v49 = vadd.f32 %v8728_v21, %v4180_v24  ;;  %v4216_v29 = vadd.f32 %v8728_v21, %v4181_v30  ;;  %v4974_v30 = vld [vmem:[%s5335_s16 + $0x20] sm:$0xff] }
 0xa6d   : > { %v8753_v41 = vmul.f32 %v8723_v7, %v4161_v56  ;;  %v8756_v25 = vmul.f32 %v8723_v7, %v4162_v36  ;;  %v8759_v26 = vmul.f32 %v8723_v7, %v4163_v8  ;;  %v4217_v27 = vadd.f32 %v8728_v21, %v4182_v43  ;;  %v4970_v8 = vld [vmem:[%s5335_s16] sm:$0xff] }
 0xa6e   : > { %v8763_v35 = vmul.f32 %v8723_v7, %v4164_v12  ;;  %v8766_v3 = vmul.f32 %v8723_v7, %v4165_v52  ;;  %v8769_v47 = vmul.f32 %v8723_v7, %v4166_v13  ;;  %v4218_v23 = vadd.f32 %v8728_v21, %v4183_v60  ;;  %v4971_v52 = vld [vmem:[%s5335_s16 + $0x8] sm:$0xff] }
 0xa6f   : > { %v8773_v0 = vmul.f32 %v8723_v7, %v4167_v9  ;;  %v8776_v44 = vmul.f32 %v8723_v7, %v4168_v45  ;;  %v8779_v6 = vmul.f32 %v8723_v7, %v4169_v62  ;;  %v4219_v16 = vadd.f32 %v8728_v21, %v4184_v32  ;;  %v4972_v9 = vld [vmem:[%s5335_s16 + $0x10] sm:$0xff] }
 0xa70   : > { %v4220_v1 = vadd.f32 %v8728_v21, %v4185_v40  ;;  %v4246_v10 = vmax.f32 %v4214_v54, 0.0  ;;  %v4247_v17 = vmax.f32 %v4215_v49, 0.0  ;;  %v4248_v37 = vmax.f32 %v4216_v29, 0.0  ;;  %v4977_v54 = vld [vmem:[%s5335_s16 + $0x38] sm:$0xff] }
 0xa71   : > { %v8784_v48 = vmul.f32 %v8723_v7, %v4170_v38  ;;  %v8787_v46 = vmul.f32 %v8723_v7, %v4171_v5  ;;  %v4221_v39 = vadd.f32 %v8728_v21, %v4186_v50  ;;  %v4249_v59 = vmax.f32 %v4217_v27, 0.0  ;;  %v4976_v50 = vld [vmem:[%s5335_s16 + $0x30] sm:$0xff] }
 0xa72   : > { %v8791_v55 = vmul.f32 %v8723_v7, %v4172_v4  ;;  %v8794_v19 = vmul.f32 %v8723_v7, %v4173_v14  ;;  %v4222_v51 = vadd.f32 %v8728_v21, %v4187_v53  ;;  %v4250_v20 = vmax.f32 %v4218_v23, 0.0  ;;  %v4973_v4 = vld [vmem:[%s5335_s16 + $0x18] sm:$0xff]  ;;  %v4978_v23 = vld [vmem:[%s5335_s16 + $0x40] sm:$0xff] }
 0xa73   : > { %v8798_v2 = vmul.f32 %v8723_v7, %v4174_v28  ;;  %v4223_v42 = vadd.f32 %v8728_v21, %v4188_v58  ;;  %v4224_v63 = vadd.f32 %v8728_v21, %v4189_v18  ;;  %v4251_v56 = vmax.f32 %v4219_v16, 0.0 }
 0xa74   : > { %v4252_v36 = vmax.f32 %v4220_v1, 0.0  ;;  %v4278_v12 = vadd.f32 %v4970_v8, %v4246_v10  ;;  %v4279_v13 = vadd.f32 %v4971_v52, %v4247_v17  ;;  %v4280_v45 = vadd.f32 %v4972_v9, %v4248_v37  ;;  %v4979_v17 = vld [vmem:[%s5335_s16 + $0x48] sm:$0xff]  ;;  %v4982_v52 = vld [vmem:[%s5335_s16 + $0x60] sm:$0xff] }
 0xa75   : > { %v8806_v62 = vmul.f32 %v8723_v7, %v4175_v34  ;;  %v4225_v38 = vadd.f32 %v8728_v21, %v4190_v33  ;;  %v4253_v5 = vmax.f32 %v4221_v39, 0.0  ;;  %v4281_v14 = vadd.f32 %v4973_v4, %v4249_v59  ;;  %v4975_v7 = vld [vmem:[%s5335_s16 + $0x28] sm:$0xff] }
 0xa76   : > { %v4226_v28 = vadd.f32 %v8728_v21, %v4191_v61  ;;  %v4227_v22 = vadd.f32 %v8728_v21, %v4192_v57  ;;  %v4254_v24 = vmax.f32 %v4222_v51, 0.0  ;;  %v4282_v43 = vadd.f32 %v4974_v30, %v4250_v20  ;;  %v4980_v51 = vld [vmem:[%s5335_s16 + $0x50] sm:$0xff] }
 0xa77   : > { %v4228_v60 = vadd.f32 %v8728_v21, %v4193_v11  ;;  %v4255_v32 = vmax.f32 %v4223_v42, 0.0  ;;  %v4256_v40 = vmax.f32 %v4224_v63, 0.0  ;;  %v4283_v34 = vadd.f32 %v4975_v7, %v4251_v56  ;;  %v4981_v56 = vld [vmem:[%s5335_s16 + $0x58] sm:$0xff]  ;;  %v4986_v7 = vld [vmem:[%s5335_s16 + $0x80] sm:$0xff] }
 0xa78   : > { %v4284_v53 = vadd.f32 %v4976_v50, %v4252_v36  ;;  %v4310_v58 = vmax.f32 %v4278_v12, 0.0  ;;  %v4311_v18 = vmax.f32 %v4279_v13, 0.0  ;;  %v4312_v33 = vmax.f32 %v4280_v45, 0.0 }
 0xa79   : > { %v4229_v61 = vadd.f32 %v8728_v21, %v4194_v31  ;;  %v4257_v57 = vmax.f32 %v4225_v38, 0.0  ;;  %v4285_v49 = vadd.f32 %v4977_v54, %v4253_v5  ;;  %v4313_v29 = vmax.f32 %v4281_v14, 0.0  ;;  %v4983_v38 = vld [vmem:[%s5335_s16 + $0x68] sm:$0xff] }
 0xa7a   : > { %v4230_v11 = vadd.f32 %v8728_v21, %v8747_v15  ;;  %v4258_v27 = vmax.f32 %v4226_v28, 0.0  ;;  %v4286_v16 = vadd.f32 %v4978_v23, %v4254_v24  ;;  %v4314_v1 = vmax.f32 %v4282_v43, 0.0  ;;  %4342 = vst.msk [vmem:[%s8823_s12] sm:$0xff] %vm626_vm0, %v4310_v58  ;;  %v4984_v28 = vld [vmem:[%s5335_s16 + $0x70] sm:$0xff]  ;;  %v4985_v43 = vld [vmem:[%s5335_s16 + $0x78] sm:$0xff]  ;;  %v4987_v58 = vld [vmem:[%s5335_s16 + $0x88] sm:$0xff] }
 0xa7b   : > { %v4231_v31 = vadd.f32 %v8728_v21, %v8753_v41  ;;  %v4259_v10 = vmax.f32 %v4227_v22, 0.0  ;;  %v4287_v15 = vadd.f32 %v4979_v17, %v4255_v32  ;;  %v4315_v37 = vmax.f32 %v4283_v34, 0.0  ;;  %4343 = vst.msk [vmem:[%s8823_s12 + $0x8] sm:$0xff] %vm626_vm0, %v4311_v18 }
 0xa7c   : > { %v4232_v39 = vadd.f32 %v8728_v21, %v8756_v25  ;;  %v4260_v59 = vmax.f32 %v4228_v60, 0.0  ;;  %v4288_v20 = vadd.f32 %v4980_v51, %v4256_v40  ;;  %v4316_v42 = vmax.f32 %v4284_v53, 0.0  ;;  %4344 = vst.msk [vmem:[%s8823_s12 + $0x10] sm:$0xff] %vm626_vm0, %v4312_v33  ;;  %v4992_v51 = vld [vmem:[%s5335_s16 + $0xb0] sm:$0xff] }
 0xa7d   : > { %v4233_v41 = vadd.f32 %v8728_v21, %v8759_v26  ;;  %v4261_v63 = vmax.f32 %v4229_v61, 0.0  ;;  %v4289_v36 = vadd.f32 %v4981_v56, %v4257_v57  ;;  %v4317_v8 = vmax.f32 %v4285_v49, 0.0  ;;  %4345 = vst.msk [vmem:[%s8823_s12 + $0x18] sm:$0xff] %vm626_vm0, %v4313_v29  ;;  %v4988_v57 = vld [vmem:[%s5335_s16 + $0x90] sm:$0xff] }
 0xa7e   : > { %v4234_v25 = vadd.f32 %v8728_v21, %v8763_v35  ;;  %v4262_v12 = vmax.f32 %v4230_v11, 0.0  ;;  %v4290_v13 = vadd.f32 %v4982_v52, %v4258_v27  ;;  %v4318_v9 = vmax.f32 %v4286_v16, 0.0  ;;  %4346 = vst.msk [vmem:[%s8823_s12 + $0x20] sm:$0xff] %vm626_vm0, %v4314_v1  ;;  %v4989_v11 = vld [vmem:[%s5335_s16 + $0x98] sm:$0xff]  ;;  %v4990_v1 = vld [vmem:[%s5335_s16 + $0xa0] sm:$0xff] }
 0xa7f   : > { %v4235_v26 = vadd.f32 %v8728_v21, %v8766_v3  ;;  %v4263_v45 = vmax.f32 %v4231_v31, 0.0  ;;  %v4291_v5 = vadd.f32 %v4983_v38, %v4259_v10  ;;  %v4319_v4 = vmax.f32 %v4287_v15, 0.0  ;;  %4347 = vst.msk [vmem:[%s8823_s12 + $0x28] sm:$0xff] %vm626_vm0, %v4315_v37  ;;  %v4991_v15 = vld [vmem:[%s5335_s16 + $0xa8] sm:$0xff] }
 0xa80   : > { %v4236_v35 = vadd.f32 %v8728_v21, %v8769_v47  ;;  %v4264_v14 = vmax.f32 %v4232_v39, 0.0  ;;  %v4292_v22 = vadd.f32 %v4984_v28, %v4260_v59  ;;  %v4320_v24 = vmax.f32 %v4288_v20, 0.0  ;;  %4348 = vst.msk [vmem:[%s8823_s12 + $0x30] sm:$0xff] %vm626_vm0, %v4316_v42  ;;  %v4998_v28 = vld [vmem:[%s5335_s16 + $0xe0] sm:$0xff] }
 0xa81   : > { %v4237_v3 = vadd.f32 %v8728_v21, %v8773_v0  ;;  %v4265_v30 = vmax.f32 %v4233_v41, 0.0  ;;  %v4293_v60 = vadd.f32 %v4985_v43, %v4261_v63  ;;  %v4321_v32 = vmax.f32 %v4289_v36, 0.0  ;;  %4349 = vst.msk [vmem:[%s8823_s12 + $0x38] sm:$0xff] %vm626_vm0, %v4317_v8  ;;  %v4993_v63 = vld [vmem:[%s5335_s16 + $0xb8] sm:$0xff]  ;;  %v4994_v8 = vld [vmem:[%s5335_s16 + $0xc0] sm:$0xff] }
 0xa82   : > { %v4238_v47 = vadd.f32 %v8728_v21, %v8776_v44  ;;  %v4266_v40 = vmax.f32 %v4234_v25, 0.0  ;;  %v4294_v34 = vadd.f32 %v4986_v7, %v4262_v12  ;;  %v4322_v50 = vmax.f32 %v4290_v13, 0.0  ;;  %4350 = vst.msk [vmem:[%s8823_s12 + $0x40] sm:$0xff] %vm626_vm0, %v4318_v9 }
 0xa83   : > { %v4239_v0 = vadd.f32 %v8728_v21, %v8779_v6  ;;  %v4267_v53 = vmax.f32 %v4235_v26, 0.0  ;;  %v4295_v18 = vadd.f32 %v4987_v58, %v4263_v45  ;;  %v4323_v33 = vmax.f32 %v4291_v5, 0.0  ;;  %4351 = vst.msk [vmem:[%s8823_s12 + $0x48] sm:$0xff] %vm626_vm0, %v4319_v4  ;;  %v4996_v26 = vld [vmem:[%s5335_s16 + $0xd0] sm:$0xff]  ;;  %v4997_v4 = vld [vmem:[%s5335_s16 + $0xd8] sm:$0xff] }
 0xa84   : > { %v4240_v44 = vadd.f32 %v8728_v21, %v8784_v48  ;;  %v4268_v61 = vmax.f32 %v4236_v35, 0.0  ;;  %v4296_v54 = vadd.f32 %v4988_v57, %v4264_v14  ;;  %v4324_v49 = vmax.f32 %v4292_v22, 0.0  ;;  %4352 = vst.msk [vmem:[%s8823_s12 + $0x50] sm:$0xff] %vm626_vm0, %v4320_v24 }
 0xa85   : > { %v4241_v6 = vadd.f32 %v8728_v21, %v8787_v46  ;;  %v4269_v29 = vmax.f32 %v4237_v3, 0.0  ;;  %v4297_v27 = vadd.f32 %v4989_v11, %v4265_v30  ;;  %v4325_v23 = vmax.f32 %v4293_v60, 0.0  ;;  %4353 = vst.msk [vmem:[%s8823_s12 + $0x58] sm:$0xff] %vm626_vm0, %v4321_v32  ;;  %v4999_v3 = vld [vmem:[%s5335_s16 + $0xe8] sm:$0xff]  ;;  %v5000_v60 = vld [vmem:[%s5335_s16 + $0xf0] sm:$0xff] }
 0xa86   : > { %v4242_v48 = vadd.f32 %v8728_v21, %v8791_v55  ;;  %v4270_v16 = vmax.f32 %v4238_v47, 0.0  ;;  %v4298_v31 = vadd.f32 %v4990_v1, %v4266_v40  ;;  %v4326_v10 = vmax.f32 %v4294_v34, 0.0  ;;  %4354 = vst.msk [vmem:[%s8823_s12 + $0x60] sm:$0xff] %vm626_vm0, %v4322_v50  ;;  %v5001_v40 = vld [vmem:[%s5335_s16 + $0xf8] sm:$0xff] }
 0xa87   : > { %v4243_v46 = vadd.f32 %v8728_v21, %v8794_v19  ;;  %v4271_v17 = vmax.f32 %v4239_v0, 0.0  ;;  %v4299_v37 = vadd.f32 %v4991_v15, %v4267_v53  ;;  %v4327_v39 = vmax.f32 %v4295_v18, 0.0  ;;  %4355 = vst.msk [vmem:[%s8823_s12 + $0x68] sm:$0xff] %vm626_vm0, %v4323_v33 }
 0xa88   : > { %v4244_v55 = vadd.f32 %v8728_v21, %v8798_v2  ;;  %v4272_v59 = vmax.f32 %v4240_v44, 0.0  ;;  %v4300_v20 = vadd.f32 %v4992_v51, %v4268_v61  ;;  %v4328_v42 = vmax.f32 %v4296_v54, 0.0  ;;  %4356 = vst.msk [vmem:[%s8823_s12 + $0x70] sm:$0xff] %vm626_vm0, %v4324_v49 }
 0xa89   : > { %v4245_v19 = vadd.f32 %v8728_v21, %v8806_v62  ;;  %v4273_v41 = vmax.f32 %v4241_v6, 0.0  ;;  %v4301_v56 = vadd.f32 %v4993_v63, %v4269_v29  ;;  %v4329_v36 = vmax.f32 %v4297_v27, 0.0  ;;  %4357 = vst.msk [vmem:[%s8823_s12 + $0x78] sm:$0xff] %vm626_vm0, %v4325_v23  ;;  %v4995_v21 = vld [vmem:[%s5335_s16 + $0xc8] sm:$0xff]  ;;  %s4375_s16 = scalar_lea.sflag [#allocation5], %s5329_s11 }
 0xa8a   : > { %v4274_v2 = vmax.f32 %v4242_v48, 0.0  ;;  %v4302_v25 = vadd.f32 %v4994_v8, %v4270_v16  ;;  %v4330_v12 = vmax.f32 %v4298_v31, 0.0  ;;  %4358 = vst.msk [vmem:[%s8823_s12 + $0x80] sm:$0xff] %vm626_vm0, %v4326_v10  ;;  %v4275_v52 = vmax.f32 %v4243_v46, 0.0 }
 0xa8b   : > { %v4303_v62 = vadd.f32 %v4995_v21, %v4271_v17  ;;  %v4331_v13 = vmax.f32 %v4299_v37, 0.0  ;;  %4359 = vst.msk [vmem:[%s8823_s12 + $0x88] sm:$0xff] %vm626_vm0, %v4327_v39  ;;  %v4276_v9 = vmax.f32 %v4244_v55, 0.0  ;;  %v4304_v45 = vadd.f32 %v4996_v26, %v4272_v59 }
 0xa8c   : > { %v4332_v38 = vmax.f32 %v4300_v20, 0.0  ;;  %4360 = vst.msk [vmem:[%s8823_s12 + $0x90] sm:$0xff] %vm626_vm0, %v4328_v42  ;;  %v4277_v5 = vmax.f32 %v4245_v19, 0.0  ;;  %v4305_v35 = vadd.f32 %v4997_v4, %v4273_v41  ;;  %v4333_v14 = vmax.f32 %v4301_v56, 0.0 }
 0xa8d   : > { %4361 = vst.msk [vmem:[%s8823_s12 + $0x98] sm:$0xff] %vm626_vm0, %v4329_v36  ;;  %v4306_v22 = vadd.f32 %v4998_v28, %v4274_v2  ;;  %v4334_v24 = vmax.f32 %v4302_v25, 0.0  ;;  %v4307_v30 = vadd.f32 %v4999_v3, %v4275_v52  ;;  %v4335_v43 = vmax.f32 %v4303_v62, 0.0 }
 0xa8e   : > { %4362 = vst.msk [vmem:[%s8823_s12 + $0xa0] sm:$0xff] %vm626_vm0, %v4330_v12  ;;  %v4308_v32 = vadd.f32 %v5000_v60, %v4276_v9  ;;  %v4336_v47 = vmax.f32 %v4304_v45, 0.0  ;;  %v4309_v7 = vadd.f32 %v5001_v40, %v4277_v5  ;;  %v4337_v34 = vmax.f32 %v4305_v35, 0.0 }
 0xa8f   : > { %4363 = vst.msk [vmem:[%s8823_s12 + $0xa8] sm:$0xff] %vm626_vm0, %v4331_v13  ;;  %v4338_v50 = vmax.f32 %v4306_v22, 0.0  ;;  %v4339_v0 = vmax.f32 %v4307_v30, 0.0 }
 0xa90   : > { %4364 = vst.msk [vmem:[%s8823_s12 + $0xb0] sm:$0xff] %vm626_vm0, %v4332_v38  ;;  %v4340_v53 = vmax.f32 %v4308_v32, 0.0  ;;  %v4341_v58 = vmax.f32 %v4309_v7, 0.0 }
 0xa91   : > { %4365 = vst.msk [vmem:[%s8823_s12 + $0xb8] sm:$0xff] %vm626_vm0, %v4333_v14 }
 0xa92   : > { %4366 = vst.msk [vmem:[%s8823_s12 + $0xc0] sm:$0xff] %vm626_vm0, %v4334_v24 }
 0xa93   : > { %4367 = vst.msk [vmem:[%s8823_s12 + $0xc8] sm:$0xff] %vm626_vm0, %v4335_v43 }
 0xa94   : > { %4368 = vst.msk [vmem:[%s8823_s12 + $0xd0] sm:$0xff] %vm626_vm0, %v4336_v47 }
 0xa95   : > { %4369 = vst.msk [vmem:[%s8823_s12 + $0xd8] sm:$0xff] %vm626_vm0, %v4337_v34 }
 0xa96   : > { %4370 = vst.msk [vmem:[%s8823_s12 + $0xe0] sm:$0xff] %vm626_vm0, %v4338_v50 }
 0xa97   : > { %4371 = vst.msk [vmem:[%s8823_s12 + $0xe8] sm:$0xff] %vm626_vm0, %v4339_v0 }
 0xa98   : > { %4372 = vst.msk [vmem:[%s8823_s12 + $0xf0] sm:$0xff] %vm626_vm0, %v4340_v53 }
 0xa99   : > { %4373 = vst.msk [vmem:[%s8823_s12 + $0xf8] sm:$0xff] %vm626_vm0, %v4341_v58 }
 0xa9a   : > { %5089 = shalt.err (!%p5086_p10)
}
 0xa9b   : > { %s5138_s11 = smov 128   ;;  %s5139_s12 = smov 8  }
 0xa9c   : > { %4873 = dma.vmem_to_hbm [thread:$0]  (%p5299_p3), %s4388_s19, 4096, %s4390_s23, %s4375_s16, %s5138_s11, %s5138_s11, %s5139_s12  }
 0xa9d PF: > { %s9361_s17 = sld [smem:[#allocation12_spill]]  ;;  %p9363_p12 = scmp.ge.s32.totalorder %s5132_s27, 2 }
 0xa9f   : > { %p4884_p13 = pnand %p9363_p12, %p5265_p6 }
 0xaa1   : > { %p4885_p0 = pneg %p4884_p13 }
 0xaa3   : > { %s4404_s1 = sand.u32 1, %s9361_s17  }
 0xaa4   : > { %s4405_s21 = scalar_lea.sflag [#allocation5], %s4404_s1 }
 0xaa5   : > { %5115 = dma.done.wait (%p4885_p0), %s4405_s21, 4096  }
 0xaa6   : > { %5117 = vsyncadd (%p4885_p0), %s4405_s21, 4294963200  ;;  %s9364_s27 = sld [smem:[#allocation15_spill]]  ;;  %s9367_s24 = smov %s5124_s25 }
 0xaa7   : > { %s9365_s20 = sld [smem:[#allocation13_spill]] }
 0xaa8   : > { %s9366_s26 = sld [smem:[#allocation16_spill]] }
 0xaac   : > { %p31_p5 = scmp.ge.s32.totalorder %s9364_s27, 4  }
 0xaad   : > { %s9368_s25 = smov %s9365_s20 }
 0xaae   :  { %33 = sbr.rel (!%p31_p5) target bundleno = 14 (0xe), region = 139 }
 0xab3   :  { %4411 = vsyncpa [#allocation4], 1 }
 0xab4   :  { %4413 = vsyncpa [#allocation4 + $0x1], 1 }
 0xab5   :  { %4414 = vsyncpa [#allocation7], 1 }
 0xab6   :  { %4415 = vsyncpa [#allocation5], 1 }
 0xab7   :  { %4417 = vsyncpa [#allocation5 + $0x1], 1 }

</bundles_post_ra>
